<compile_context>
chip_gen: v5e
topology: v5e:2x2
jax: 0.10.0
libtpu: 0.0.40
codegen_flags: <defaults>
</compile_context>

<pallas_src>
import jax
import jax.numpy as jnp
from jax.experimental import pallas as pl
from jax.experimental.pallas import tpu as pltpu

INPUT_DIM = 784
HIDDEN_DIM = 400
LATENT_DIM = 200
Z_DIM = 2
NEG_SLOPE = 0.2


def _leaky_relu(v):
    return jnp.where(v > 0, v, NEG_SLOPE * v)


def vae_kernel(
    x_ref, eps_ref,
    w1_ref, b1_ref,          # encoder linear 1: (784,400) bf16, (1,400) f32
    w2_ref, b2_ref,          # encoder linear 2: (400,200) bf16, (1,200) f32
    wh_ref, bh_ref,          # fused mean|logvar head: (200,4) bf16, (1,4) f32
    wd1_ref, bd1_ref,        # decoder linear 1: (2,200) bf16, (1,200) f32
    wd2_ref, bd2_ref,        # decoder linear 2: (200,400) bf16, (1,400) f32
    wd3_ref, bd3_ref,        # decoder linear 3: (400,784) bf16, (1,784) f32
    xhat_ref, mean_ref, logvar_ref,
):
    f32 = jnp.float32
    x = x_ref[...]

    # ---- encoder ----
    h1 = _leaky_relu(
        jnp.dot(x, w1_ref[...].astype(f32), preferred_element_type=f32) + b1_ref[...]
    )
    h2 = _leaky_relu(
        jnp.dot(h1, w2_ref[...].astype(f32), preferred_element_type=f32) + b2_ref[...]
    )

    # ---- fused mean / logvar head (one lane-denser matmul instead of two N=2) ----
    head = jnp.dot(h2, wh_ref[...].astype(f32), preferred_element_type=f32) + bh_ref[...]
    mean = head[:, 0:Z_DIM]
    logvar = head[:, Z_DIM:2 * Z_DIM]

    # reparameterization: z = mean + logvar * eps
    # (matches the PyTorch module literally, which passes logvar as "var")
    z = mean + logvar * eps_ref[...]

    # ---- decoder ----
    # layer 1 has K=2: cheaper as two VPU broadcast FMAs than an MXU matmul.
    wd1 = wd1_ref[...].astype(f32)
    d1 = _leaky_relu(
        z[:, 0:1] * wd1[0:1, :] + z[:, 1:2] * wd1[1:2, :] + bd1_ref[...]
    )
    d2 = _leaky_relu(
        jnp.dot(d1, wd2_ref[...].astype(f32), preferred_element_type=f32) + bd2_ref[...]
    )
    logits = (
        jnp.dot(d2, wd3_ref[...].astype(f32), preferred_element_type=f32) + bd3_ref[...]
    )

    xhat_ref[...] = jax.nn.sigmoid(logits)
    mean_ref[...] = mean
    logvar_ref[...] = logvar


def vae_forward(x, eps, params, *, block_b=128):
    B = x.shape[0]
    tb = B if B < block_b else block_b          # batch tile (multiple of 8 or == B)
    grid = (pl.cdiv(B, tb),)

    # Weights/biases: full-array blocks with a constant index_map so they are
    # fetched once and stay resident in VMEM across all batch tiles.
    weight_specs = [pl.BlockSpec(p.shape, lambda i: (0, 0)) for p in params]

    return pl.pallas_call(
        vae_kernel,
        out_shape=(
            jax.ShapeDtypeStruct((B, INPUT_DIM), jnp.float32),  # x_hat
            jax.ShapeDtypeStruct((B, Z_DIM), jnp.float32),      # mean
            jax.ShapeDtypeStruct((B, Z_DIM), jnp.float32),      # logvar
        ),
        grid=grid,
        in_specs=[
            pl.BlockSpec((tb, INPUT_DIM), lambda i: (i, 0)),    # x
            pl.BlockSpec((tb, Z_DIM), lambda i: (i, 0)),        # eps
            *weight_specs,
        ],
        out_specs=(
            pl.BlockSpec((tb, INPUT_DIM), lambda i: (i, 0)),
            pl.BlockSpec((tb, Z_DIM), lambda i: (i, 0)),
            pl.BlockSpec((tb, Z_DIM), lambda i: (i, 0)),
        ),
        compiler_params=pltpu.CompilerParams(
            dimension_semantics=("parallel",),                  # megacore sharding
            vmem_limit_bytes=16 * 1024 * 1024,                  # ample; weights ~1.6 MiB
        ),
    )(x, eps, *params)


def init_params(key):
    """Deterministic PyTorch-style init: U(-1/sqrt(fan_in), 1/sqrt(fan_in)).

    Weights are stored transposed to (in, out) and cast to bf16 (halves the
    weight-DMA cost); biases stay f32 as (1, out). The mean/logvar head
    weights are concatenated into a single (latent, 4) matrix.
    """
    def linear(k, fan_in, fan_out):
        kw, kb = jax.random.split(k)
        bound = float(fan_in) ** -0.5
        w = jax.random.uniform(kw, (fan_in, fan_out), jnp.float32, -bound, bound)
        b = jax.random.uniform(kb, (1, fan_out), jnp.float32, -bound, bound)
        return w, b

    keys = jax.random.split(key, 7)
    w1, b1 = linear(keys[0], INPUT_DIM, HIDDEN_DIM)     # encoder 1
    w2, b2 = linear(keys[1], HIDDEN_DIM, LATENT_DIM)    # encoder 2
    wm, bm = linear(keys[2], LATENT_DIM, Z_DIM)         # mean head
    wl, bl = linear(keys[3], LATENT_DIM, Z_DIM)         # logvar head
    wd1, bd1 = linear(keys[4], Z_DIM, LATENT_DIM)       # decoder 1
    wd2, bd2 = linear(keys[5], LATENT_DIM, HIDDEN_DIM)  # decoder 2
    wd3, bd3 = linear(keys[6], HIDDEN_DIM, INPUT_DIM)   # decoder 3

    wh = jnp.concatenate([wm, wl], axis=1)              # (200, 4)
    bh = jnp.concatenate([bm, bl], axis=1)              # (1, 4)

    bf16 = lambda w: w.astype(jnp.bfloat16)
    return [
        bf16(w1), b1,
        bf16(w2), b2,
        bf16(wh), bh,
        bf16(wd1), bd1,
        bf16(wd2), bd2,
        bf16(wd3), bd3,
    ]


def vae_reference(x, eps, params):
    """Plain-JAX reference of the same forward pass (for sanity check)."""
    (w1, b1, w2, b2, wh, bh, wd1, bd1, wd2, bd2, wd3, bd3) = params
    f32 = lambda w: w.astype(jnp.float32)
    h1 = _leaky_relu(x @ f32(w1) + b1)
    h2 = _leaky_relu(h1 @ f32(w2) + b2)
    head = h2 @ f32(wh) + bh
    mean, logvar = head[:, :Z_DIM], head[:, Z_DIM:]
    z = mean + logvar * eps
    d1 = _leaky_relu(z @ f32(wd1) + bd1)
    d2 = _leaky_relu(d1 @ f32(wd2) + bd2)
    x_hat = jax.nn.sigmoid(d2 @ f32(wd3) + bd3)
    return x_hat, mean, logvar


if __name__ == "__main__":
    key = jax.random.PRNGKey(0)
    k_params, k_x, k_eps = jax.random.split(key, 3)

    B = 8
    params = init_params(k_params)
    x = jax.random.uniform(k_x, (B, INPUT_DIM), jnp.float32)  # MNIST-like pixels in [0,1)
    # TODO(synk): epsilon ~ N(0,1) is sampled outside the kernel (torch.randn_like
    # equivalent); in-kernel pltpu PRNG would change the random stream.
    eps = jax.random.normal(k_eps, (B, Z_DIM), jnp.float32)

    x_hat, mean, logvar = jax.block_until_ready(vae_forward(x, eps, params))

    # sanity check against plain-JAX reference
    r_xhat, r_mean, r_logvar = vae_reference(x, eps, params)
    assert jnp.allclose(x_hat, r_xhat, atol=1e-5, rtol=1e-5)
    assert jnp.allclose(mean, r_mean, atol=1e-5, rtol=1e-5)
    assert jnp.allclose(logvar, r_logvar, atol=1e-5, rtol=1e-5)

    print("KERNEL_OK")
</pallas_src>

<mosaic_0001>
module attributes {stable_mosaic.version = 11 : i64} {
  func.func @vae_kernel(%arg0: i32, %arg1: memref<8x784xf32, #tpu.memory_space<vmem>>, %arg2: memref<8x2xf32, #tpu.memory_space<vmem>>, %arg3: memref<784x400xbf16, #tpu.memory_space<vmem>>, %arg4: memref<1x400xf32, #tpu.memory_space<vmem>>, %arg5: memref<400x200xbf16, #tpu.memory_space<vmem>>, %arg6: memref<1x200xf32, #tpu.memory_space<vmem>>, %arg7: memref<200x4xbf16, #tpu.memory_space<vmem>>, %arg8: memref<1x4xf32, #tpu.memory_space<vmem>>, %arg9: memref<2x200xbf16, #tpu.memory_space<vmem>>, %arg10: memref<1x200xf32, #tpu.memory_space<vmem>>, %arg11: memref<200x400xbf16, #tpu.memory_space<vmem>>, %arg12: memref<1x400xf32, #tpu.memory_space<vmem>>, %arg13: memref<400x784xbf16, #tpu.memory_space<vmem>>, %arg14: memref<1x784xf32, #tpu.memory_space<vmem>>, %arg15: memref<8x784xf32, #tpu.memory_space<vmem>>, %arg16: memref<8x2xf32, #tpu.memory_space<vmem>>, %arg17: memref<8x2xf32, #tpu.memory_space<vmem>>) attributes {dimension_semantics = [#tpu.dimension_semantics<parallel>], iteration_bounds = array<i64: 1>, scalar_prefetch = 0 : i64, scratch_operands = 0 : i64, tpu.core_type = #tpu.core_type<tc>, window_params = [{transform_indices = @transform_0, window_bounds = array<i64: 8, 784>}, {transform_indices = @transform_1, window_bounds = array<i64: 8, 2>}, {pipeline_mode = #tpu.pipeline_mode<synchronous>, transform_indices = @transform_2, window_bounds = array<i64: 784, 400>}, {pipeline_mode = #tpu.pipeline_mode<synchronous>, transform_indices = @transform_3, window_bounds = array<i64: 1, 400>}, {pipeline_mode = #tpu.pipeline_mode<synchronous>, transform_indices = @transform_4, window_bounds = array<i64: 400, 200>}, {pipeline_mode = #tpu.pipeline_mode<synchronous>, transform_indices = @transform_5, window_bounds = array<i64: 1, 200>}, {pipeline_mode = #tpu.pipeline_mode<synchronous>, transform_indices = @transform_6, window_bounds = array<i64: 200, 4>}, {pipeline_mode = #tpu.pipeline_mode<synchronous>, transform_indices = @transform_7, window_bounds = array<i64: 1, 4>}, {pipeline_mode = #tpu.pipeline_mode<synchronous>, transform_indices = @transform_8, window_bounds = array<i64: 2, 200>}, {pipeline_mode = #tpu.pipeline_mode<synchronous>, transform_indices = @transform_9, window_bounds = array<i64: 1, 200>}, {pipeline_mode = #tpu.pipeline_mode<synchronous>, transform_indices = @transform_10, window_bounds = array<i64: 200, 400>}, {pipeline_mode = #tpu.pipeline_mode<synchronous>, transform_indices = @transform_11, window_bounds = array<i64: 1, 400>}, {pipeline_mode = #tpu.pipeline_mode<synchronous>, transform_indices = @transform_12, window_bounds = array<i64: 400, 784>}, {pipeline_mode = #tpu.pipeline_mode<synchronous>, transform_indices = @transform_13, window_bounds = array<i64: 1, 784>}, {transform_indices = @transform_14, window_bounds = array<i64: 8, 784>}, {transform_indices = @transform_15, window_bounds = array<i64: 8, 2>}, {transform_indices = @transform_16, window_bounds = array<i64: 8, 2>}]} {
    %c0 = arith.constant 0 : index
    %c0_0 = arith.constant 0 : index
    %0 = vector.load %arg1[%c0, %c0_0] : memref<8x784xf32, #tpu.memory_space<vmem>>, vector<8x784xf32>
    %c0_1 = arith.constant 0 : index
    %c0_2 = arith.constant 0 : index
    %1 = vector.load %arg3[%c0_1, %c0_2] : memref<784x400xbf16, #tpu.memory_space<vmem>>, vector<784x400xbf16>
    %2 = arith.extf %1 : vector<784x400xbf16> to vector<784x400xf32>
    %cst = arith.constant dense<0.000000e+00> : vector<8x400xf32>
    %3 = tpu.matmul %0, %2, %cst {dimension_numbers = #tpu.dot_dimension_numbers<[1], [0], [0], [1], [0, 0, 1, 1], [], []>} : vector<8x784xf32>, vector<784x400xf32>, vector<8x400xf32> -> vector<8x400xf32>
    %c0_3 = arith.constant 0 : index
    %c0_4 = arith.constant 0 : index
    %4 = vector.load %arg4[%c0_3, %c0_4] : memref<1x400xf32, #tpu.memory_space<vmem>>, vector<1x400xf32>
    %5 = vector.broadcast %4 : vector<1x400xf32> to vector<8x400xf32>
    %6 = arith.addf %3, %5 : vector<8x400xf32>
    %cst_5 = arith.constant 0.000000e+00 : f32
    %7 = vector.broadcast %cst_5 : f32 to vector<8x400xf32>
    %8 = arith.cmpf ogt, %6, %7 : vector<8x400xf32>
    %cst_6 = arith.constant 2.000000e-01 : f32
    %9 = vector.broadcast %cst_6 : f32 to vector<8x400xf32>
    %10 = arith.mulf %9, %6 : vector<8x400xf32>
    %11 = arith.select %8, %6, %10 : vector<8x400xi1>, vector<8x400xf32>
    %c0_7 = arith.constant 0 : index
    %c0_8 = arith.constant 0 : index
    %12 = vector.load %arg5[%c0_7, %c0_8] : memref<400x200xbf16, #tpu.memory_space<vmem>>, vector<400x200xbf16>
    %13 = arith.extf %12 : vector<400x200xbf16> to vector<400x200xf32>
    %cst_9 = arith.constant dense<0.000000e+00> : vector<8x200xf32>
    %14 = tpu.matmul %11, %13, %cst_9 {dimension_numbers = #tpu.dot_dimension_numbers<[1], [0], [0], [1], [0, 0, 1, 1], [], []>} : vector<8x400xf32>, vector<400x200xf32>, vector<8x200xf32> -> vector<8x200xf32>
    %c0_10 = arith.constant 0 : index
    %c0_11 = arith.constant 0 : index
    %15 = vector.load %arg6[%c0_10, %c0_11] : memref<1x200xf32, #tpu.memory_space<vmem>>, vector<1x200xf32>
    %16 = vector.broadcast %15 : vector<1x200xf32> to vector<8x200xf32>
    %17 = arith.addf %14, %16 : vector<8x200xf32>
    %cst_12 = arith.constant 0.000000e+00 : f32
    %18 = vector.broadcast %cst_12 : f32 to vector<8x200xf32>
    %19 = arith.cmpf ogt, %17, %18 : vector<8x200xf32>
    %cst_13 = arith.constant 2.000000e-01 : f32
    %20 = vector.broadcast %cst_13 : f32 to vector<8x200xf32>
    %21 = arith.mulf %20, %17 : vector<8x200xf32>
    %22 = arith.select %19, %17, %21 : vector<8x200xi1>, vector<8x200xf32>
    %c0_14 = arith.constant 0 : index
    %c0_15 = arith.constant 0 : index
    %23 = vector.load %arg7[%c0_14, %c0_15] : memref<200x4xbf16, #tpu.memory_space<vmem>>, vector<200x4xbf16>
    %24 = arith.extf %23 : vector<200x4xbf16> to vector<200x4xf32>
    %cst_16 = arith.constant dense<0.000000e+00> : vector<8x4xf32>
    %25 = tpu.matmul %22, %24, %cst_16 {dimension_numbers = #tpu.dot_dimension_numbers<[1], [0], [0], [1], [0, 0, 1, 1], [], []>} : vector<8x200xf32>, vector<200x4xf32>, vector<8x4xf32> -> vector<8x4xf32>
    %c0_17 = arith.constant 0 : index
    %c0_18 = arith.constant 0 : index
    %26 = vector.load %arg8[%c0_17, %c0_18] : memref<1x4xf32, #tpu.memory_space<vmem>>, vector<1x4xf32>
    %27 = vector.broadcast %26 : vector<1x4xf32> to vector<8x4xf32>
    %28 = arith.addf %25, %27 : vector<8x4xf32>
    %29 = vector.extract_strided_slice %28 {offsets = [0, 0], sizes = [8, 2], strides = [1, 1]} : vector<8x4xf32> to vector<8x2xf32>
    %30 = vector.extract_strided_slice %28 {offsets = [0, 2], sizes = [8, 2], strides = [1, 1]} : vector<8x4xf32> to vector<8x2xf32>
    %c0_19 = arith.constant 0 : index
    %c0_20 = arith.constant 0 : index
    %31 = vector.load %arg2[%c0_19, %c0_20] : memref<8x2xf32, #tpu.memory_space<vmem>>, vector<8x2xf32>
    %32 = arith.mulf %30, %31 : vector<8x2xf32>
    %33 = arith.addf %29, %32 : vector<8x2xf32>
    %c0_21 = arith.constant 0 : index
    %c0_22 = arith.constant 0 : index
    %34 = vector.load %arg9[%c0_21, %c0_22] : memref<2x200xbf16, #tpu.memory_space<vmem>>, vector<2x200xbf16>
    %35 = arith.extf %34 : vector<2x200xbf16> to vector<2x200xf32>
    %36 = vector.extract_strided_slice %33 {offsets = [0, 0], sizes = [8, 1], strides = [1, 1]} : vector<8x2xf32> to vector<8x1xf32>
    %37 = vector.extract_strided_slice %35 {offsets = [0, 0], sizes = [1, 200], strides = [1, 1]} : vector<2x200xf32> to vector<1x200xf32>
    %38 = vector.broadcast %36 : vector<8x1xf32> to vector<8x200xf32>
    %39 = vector.broadcast %37 : vector<1x200xf32> to vector<8x200xf32>
    %40 = arith.mulf %38, %39 : vector<8x200xf32>
    %41 = vector.extract_strided_slice %33 {offsets = [0, 1], sizes = [8, 1], strides = [1, 1]} : vector<8x2xf32> to vector<8x1xf32>
    %42 = vector.extract_strided_slice %35 {offsets = [1, 0], sizes = [1, 200], strides = [1, 1]} : vector<2x200xf32> to vector<1x200xf32>
    %43 = vector.broadcast %41 : vector<8x1xf32> to vector<8x200xf32>
    %44 = vector.broadcast %42 : vector<1x200xf32> to vector<8x200xf32>
    %45 = arith.mulf %43, %44 : vector<8x200xf32>
    %46 = arith.addf %40, %45 : vector<8x200xf32>
    %c0_23 = arith.constant 0 : index
    %c0_24 = arith.constant 0 : index
    %47 = vector.load %arg10[%c0_23, %c0_24] : memref<1x200xf32, #tpu.memory_space<vmem>>, vector<1x200xf32>
    %48 = vector.broadcast %47 : vector<1x200xf32> to vector<8x200xf32>
    %49 = arith.addf %46, %48 : vector<8x200xf32>
    %cst_25 = arith.constant 0.000000e+00 : f32
    %50 = vector.broadcast %cst_25 : f32 to vector<8x200xf32>
    %51 = arith.cmpf ogt, %49, %50 : vector<8x200xf32>
    %cst_26 = arith.constant 2.000000e-01 : f32
    %52 = vector.broadcast %cst_26 : f32 to vector<8x200xf32>
    %53 = arith.mulf %52, %49 : vector<8x200xf32>
    %54 = arith.select %51, %49, %53 : vector<8x200xi1>, vector<8x200xf32>
    %c0_27 = arith.constant 0 : index
    %c0_28 = arith.constant 0 : index
    %55 = vector.load %arg11[%c0_27, %c0_28] : memref<200x400xbf16, #tpu.memory_space<vmem>>, vector<200x400xbf16>
    %56 = arith.extf %55 : vector<200x400xbf16> to vector<200x400xf32>
    %cst_29 = arith.constant dense<0.000000e+00> : vector<8x400xf32>
    %57 = tpu.matmul %54, %56, %cst_29 {dimension_numbers = #tpu.dot_dimension_numbers<[1], [0], [0], [1], [0, 0, 1, 1], [], []>} : vector<8x200xf32>, vector<200x400xf32>, vector<8x400xf32> -> vector<8x400xf32>
    %c0_30 = arith.constant 0 : index
    %c0_31 = arith.constant 0 : index
    %58 = vector.load %arg12[%c0_30, %c0_31] : memref<1x400xf32, #tpu.memory_space<vmem>>, vector<1x400xf32>
    %59 = vector.broadcast %58 : vector<1x400xf32> to vector<8x400xf32>
    %60 = arith.addf %57, %59 : vector<8x400xf32>
    %cst_32 = arith.constant 0.000000e+00 : f32
    %61 = vector.broadcast %cst_32 : f32 to vector<8x400xf32>
    %62 = arith.cmpf ogt, %60, %61 : vector<8x400xf32>
    %cst_33 = arith.constant 2.000000e-01 : f32
    %63 = vector.broadcast %cst_33 : f32 to vector<8x400xf32>
    %64 = arith.mulf %63, %60 : vector<8x400xf32>
    %65 = arith.select %62, %60, %64 : vector<8x400xi1>, vector<8x400xf32>
    %c0_34 = arith.constant 0 : index
    %c0_35 = arith.constant 0 : index
    %66 = vector.load %arg13[%c0_34, %c0_35] : memref<400x784xbf16, #tpu.memory_space<vmem>>, vector<400x784xbf16>
    %67 = arith.extf %66 : vector<400x784xbf16> to vector<400x784xf32>
    %cst_36 = arith.constant dense<0.000000e+00> : vector<8x784xf32>
    %68 = tpu.matmul %65, %67, %cst_36 {dimension_numbers = #tpu.dot_dimension_numbers<[1], [0], [0], [1], [0, 0, 1, 1], [], []>} : vector<8x400xf32>, vector<400x784xf32>, vector<8x784xf32> -> vector<8x784xf32>
    %c0_37 = arith.constant 0 : index
    %c0_38 = arith.constant 0 : index
    %69 = vector.load %arg14[%c0_37, %c0_38] : memref<1x784xf32, #tpu.memory_space<vmem>>, vector<1x784xf32>
    %70 = vector.broadcast %69 : vector<1x784xf32> to vector<8x784xf32>
    %71 = arith.addf %68, %70 : vector<8x784xf32>
    %72 = arith.negf %71 : vector<8x784xf32>
    %73 = math.exp %72 : vector<8x784xf32>
    %cst_39 = arith.constant 1.000000e+00 : f32
    %74 = vector.broadcast %cst_39 : f32 to vector<8x784xf32>
    %75 = arith.addf %74, %73 : vector<8x784xf32>
    %76 = arith.divf %74, %75 : vector<8x784xf32>
    %c0_40 = arith.constant 0 : index
    %c0_41 = arith.constant 0 : index
    %77 = vector.load %arg15[%c0_40, %c0_41] : memref<8x784xf32, #tpu.memory_space<vmem>>, vector<8x784xf32>
    tpu.vector_store %arg15[%c0_40, %c0_41], %76 {strides = array<i32>} : memref<8x784xf32, #tpu.memory_space<vmem>>, vector<8x784xf32>,
    %c0_42 = arith.constant 0 : index
    %c0_43 = arith.constant 0 : index
    %78 = vector.load %arg16[%c0_42, %c0_43] : memref<8x2xf32, #tpu.memory_space<vmem>>, vector<8x2xf32>
    tpu.vector_store %arg16[%c0_42, %c0_43], %29 {strides = array<i32>} : memref<8x2xf32, #tpu.memory_space<vmem>>, vector<8x2xf32>,
    %c0_44 = arith.constant 0 : index
    %c0_45 = arith.constant 0 : index
    %79 = vector.load %arg17[%c0_44, %c0_45] : memref<8x2xf32, #tpu.memory_space<vmem>>, vector<8x2xf32>
    tpu.vector_store %arg17[%c0_44, %c0_45], %30 {strides = array<i32>} : memref<8x2xf32, #tpu.memory_space<vmem>>, vector<8x2xf32>,
    return
  }
  func.func @transform_0(%arg0: i32) -> (i32, i32) {
    %c0_i32 = arith.constant 0 : i32
    %c0_i32_0 = arith.constant 0 : i32
    return %arg0, %c0_i32 : i32, i32
  }
  func.func @transform_1(%arg0: i32) -> (i32, i32) {
    %c0_i32 = arith.constant 0 : i32
    %c0_i32_0 = arith.constant 0 : i32
    return %arg0, %c0_i32 : i32, i32
  }
  func.func @transform_2(%arg0: i32) -> (i32, i32) {
    %c0_i32 = arith.constant 0 : i32
    %c0_i32_0 = arith.constant 0 : i32
    %c0_i32_1 = arith.constant 0 : i32
    return %c0_i32, %c0_i32_0 : i32, i32
  }
  func.func @transform_3(%arg0: i32) -> (i32, i32) {
    %c0_i32 = arith.constant 0 : i32
    %c0_i32_0 = arith.constant 0 : i32
    %c0_i32_1 = arith.constant 0 : i32
    return %c0_i32, %c0_i32_0 : i32, i32
  }
  func.func @transform_4(%arg0: i32) -> (i32, i32) {
    %c0_i32 = arith.constant 0 : i32
    %c0_i32_0 = arith.constant 0 : i32
    %c0_i32_1 = arith.constant 0 : i32
    return %c0_i32, %c0_i32_0 : i32, i32
  }
  func.func @transform_5(%arg0: i32) -> (i32, i32) {
    %c0_i32 = arith.constant 0 : i32
    %c0_i32_0 = arith.constant 0 : i32
    %c0_i32_1 = arith.constant 0 : i32
    return %c0_i32, %c0_i32_0 : i32, i32
  }
  func.func @transform_6(%arg0: i32) -> (i32, i32) {
    %c0_i32 = arith.constant 0 : i32
    %c0_i32_0 = arith.constant 0 : i32
    %c0_i32_1 = arith.constant 0 : i32
    return %c0_i32, %c0_i32_0 : i32, i32
  }
  func.func @transform_7(%arg0: i32) -> (i32, i32) {
    %c0_i32 = arith.constant 0 : i32
    %c0_i32_0 = arith.constant 0 : i32
    %c0_i32_1 = arith.constant 0 : i32
    return %c0_i32, %c0_i32_0 : i32, i32
  }
  func.func @transform_8(%arg0: i32) -> (i32, i32) {
    %c0_i32 = arith.constant 0 : i32
    %c0_i32_0 = arith.constant 0 : i32
    %c0_i32_1 = arith.constant 0 : i32
    return %c0_i32, %c0_i32_0 : i32, i32
  }
  func.func @transform_9(%arg0: i32) -> (i32, i32) {
    %c0_i32 = arith.constant 0 : i32
    %c0_i32_0 = arith.constant 0 : i32
    %c0_i32_1 = arith.constant 0 : i32
    return %c0_i32, %c0_i32_0 : i32, i32
  }
  func.func @transform_10(%arg0: i32) -> (i32, i32) {
    %c0_i32 = arith.constant 0 : i32
    %c0_i32_0 = arith.constant 0 : i32
    %c0_i32_1 = arith.constant 0 : i32
    return %c0_i32, %c0_i32_0 : i32, i32
  }
  func.func @transform_11(%arg0: i32) -> (i32, i32) {
    %c0_i32 = arith.constant 0 : i32
    %c0_i32_0 = arith.constant 0 : i32
    %c0_i32_1 = arith.constant 0 : i32
    return %c0_i32, %c0_i32_0 : i32, i32
  }
  func.func @transform_12(%arg0: i32) -> (i32, i32) {
    %c0_i32 = arith.constant 0 : i32
    %c0_i32_0 = arith.constant 0 : i32
    %c0_i32_1 = arith.constant 0 : i32
    return %c0_i32, %c0_i32_0 : i32, i32
  }
  func.func @transform_13(%arg0: i32) -> (i32, i32) {
    %c0_i32 = arith.constant 0 : i32
    %c0_i32_0 = arith.constant 0 : i32
    %c0_i32_1 = arith.constant 0 : i32
    return %c0_i32, %c0_i32_0 : i32, i32
  }
  func.func @transform_14(%arg0: i32) -> (i32, i32) {
    %c0_i32 = arith.constant 0 : i32
    %c0_i32_0 = arith.constant 0 : i32
    return %arg0, %c0_i32 : i32, i32
  }
  func.func @transform_15(%arg0: i32) -> (i32, i32) {
    %c0_i32 = arith.constant 0 : i32
    %c0_i32_0 = arith.constant 0 : i32
    return %arg0, %c0_i32 : i32, i32
  }
  func.func @transform_16(%arg0: i32) -> (i32, i32) {
    %c0_i32 = arith.constant 0 : i32
    %c0_i32_0 = arith.constant 0 : i32
    return %arg0, %c0_i32 : i32, i32
  }
}

</mosaic_0001>

<bundles_post_ra>
// kernel: tpu_custom_call.1
= control target key start
LH: loop header
LB: loop body
LE: loop exit
PB: predicated region body
PF: predicated region fallthrough
CT: control target
= control target key end

     0   :  { %s6672_s0 = inlined_call_operand.vmem [shape: f32[8,784], index: 0, kind: input, shape index: {}]   ;;  %s6673_s1 = inlined_call_operand.vmem [shape: f32[8,2], index: 1, kind: input, shape index: {}]   ;;  %s6674_s2 = inlined_call_operand.vmem [shape: bf16[784,400], index: 2, kind: input, shape index: {}]   ;;  %s6675_s3 = inlined_call_operand.vmem [shape: f32[1,400], index: 3, kind: input, shape index: {}]   ;;  %s6676_s4 = inlined_call_operand.vmem [shape: bf16[400,200], index: 4, kind: input, shape index: {}]   ;;  %s6677_s5 = inlined_call_operand.vmem [shape: f32[1,200], index: 5, kind: input, shape index: {}]   ;;  %s6678_s6 = inlined_call_operand.vmem [shape: bf16[200,4], index: 6, kind: input, shape index: {}]   ;;  %s6679_s7 = inlined_call_operand.vmem [shape: f32[1,4], index: 7, kind: input, shape index: {}]   ;;  %s6680_s8 = inlined_call_operand.vmem [shape: bf16[2,200], index: 8, kind: input, shape index: {}]   ;;  %s6681_s9 = inlined_call_operand.vmem [shape: f32[1,200], index: 9, kind: input, shape index: {}]   ;;  %s6682_s10 = inlined_call_operand.vmem [shape: bf16[200,400], index: 10, kind: input, shape index: {}]   ;;  %s6683_s11 = inlined_call_operand.vmem [shape: f32[1,400], index: 11, kind: input, shape index: {}]   ;;  %s6684_s12 = inlined_call_operand.vmem [shape: bf16[400,784], index: 12, kind: input, shape index: {}]   ;;  %s6685_s13 = inlined_call_operand.vmem [shape: f32[1,784], index: 13, kind: input, shape index: {}]   ;;  %s6686_s14 = inlined_call_operand.hbm [shape: f32[8,784], index: 14, kind: output, shape index: {0}]   ;;  %s6687_s15 = inlined_call_operand.vmem [shape: f32[8,2], index: 15, kind: output, shape index: {1}]   ;;  %s6688_s16 = inlined_call_operand.vmem [shape: f32[8,2], index: 16, kind: output, shape index: {2}]  }
   0x1   :  { %6748 = sst [smem:[#allocation37_spill]] %s6672_s0 }
   0x2   :  { %v3592_v0 = vld [vmem:[%s6674_s2 + $0xf0] sm:$0xff]  ;;  %v3615_v7 = vld [vmem:[%s6674_s2 + $0xe0] sm:$0xff] }
   0x3   :  { %v3597_v1 = vld [vmem:[%s6674_s2 + $0x1f0] sm:$0xff]  ;;  %v314_v3 = vunpack.c.l.bf16 %v3592_v0  ;;  %v3620_v8 = vld [vmem:[%s6674_s2 + $0x1e0] sm:$0xff]  ;;  %v310_v10 = vunpack.c.l.bf16 %v3615_v7 }
   0x4   :  { %v3602_v2 = vld [vmem:[%s6674_s2 + $0x2f0] sm:$0xff]  ;;  %v378_v4 = vunpack.c.l.bf16 %v3597_v1  ;;  %v3627_v11 = vld [vmem:[%s6674_s2 + $0x2e0] sm:$0xff]  ;;  %v374_v14 = vunpack.c.l.bf16 %v3620_v8 }
   0x5   :  { %v442_v5 = vunpack.c.l.bf16 %v3602_v2  ;;  %v3610_v6 = vld [vmem:[%s6674_s2 + $0x3f0] sm:$0xff]  ;;  %v3632_v12 = vld [vmem:[%s6674_s2 + $0x3e0] sm:$0xff]  ;;  %660 = vmatpush.msra.mxu0 %v314_v3  ;;  %v438_v15 = vunpack.c.l.bf16 %v3627_v11 }
   0x6   :  { %v506_v9 = vunpack.c.l.bf16 %v3610_v6  ;;  %v3637_v13 = vld [vmem:[%s6674_s2 + $0xd0] sm:$0xff]  ;;  %680 = vmatpush.msra.mxu1 %v378_v4  ;;  %v502_v19 = vunpack.c.l.bf16 %v3632_v12  ;;  %v3662_v22 = vld [vmem:[%s6674_s2 + $0xc0] sm:$0xff] }
   0x7   :  { %v3644_v16 = vld [vmem:[%s6674_s2 + $0x1d0] sm:$0xff]  ;;  %700 = vmatpush.msra.mxu2 %v442_v5  ;;  %v306_v20 = vunpack.c.l.bf16 %v3637_v13  ;;  %v3667_v23 = vld [vmem:[%s6674_s2 + $0x1c0] sm:$0xff]  ;;  %661 = vmatpush.msra.mxu0 %v310_v10  ;;  %v302_v30 = vunpack.c.l.bf16 %v3662_v22 }
   0x8   :  { %v3649_v17 = vld [vmem:[%s6674_s2 + $0x2d0] sm:$0xff]  ;;  %720 = vmatpush.msra.mxu3 %v506_v9  ;;  %v370_v21 = vunpack.c.l.bf16 %v3644_v16  ;;  %v3672_v24 = vld [vmem:[%s6674_s2 + $0x2c0] sm:$0xff]  ;;  %681 = vmatpush.msra.mxu1 %v374_v14  ;;  %v366_v31 = vunpack.c.l.bf16 %v3667_v23 }
   0x9   :  { %v3654_v18 = vld [vmem:[%s6674_s2 + $0x3d0] sm:$0xff]  ;;  %v434_v25 = vunpack.c.l.bf16 %v3649_v17  ;;  %v3679_v27 = vld [vmem:[%s6674_s2 + $0x3c0] sm:$0xff]  ;;  %701 = vmatpush.msra.mxu2 %v438_v15  ;;  %662 = vmatpush.msra.mxu0 %v306_v20  ;;  %v430_v35 = vunpack.c.l.bf16 %v3672_v24 }
   0xa   :  { %v498_v26 = vunpack.c.l.bf16 %v3654_v18  ;;  %v3684_v28 = vld [vmem:[%s6674_s2 + $0xb0] sm:$0xff]  ;;  %721 = vmatpush.msra.mxu3 %v502_v19  ;;  %v3706_v34 = vld [vmem:[%s6674_s2 + $0xa0] sm:$0xff]  ;;  %682 = vmatpush.msra.mxu1 %v370_v21  ;;  %v494_v36 = vunpack.c.l.bf16 %v3679_v27 }
   0xb   :  { %v3689_v29 = vld [vmem:[%s6674_s2 + $0x1b0] sm:$0xff]  ;;  %v3713_v37 = vld [vmem:[%s6674_s2 + $0x1a0] sm:$0xff]  ;;  %702 = vmatpush.msra.mxu2 %v434_v25  ;;  %v298_v39 = vunpack.c.l.bf16 %v3684_v28  ;;  %663 = vmatpush.msra.mxu0 %v302_v30  ;;  %v294_v46 = vunpack.c.l.bf16 %v3706_v34 }
   0xc   :  { %v3696_v32 = vld [vmem:[%s6674_s2 + $0x2b0] sm:$0xff]  ;;  %v3718_v38 = vld [vmem:[%s6674_s2 + $0x2a0] sm:$0xff]  ;;  %722 = vmatpush.msra.mxu3 %v498_v26  ;;  %v362_v40 = vunpack.c.l.bf16 %v3689_v29  ;;  %683 = vmatpush.msra.mxu1 %v366_v31  ;;  %v358_v49 = vunpack.c.l.bf16 %v3713_v37 }
   0xd   :  { %v3701_v33 = vld [vmem:[%s6674_s2 + $0x3b0] sm:$0xff]  ;;  %v426_v41 = vunpack.c.l.bf16 %v3696_v32  ;;  %v3726_v42 = vld [vmem:[%s6674_s2 + $0x3a0] sm:$0xff]  ;;  %703 = vmatpush.msra.mxu2 %v430_v35  ;;  %v422_v50 = vunpack.c.l.bf16 %v3718_v38  ;;  %664 = vmatpush.msra.mxu0 %v298_v39 }
   0xe   :  { %v3731_v43 = vld [vmem:[%s6674_s2 + $0x90] sm:$0xff]  ;;  %v490_v45 = vunpack.c.l.bf16 %v3701_v33  ;;  %723 = vmatpush.msra.mxu3 %v494_v36  ;;  %v3755_v51 = vld [vmem:[%s6674_s2 + $0x80] sm:$0xff]  ;;  %684 = vmatpush.msra.mxu1 %v362_v40  ;;  %v486_v53 = vunpack.c.l.bf16 %v3726_v42 }
   0xf   :  { %v3736_v44 = vld [vmem:[%s6674_s2 + $0x190] sm:$0xff]  ;;  %v3760_v52 = vld [vmem:[%s6674_s2 + $0x180] sm:$0xff]  ;;  %v290_v54 = vunpack.c.l.bf16 %v3731_v43  ;;  %704 = vmatpush.msra.mxu2 %v426_v41  ;;  %665 = vmatpush.msra.mxu0 %v294_v46  ;;  %v286_v62 = vunpack.c.l.bf16 %v3755_v51 }
  0x10   :  { %v3743_v47 = vld [vmem:[%s6674_s2 + $0x290] sm:$0xff]  ;;  %v354_v55 = vunpack.c.l.bf16 %v3736_v44  ;;  %v3768_v56 = vld [vmem:[%s6674_s2 + $0x280] sm:$0xff]  ;;  %724 = vmatpush.msra.mxu3 %v490_v45  ;;  %685 = vmatpush.msra.mxu1 %v358_v49  ;;  %v350_v63 = vunpack.c.l.bf16 %v3760_v52 }
  0x11   :  { %6749 = vst [vmem:[#allocation5_spill] sm:$0xff] %v3743_v47  ;;  %v3748_v48 = vld [vmem:[%s6674_s2 + $0x390] sm:$0xff]  ;;  %v3773_v57 = vld [vmem:[%s6674_s2 + $0x380] sm:$0xff]  ;;  %v418_v58 = vunpack.c.l.bf16 %v3743_v47  ;;  %705 = vmatpush.msra.mxu2 %v422_v50  ;;  %v414_v5 = vunpack.c.l.bf16 %v3768_v56  ;;  %666 = vmatpush.msra.mxu0 %v290_v54 }
  0x12   :  { %6750 = vst [vmem:[#allocation6_spill] sm:$0xff] %v3768_v56  ;;  %v482_v59 = vunpack.c.l.bf16 %v3748_v48  ;;  %v3780_v60 = vld [vmem:[%s6674_s2 + $0x70] sm:$0xff]  ;;  %725 = vmatpush.msra.mxu3 %v486_v53  ;;  %v478_v9 = vunpack.c.l.bf16 %v3773_v57  ;;  %v3804_v10 = vld [vmem:[%s6674_s2 + $0x60] sm:$0xff]  ;;  %686 = vmatpush.msra.mxu1 %v354_v55 }
  0x13   :  { %6751 = vst [vmem:[#allocation7_spill] sm:$0xff] %v3773_v57  ;;  %v3785_v61 = vld [vmem:[%s6674_s2 + $0x170] sm:$0xff]  ;;  %v3809_v14 = vld [vmem:[%s6674_s2 + $0x160] sm:$0xff]  ;;  %v282_v15 = vunpack.c.l.bf16 %v3780_v60  ;;  %706 = vmatpush.msra.mxu2 %v418_v58  ;;  %667 = vmatpush.msra.mxu0 %v286_v62  ;;  %v278_v35 = vunpack.c.l.bf16 %v3804_v10 }
  0x14   :  { %v3792_v3 = vld [vmem:[%s6674_s2 + $0x270] sm:$0xff]  ;;  %v346_v19 = vunpack.c.l.bf16 %v3785_v61  ;;  %v3816_v20 = vld [vmem:[%s6674_s2 + $0x260] sm:$0xff]  ;;  %726 = vmatpush.msra.mxu3 %v482_v59  ;;  %687 = vmatpush.msra.mxu1 %v350_v63  ;;  %v342_v36 = vunpack.c.l.bf16 %v3809_v14 }
  0x15   :  { %6752 = vst [vmem:[#allocation8_spill] sm:$0xff] %v3792_v3  ;;  %v3797_v4 = vld [vmem:[%s6674_s2 + $0x370] sm:$0xff]  ;;  %v3821_v21 = vld [vmem:[%s6674_s2 + $0x360] sm:$0xff]  ;;  %v410_v25 = vunpack.c.l.bf16 %v3792_v3  ;;  %707 = vmatpush.msra.mxu2 %v414_v5  ;;  %v406_v41 = vunpack.c.l.bf16 %v3816_v20  ;;  %668 = vmatpush.msra.mxu0 %v282_v15 }
  0x16   :  { %6753 = vst [vmem:[#allocation9_spill] sm:$0xff] %v3797_v4  ;;  %v474_v26 = vunpack.c.l.bf16 %v3797_v4  ;;  %v3828_v30 = vld [vmem:[%s6674_s2 + $0x50] sm:$0xff]  ;;  %727 = vmatpush.msra.mxu3 %v478_v9  ;;  %v470_v45 = vunpack.c.l.bf16 %v3821_v21  ;;  %v3852_v46 = vld [vmem:[%s6674_s2 + $0x40] sm:$0xff]  ;;  %688 = vmatpush.msra.mxu1 %v346_v19 }
  0x17   :  { %6754 = vst [vmem:[#allocation10_spill] sm:$0xff] %v3816_v20  ;;  %v3833_v31 = vld [vmem:[%s6674_s2 + $0x150] sm:$0xff]  ;;  %v3857_v49 = vld [vmem:[%s6674_s2 + $0x140] sm:$0xff]  ;;  %v274_v50 = vunpack.c.l.bf16 %v3828_v30  ;;  %708 = vmatpush.msra.mxu2 %v410_v25  ;;  %669 = vmatpush.msra.mxu0 %v278_v35  ;;  %v270_v5 = vunpack.c.l.bf16 %v3852_v46 }
  0x18   :  { %6755 = vst [vmem:[#allocation11_spill] sm:$0xff] %v3821_v21  ;;  %v3840_v39 = vld [vmem:[%s6674_s2 + $0x250] sm:$0xff]  ;;  %v338_v53 = vunpack.c.l.bf16 %v3833_v31  ;;  %v3864_v54 = vld [vmem:[%s6674_s2 + $0x240] sm:$0xff]  ;;  %728 = vmatpush.msra.mxu3 %v474_v26  ;;  %689 = vmatpush.msra.mxu1 %v342_v36  ;;  %v334_v9 = vunpack.c.l.bf16 %v3857_v49 }
  0x19   :  { %6756 = vst [vmem:[#allocation12_spill] sm:$0xff] %v3840_v39  ;;  %v3845_v40 = vld [vmem:[%s6674_s2 + $0x350] sm:$0xff]  ;;  %v3869_v55 = vld [vmem:[%s6674_s2 + $0x340] sm:$0xff]  ;;  %v402_v58 = vunpack.c.l.bf16 %v3840_v39  ;;  %709 = vmatpush.msra.mxu2 %v406_v41  ;;  %v398_v25 = vunpack.c.l.bf16 %v3864_v54  ;;  %670 = vmatpush.msra.mxu0 %v274_v50 }
  0x1a   :  { %6757 = vst [vmem:[#allocation13_spill] sm:$0xff] %v3845_v40  ;;  %v466_v59 = vunpack.c.l.bf16 %v3845_v40  ;;  %v3876_v62 = vld [vmem:[%s6674_s2 + $0x30] sm:$0xff]  ;;  %729 = vmatpush.msra.mxu3 %v470_v45  ;;  %v462_v26 = vunpack.c.l.bf16 %v3869_v55  ;;  %v3900_v35 = vld [vmem:[%s6674_s2 + $0x20] sm:$0xff]  ;;  %690 = vmatpush.msra.mxu1 %v338_v53 }
  0x1b   :  { %6758 = vst [vmem:[#allocation14_spill] sm:$0xff] %v3864_v54  ;;  %v3881_v63 = vld [vmem:[%s6674_s2 + $0x130] sm:$0xff]  ;;  %v3905_v36 = vld [vmem:[%s6674_s2 + $0x120] sm:$0xff]  ;;  %v266_v39 = vunpack.c.l.bf16 %v3876_v62  ;;  %710 = vmatpush.msra.mxu2 %v402_v58  ;;  %671 = vmatpush.msra.mxu0 %v270_v5  ;;  %v262_v40 = vunpack.c.l.bf16 %v3900_v35 }
  0x1c   :  { %6759 = vst [vmem:[#allocation15_spill] sm:$0xff] %v3869_v55  ;;  %v3888_v15 = vld [vmem:[%s6674_s2 + $0x230] sm:$0xff]  ;;  %v330_v41 = vunpack.c.l.bf16 %v3881_v63  ;;  %v3912_v45 = vld [vmem:[%s6674_s2 + $0x220] sm:$0xff]  ;;  %730 = vmatpush.msra.mxu3 %v466_v59  ;;  %691 = vmatpush.msra.mxu1 %v334_v9  ;;  %v326_v58 = vunpack.c.l.bf16 %v3905_v36 }
  0x1d   :  { %6760 = vst [vmem:[#allocation16_spill] sm:$0xff] %v3888_v15  ;;  %v3893_v19 = vld [vmem:[%s6674_s2 + $0x330] sm:$0xff]  ;;  %v3917_v54 = vld [vmem:[%s6674_s2 + $0x320] sm:$0xff]  ;;  %v394_v55 = vunpack.c.l.bf16 %v3888_v15  ;;  %711 = vmatpush.msra.mxu2 %v398_v25  ;;  %672 = vmatpush.msra.mxu0 %v266_v39 }
  0x1e   :  { %6761 = vst [vmem:[#allocation17_spill] sm:$0xff] %v3893_v19  ;;  %v458_v50 = vunpack.c.l.bf16 %v3893_v19  ;;  %v3924_v53 = vld [vmem:[%s6674_s2 + $0x10] sm:$0xff]  ;;  %731 = vmatpush.msra.mxu3 %v462_v26  ;;  %v390_v19 = vunpack.c.l.bf16 %v3912_v45  ;;  %v454_v5 = vunpack.c.l.bf16 %v3917_v54  ;;  %v3948_v9 = vld [vmem:[%s6674_s2] sm:$0xff]  ;;  %692 = vmatpush.msra.mxu1 %v330_v41 }
  0x1f   :  { %6762 = vst [vmem:[#allocation18_spill] sm:$0xff] %v3912_v45  ;;  %v3929_v20 = vld [vmem:[%s6674_s2 + $0x110] sm:$0xff]  ;;  %v3953_v3 = vld [vmem:[%s6674_s2 + $0x100] sm:$0xff]  ;;  %v258_v21 = vunpack.c.l.bf16 %v3924_v53  ;;  %712 = vmatpush.msra.mxu2 %v394_v55  ;;  %673 = vmatpush.msra.mxu0 %v262_v40  ;;  %v254_v4 = vunpack.c.l.bf16 %v3948_v9 }
  0x20   :  { %6763 = vst [vmem:[#allocation19_spill] sm:$0xff] %v3917_v54  ;;  %v3936_v59 = vld [vmem:[%s6674_s2 + $0x210] sm:$0xff]  ;;  %v322_v25 = vunpack.c.l.bf16 %v3929_v20  ;;  %v3960_v26 = vld [vmem:[%s6674_s2 + $0x200] sm:$0xff]  ;;  %732 = vmatpush.msra.mxu3 %v458_v50  ;;  %693 = vmatpush.msra.mxu1 %v326_v58  ;;  %v318_v55 = vunpack.c.l.bf16 %v3953_v3 }
  0x21   :  { %6764 = vst [vmem:[#allocation20_spill] sm:$0xff] %v3936_v59  ;;  %v3941_v15 = vld [vmem:[%s6674_s2 + $0x310] sm:$0xff]  ;;  %v3965_v45 = vld [vmem:[%s6674_s2 + $0x300] sm:$0xff]  ;;  %v386_v54 = vunpack.c.l.bf16 %v3936_v59  ;;  %713 = vmatpush.msra.mxu2 %v390_v19  ;;  %v382_v59 = vunpack.c.l.bf16 %v3960_v26  ;;  %674 = vmatpush.msra.mxu0 %v258_v21 }
  0x22   :  { %6765 = vst [vmem:[#allocation21_spill] sm:$0xff] %v3941_v15  ;;  %v450_v39 = vunpack.c.l.bf16 %v3941_v15  ;;  %v3972_v41 = vld [vmem:[%s6674_s2 + $0x4f0] sm:$0xff]  ;;  %733 = vmatpush.msra.mxu3 %v454_v5  ;;  %v446_v15 = vunpack.c.l.bf16 %v3965_v45  ;;  %v3991_v40 = vld [vmem:[%s6674_s2 + $0x4e0] sm:$0xff]  ;;  %694 = vmatpush.msra.mxu1 %v322_v25 }
  0x23   :  { %6766 = vst [vmem:[#allocation22_spill] sm:$0xff] %v3960_v26  ;;  %v3977_v56 = vld [vmem:[%s6674_s2 + $0x5f0] sm:$0xff]  ;;  %v3996_v58 = vld [vmem:[%s6674_s2 + $0x5e0] sm:$0xff]  ;;  %v570_v47 = vunpack.c.l.bf16 %v3972_v41  ;;  %714 = vmatpush.msra.mxu2 %v386_v54  ;;  %675 = vmatpush.msra.mxu0 %v254_v4  ;;  %v566_v25 = vunpack.c.l.bf16 %v3991_v40 }
  0x24   :  { %6767 = vst [vmem:[#allocation23_spill] sm:$0xff] %v3965_v45  ;;  %v3984_v50 = vld [vmem:[%s6674_s2 + $0x610] sm:$0xff]  ;;  %v634_v19 = vunpack.c.l.bf16 %v3977_v56  ;;  %v4003_v5 = vld [vmem:[%s6674_s2 + $0x600] sm:$0xff]  ;;  %734 = vmatpush.msra.mxu3 %v450_v39  ;;  %v315_v45 = vunpack.c.h.bf16 %v3592_v0  ;;  %695 = vmatpush.msra.mxu1 %v318_v55  ;;  %v630_v57 = vunpack.c.l.bf16 %v3996_v58 }
  0x25   :  { %6768 = vst [vmem:[#allocation24_spill] sm:$0xff] %v3984_v50  ;;  %v642_v26 = vunpack.c.l.bf16 %v3984_v50  ;;  %v4010_v21 = vld [vmem:[%s6674_s2 + $0x4d0] sm:$0xff] }
  0x26   :  { %6769 = vst [vmem:[#allocation25_spill] sm:$0xff] %v4003_v5  ;;  %v4017_v54 = vld [vmem:[%s6674_s2 + $0x5d0] sm:$0xff] }
  0x27   :  { %22 = vsyncpa [#allocation3], 0  ;;  %715 = vmatpush.msra.mxu2 %v382_v59  ;;  %735 = vmatpush.msra.mxu3 %v446_v15  ;;  %v638_v0 = vunpack.c.l.bf16 %v4003_v5  ;;  %v311_v39 = vunpack.c.h.bf16 %v3615_v7  ;;  %v562_v4 = vunpack.c.l.bf16 %v4010_v21  ;;  %v379_v55 = vunpack.c.h.bf16 %v3597_v1  ;;  %s6770_s17 = sld [smem:[#allocation37_spill]]  ;;  %v4032_v15 = vld [vmem:[%s6674_s2 + $0x4c0] sm:$0xff]  ;;  %s3499_s21 = smov 2  }
  0x28   :  { %740 = vmatpush.msrb.mxu0 %v570_v47  ;;  %760 = vmatpush.msrb.mxu1 %v634_v19  ;;  %v626_v59 = vunpack.c.l.bf16 %v4017_v54  ;;  %v4037_v7 = vld [vmem:[%s6674_s2 + $0x5c0] sm:$0xff]  ;;  %v307_v1 = vunpack.c.h.bf16 %v3637_v13  ;;  %v375_v47 = vunpack.c.h.bf16 %v3620_v8  ;;  %v558_v8 = vunpack.c.l.bf16 %v4032_v15  ;;  %v4062_v19 = vld [vmem:[%s6674_s2 + $0x5b0] sm:$0xff]  ;;  %s3328_s23 = sshll.u32 %s6686_s14, 4  ;;  %s3329_s23 = int_to_ptr.hbm [resolvable:$true] %s3328_s23 }
  0x29   :  { %794 = vmatpush.msrb.mxu2 %v642_v26  ;;  %800 = vmatpush.msrb.mxu3 %v315_v45  ;;  %v4049_v26 = vld [vmem:[%s6674_s2 + $0x4b0] sm:$0xff]  ;;  %v367_v5 = vunpack.c.h.bf16 %v3667_v23  ;;  %v4104_v23 = vld [vmem:[%s6674_s2 + $0x480] sm:$0xff]  ;;  %vm656_vm0 = vcmask 130048   ;;  %vm1611_vm7 = vcmask 588800   ;;  %vm3314_vm8 = vcmask 15360  }
  0x2a   :  { %741 = vmatpush.msrb.mxu0 %v566_v25  ;;  %761 = vmatpush.msrb.mxu1 %v630_v57  ;;  %v622_v57 = vunpack.c.l.bf16 %v4037_v7  ;;  %v303_v25 = vunpack.c.h.bf16 %v3662_v22  ;;  %v4081_v22 = vld [vmem:[%s6674_s2 + $0x5a0] sm:$0xff] }
  0x2b   :  { %795 = vmatpush.msrb.mxu2 %v638_v0  ;;  %801 = vmatpush.msrb.mxu3 %v311_v39  ;;  %v4068_v0 = vld [vmem:[%s6674_s2 + $0x4a0] sm:$0xff]  ;;  %v371_v39 = vunpack.c.h.bf16 %v3644_v16  ;;  %v618_v16 = vunpack.c.l.bf16 %v4062_v19 }
  0x2c   :  { %742 = vmatpush.msrb.mxu0 %v562_v4  ;;  %762 = vmatpush.msrb.mxu1 %v626_v59  ;;  %v299_v59 = vunpack.c.h.bf16 %v3684_v28  ;;  %v614_v28 = vunpack.c.l.bf16 %v4081_v22 }
  0x2d   :  { %v4026_v50 = vld [vmem:[%s6770_s17 + $0x10] sm:$0xff]  ;;  %v4044_v45 = vld [vmem:[%s6770_s17] sm:$0xff]  ;;  %v4055_v13 = vld [vmem:[%s6770_s17 + $0x18] sm:$0xff]  ;;  %802 = vmatpush.msrb.mxu3 %v307_v1 }
  0x2e   :  { %6771 = vst [vmem:[#allocation26_spill] sm:$0xff] %v4026_v50  ;;  %716 = vmatmul.f32.vlgmr.msra.gmra.mxu2 %v4026_v50  ;;  %676 = vmatmul.f32.vlgmr.msra.gmra.mxu0 %v4044_v45  ;;  %v4075_v4 = vld [vmem:[%s6770_s17 + $0x8] sm:$0xff]  ;;  %v4089_v1 = vld [vmem:[%s6674_s2 + $0x490] sm:$0xff]  ;;  %v550_v50 = vunpack.c.l.bf16 %v4068_v0 }
  0x2f   :  { %6772 = vst [vmem:[#allocation27_spill] sm:$0xff] %v4044_v45  ;;  %820 = vmatpush.msra.mxu2 %v379_v55  ;;  %v554_v55 = vunpack.c.l.bf16 %v4049_v26  ;;  %736 = vmatmul.f32.vlgmr.msra.gmra.mxu3 %v4055_v13  ;;  %v4118_v45 = vld [vmem:[%s6674_s2 + $0x470] sm:$0xff] }
  0x30   :  { %6773 = vst [vmem:[#allocation28_spill] sm:$0xff] %v4055_v13  ;;  %743 = vmatpush.msrb.mxu0 %v558_v8  ;;  %763 = vmatpush.msrb.mxu1 %v622_v57  ;;  %v4096_v13 = vld [vmem:[%s6674_s2 + $0x590] sm:$0xff]  ;;  %v363_v8 = vunpack.c.h.bf16 %v3689_v29  ;;  %v546_v57 = vunpack.c.l.bf16 %v4089_v1  ;;  %v359_v29 = vunpack.c.h.bf16 %v3713_v37  ;;  %v355_v37 = vunpack.c.h.bf16 %v3736_v44 }
  0x31   :  { %6774 = vst [vmem:[#allocation29_spill] sm:$0xff] %v4075_v4  ;;  %821 = vmatpush.msra.mxu2 %v375_v47  ;;  %803 = vmatpush.msrb.mxu3 %v303_v25  ;;  %v295_v47 = vunpack.c.h.bf16 %v3706_v34  ;;  %v4111_v25 = vld [vmem:[%s6674_s2 + $0x580] sm:$0xff]  ;;  %v610_v34 = vunpack.c.l.bf16 %v4096_v13  ;;  %v351_v44 = vunpack.c.h.bf16 %v3760_v52  ;;  %v347_v52 = vunpack.c.h.bf16 %v3785_v61 }
  0x32   :  { %696 = vmatmul.f32.vlgmr.msra.gmra.mxu1 %v4075_v4  ;;  %744 = vmatpush.msrb.mxu0 %v554_v55  ;;  %v291_v4 = vunpack.c.h.bf16 %v3731_v43  ;;  %v4125_v55 = vld [vmem:[%s6674_s2 + $0x570] sm:$0xff]  ;;  %v606_v43 = vunpack.c.l.bf16 %v4111_v25  ;;  %v343_v61 = vunpack.c.h.bf16 %v3809_v14  ;;  %v339_v14 = vunpack.c.h.bf16 %v3833_v31 }
  0x33   :  { %822 = vmatpush.msra.mxu2 %v371_v39  ;;  %764 = vmatpush.msrb.mxu1 %v618_v16  ;;  %v542_v39 = vunpack.c.l.bf16 %v4104_v23  ;;  %v287_v16 = vunpack.c.h.bf16 %v3755_v51  ;;  %v602_v51 = vunpack.c.l.bf16 %v4125_v55  ;;  %v335_v31 = vunpack.c.h.bf16 %v3857_v49 }
  0x34   :  { %804 = vmatpush.msrb.mxu3 %v299_v59  ;;  %745 = vmatpush.msrb.mxu0 %v550_v50  ;;  %v4132_v59 = vld [vmem:[%s6674_s2 + $0x460] sm:$0xff]  ;;  %v538_v50 = vunpack.c.l.bf16 %v4118_v45  ;;  %v331_v49 = vunpack.c.h.bf16 %v3881_v63  ;;  %v327_v63 = vunpack.c.h.bf16 %v3905_v36 }
  0x35   :  { %823 = vmatpush.msra.mxu2 %v367_v5  ;;  %765 = vmatpush.msrb.mxu1 %v614_v28  ;;  %v4139_v5 = vld [vmem:[%s6674_s2 + $0x560] sm:$0xff]  ;;  %v283_v28 = vunpack.c.h.bf16 %v3780_v60 }
  0x36   :  { %805 = vmatpush.msrb.mxu3 %v295_v47  ;;  %746 = vmatpush.msrb.mxu0 %v546_v57  ;;  %v4146_v47 = vld [vmem:[%s6674_s2 + $0x450] sm:$0xff]  ;;  %v598_v60 = vunpack.c.l.bf16 %v4139_v5  ;;  %v4241_v36 = vld [vmem:[%s6770_s17 + $0x20] sm:$0xff] }
  0x37   :  { %824 = vmatpush.msra.mxu2 %v363_v8  ;;  %766 = vmatpush.msrb.mxu1 %v610_v34  ;;  %v534_v8 = vunpack.c.l.bf16 %v4132_v59  ;;  %v4153_v57 = vld [vmem:[%s6674_s2 + $0x550] sm:$0xff]  ;;  %v4160_v34 = vld [vmem:[%s6674_s2 + $0x440] sm:$0xff] }
  0x38   :  { %806 = vmatpush.msrb.mxu3 %v291_v4  ;;  %747 = vmatpush.msrb.mxu0 %v542_v39  ;;  %v279_v4 = vunpack.c.h.bf16 %v3804_v10  ;;  %v4167_v39 = vld [vmem:[%s6674_s2 + $0x540] sm:$0xff]  ;;  %v594_v10 = vunpack.c.l.bf16 %v4153_v57 }
  0x39   :  { %825 = vmatpush.msra.mxu2 %v359_v29  ;;  %767 = vmatpush.msrb.mxu1 %v606_v43  ;;  %v530_v29 = vunpack.c.l.bf16 %v4146_v47  ;;  %v275_v43 = vunpack.c.h.bf16 %v3828_v30  ;;  %v590_v30 = vunpack.c.l.bf16 %v4167_v39 }
  0x3a   :  { %807 = vmatpush.msrb.mxu3 %v287_v16  ;;  %748 = vmatpush.msrb.mxu0 %v538_v50  ;;  %v4174_v16 = vld [vmem:[%s6674_s2 + $0x430] sm:$0xff] }
  0x3b   :  { %826 = vmatpush.msra.mxu2 %v355_v37  ;;  %768 = vmatpush.msrb.mxu1 %v602_v51  ;;  %v526_v37 = vunpack.c.l.bf16 %v4160_v34  ;;  %v4181_v50 = vld [vmem:[%s6674_s2 + $0x530] sm:$0xff]  ;;  %v271_v51 = vunpack.c.h.bf16 %v3852_v46 }
  0x3c   :  { %808 = vmatpush.msrb.mxu3 %v283_v28  ;;  %749 = vmatpush.msrb.mxu0 %v534_v8  ;;  %v4188_v28 = vld [vmem:[%s6674_s2 + $0x420] sm:$0xff]  ;;  %v586_v46 = vunpack.c.l.bf16 %v4181_v50 }
  0x3d   :  { %827 = vmatpush.msra.mxu2 %v351_v44  ;;  %769 = vmatpush.msrb.mxu1 %v598_v60  ;;  %v522_v44 = vunpack.c.l.bf16 %v4174_v16  ;;  %v4195_v8 = vld [vmem:[%s6674_s2 + $0x520] sm:$0xff]  ;;  %v267_v60 = vunpack.c.h.bf16 %v3876_v62 }
  0x3e   :  { %809 = vmatpush.msrb.mxu3 %v279_v4  ;;  %750 = vmatpush.msrb.mxu0 %v530_v29  ;;  %v4202_v4 = vld [vmem:[%s6674_s2 + $0x410] sm:$0xff]  ;;  %v582_v62 = vunpack.c.l.bf16 %v4195_v8 }
  0x3f   :  { %828 = vmatpush.msra.mxu2 %v347_v52  ;;  %770 = vmatpush.msrb.mxu1 %v594_v10  ;;  %v518_v52 = vunpack.c.l.bf16 %v4188_v28  ;;  %v4209_v29 = vld [vmem:[%s6674_s2 + $0x510] sm:$0xff]  ;;  %v263_v10 = vunpack.c.h.bf16 %v3900_v35 }
  0x40   :  { %810 = vmatpush.msrb.mxu3 %v275_v43  ;;  %751 = vmatpush.msrb.mxu0 %v526_v37  ;;  %v4216_v43 = vld [vmem:[%s6674_s2 + $0x400] sm:$0xff]  ;;  %v578_v35 = vunpack.c.l.bf16 %v4209_v29 }
  0x41   :  { %829 = vmatpush.msra.mxu2 %v343_v61  ;;  %771 = vmatpush.msrb.mxu1 %v590_v30  ;;  %v514_v61 = vunpack.c.l.bf16 %v4202_v4  ;;  %v4223_v37 = vld [vmem:[%s6674_s2 + $0x500] sm:$0xff]  ;;  %v259_v30 = vunpack.c.h.bf16 %v3924_v53  ;;  %v255_v53 = vunpack.c.h.bf16 %v3948_v9  ;;  %v319_v9 = vunpack.c.h.bf16 %v3953_v3 }
  0x42   :  { %811 = vmatpush.msrb.mxu3 %v271_v51  ;;  %752 = vmatpush.msrb.mxu0 %v522_v44  ;;  %v510_v51 = vunpack.c.l.bf16 %v4216_v43  ;;  %v574_v44 = vunpack.c.l.bf16 %v4223_v37  ;;  %v439_v3 = vunpack.c.h.bf16 %v3627_v11  ;;  %v627_v11 = vunpack.c.h.bf16 %v4017_v54 }
  0x43   :  { %830 = vmatpush.msra.mxu2 %v339_v14  ;;  %772 = vmatpush.msrb.mxu1 %v586_v46  ;;  %v4232_v14 = vld [vmem:[%s6770_s17 + $0x30] sm:$0xff]  ;;  %v507_v46 = vunpack.c.h.bf16 %v3610_v6  ;;  %v4251_v6 = vld [vmem:[%s6770_s17 + $0x28] sm:$0xff]  ;;  %v483_v54 = vunpack.c.h.bf16 %v3748_v48  ;;  %v543_v48 = vunpack.c.h.bf16 %v4104_v23 }
  0x44   :  { %812 = vmatpush.msrb.mxu3 %v267_v60  ;;  %753 = vmatpush.msrb.mxu0 %v518_v52  ;;  %v323_v60 = vunpack.c.h.bf16 %v3929_v20  ;;  %v503_v52 = vunpack.c.h.bf16 %v3632_v12  ;;  %v443_v20 = vunpack.c.h.bf16 %v3602_v2  ;;  %v635_v12 = vunpack.c.h.bf16 %v3977_v56  ;;  %v6780_v23 = vld [vmem:[#allocation8_spill] sm:$0xff] }
  0x45   :  { %831 = vmatpush.msra.mxu2 %v335_v31  ;;  %773 = vmatpush.msrb.mxu1 %v582_v62  ;;  %v571_v31 = vunpack.c.h.bf16 %v3972_v41  ;;  %v567_v62 = vunpack.c.h.bf16 %v3991_v40  ;;  %v499_v41 = vunpack.c.h.bf16 %v3654_v18  ;;  %v495_v2 = vunpack.c.h.bf16 %v3679_v27 }
  0x46   :  { %813 = vmatpush.msrb.mxu3 %v263_v10  ;;  %754 = vmatpush.msrb.mxu0 %v514_v61  ;;  %v563_v10 = vunpack.c.h.bf16 %v4010_v21  ;;  %v631_v40 = vunpack.c.h.bf16 %v3996_v58  ;;  %v559_v18 = vunpack.c.h.bf16 %v4032_v15  ;;  %v491_v56 = vunpack.c.h.bf16 %v3701_v33 }
  0x47   :  { %832 = vmatpush.msra.mxu2 %v331_v49  ;;  %774 = vmatpush.msrb.mxu1 %v578_v35  ;;  %v435_v49 = vunpack.c.h.bf16 %v3649_v17  ;;  %v431_v21 = vunpack.c.h.bf16 %v3672_v24  ;;  %v555_v27 = vunpack.c.h.bf16 %v4049_v26  ;;  %v487_v58 = vunpack.c.h.bf16 %v3726_v42 }
  0x48   :  { %814 = vmatpush.msrb.mxu3 %v259_v30  ;;  %3345 = vmatmul.msk.f32.vlgmr.msrb.gmra.mxu2 %vm656_vm0, %v4232_v14  ;;  %v623_v17 = vunpack.c.h.bf16 %v4037_v7  ;;  %v427_v15 = vunpack.c.h.bf16 %v3696_v32  ;;  %v551_v33 = vunpack.c.h.bf16 %v4068_v0  ;;  %v619_v24 = vunpack.c.h.bf16 %v4062_v19  ;;  %v6775_v7 = vld [vmem:[#allocation7_spill] sm:$0xff]  ;;  %v6776_v0 = vld [vmem:[#allocation5_spill] sm:$0xff] }
  0x49   :  { %755 = vmatpush.msrb.mxu0 %v510_v51  ;;  %833 = vmatpush.msra.mxu2 %v327_v63  ;;  %v423_v26 = vunpack.c.h.bf16 %v3718_v38  ;;  %v547_v42 = vunpack.c.h.bf16 %v4089_v1  ;;  %v479_v61 = vunpack.c.h.bf16 %v6775_v7  ;;  %v615_v32 = vunpack.c.h.bf16 %v4081_v22  ;;  %v6777_v19 = vld [vmem:[#allocation9_spill] sm:$0xff]  ;;  %v6778_v1 = vld [vmem:[#allocation6_spill] sm:$0xff]  ;;  %v6779_v22 = vld [vmem:[#allocation11_spill] sm:$0xff] }
  0x4a   :  { %775 = vmatpush.msrb.mxu1 %v574_v44  ;;  %815 = vmatpush.msrb.mxu3 %v255_v53  ;;  %v419_v35 = vunpack.c.h.bf16 %v6776_v0  ;;  %v475_v30 = vunpack.c.h.bf16 %v6777_v19  ;;  %v611_v38 = vunpack.c.h.bf16 %v4096_v13  ;;  %v415_v51 = vunpack.c.h.bf16 %v6778_v1  ;;  %v6781_v13 = vld [vmem:[#allocation13_spill] sm:$0xff]  ;;  %v4335_v0 = vld [vmem:[%s6674_s2 + $0x1e8] sm:$0xff] }
  0x4b   :  { %756 = vmatmul.f32.vlgmr.msrb.gmra.mxu0 %v4241_v36  ;;  %834 = vmatpush.msra.mxu2 %v323_v60  ;;  %v539_v63 = vunpack.c.h.bf16 %v4118_v45  ;;  %v471_v44 = vunpack.c.h.bf16 %v6779_v22  ;;  %v607_v53 = vunpack.c.h.bf16 %v4111_v25  ;;  %v535_v60 = vunpack.c.h.bf16 %v4132_v59  ;;  %v6782_v45 = vld [vmem:[#allocation10_spill] sm:$0xff]  ;;  %v6783_v25 = vld [vmem:[#allocation15_spill] sm:$0xff]  ;;  %v6784_v59 = vld [vmem:[#allocation12_spill] sm:$0xff] }
  0x4c   :  { %860 = vmatpush.msra.mxu1 %v507_v46  ;;  %880 = vmatpush.msra.mxu3 %v571_v31  ;;  %v411_v46 = vunpack.c.h.bf16 %v6780_v23  ;;  %v467_v31 = vunpack.c.h.bf16 %v6781_v13  ;;  %v511_v7 = vunpack.c.h.bf16 %v4216_v43  ;;  %v4343_v19 = vld [vmem:[%s6674_s2 + $0x3f8] sm:$0xff]  ;;  %v376_v1 = vunpack.c.l.bf16 %v4335_v0 }
  0x4d   :  { %776 = vmatmul.f32.vlgmr.msrb.gmra.mxu1 %v4251_v6  ;;  %835 = vmatpush.msra.mxu2 %v319_v9  ;;  %v407_v9 = vunpack.c.h.bf16 %v6782_v45  ;;  %v4391_v45 = vld [vmem:[%s6674_s2 + $0x1b8] sm:$0xff] }
  0x4e   :  { %861 = vmatpush.msra.mxu1 %v503_v52  ;;  %881 = vmatpush.msra.mxu3 %v567_v62  ;;  %v603_v52 = vunpack.c.h.bf16 %v4125_v55  ;;  %v463_v62 = vunpack.c.h.bf16 %v6783_v25  ;;  %v595_v55 = vunpack.c.h.bf16 %v4153_v57 }
  0x4f   :  { %840 = vmatpush.msra.mxu0 %v443_v20  ;;  %900 = vmatpush.msrb.mxu2 %v635_v12  ;;  %v531_v20 = vunpack.c.h.bf16 %v4146_v47  ;;  %v403_v12 = vunpack.c.h.bf16 %v6784_v59  ;;  %v6798_v59 = vld [vmem:[#allocation25_spill] sm:$0xff] }
  0x50   :  { %862 = vmatpush.msra.mxu1 %v499_v41  ;;  %882 = vmatpush.msra.mxu3 %v563_v10  ;;  %v599_v41 = vunpack.c.h.bf16 %v4139_v5  ;;  %v6785_v10 = vld [vmem:[#allocation17_spill] sm:$0xff] }
  0x51   :  { %841 = vmatpush.msra.mxu0 %v439_v3  ;;  %901 = vmatpush.msrb.mxu2 %v631_v40  ;;  %v527_v3 = vunpack.c.h.bf16 %v4160_v34  ;;  %v459_v47 = vunpack.c.h.bf16 %v6785_v10  ;;  %v6786_v40 = vld [vmem:[#allocation14_spill] sm:$0xff]  ;;  %v4417_v10 = vld [vmem:[%s6674_s2 + $0x1a8] sm:$0xff] }
  0x52   :  { %863 = vmatpush.msra.mxu1 %v495_v2  ;;  %883 = vmatpush.msra.mxu3 %v559_v18  ;;  %v523_v2 = vunpack.c.h.bf16 %v4174_v16  ;;  %v399_v5 = vunpack.c.h.bf16 %v6786_v40  ;;  %v6787_v18 = vld [vmem:[#allocation19_spill] sm:$0xff]  ;;  %v6790_v16 = vld [vmem:[#allocation21_spill] sm:$0xff]  ;;  %v364_v40 = vunpack.c.l.bf16 %v4391_v45 }
  0x53   :  { %842 = vmatpush.msra.mxu0 %v435_v49  ;;  %902 = vmatpush.msrb.mxu2 %v627_v11  ;;  %v591_v49 = vunpack.c.h.bf16 %v4167_v39  ;;  %v455_v34 = vunpack.c.h.bf16 %v6787_v18  ;;  %v519_v11 = vunpack.c.h.bf16 %v4188_v28  ;;  %v6791_v39 = vld [vmem:[#allocation18_spill] sm:$0xff]  ;;  %v6792_v28 = vld [vmem:[#allocation23_spill] sm:$0xff] }
  0x54   :  { %864 = vmatpush.msra.mxu1 %v491_v56  ;;  %884 = vmatpush.msra.mxu3 %v555_v27  ;;  %v6788_v56 = vld [vmem:[#allocation16_spill] sm:$0xff]  ;;  %v451_v27 = vunpack.c.h.bf16 %v6790_v16  ;;  %v4449_v16 = vld [vmem:[%s6674_s2 + $0x2d8] sm:$0xff] }
  0x55   :  { %843 = vmatpush.msra.mxu0 %v431_v21  ;;  %903 = vmatpush.msrb.mxu2 %v623_v17  ;;  %v395_v57 = vunpack.c.h.bf16 %v6788_v56  ;;  %v6789_v21 = vld [vmem:[#allocation27_spill] sm:$0xff]  ;;  %v391_v17 = vunpack.c.h.bf16 %v6791_v39  ;;  %v4437_v56 = vld [vmem:[%s6674_s2 + $0x98] sm:$0xff] }
  0x56   :  { %865 = vmatpush.msra.mxu1 %v487_v58  ;;  %885 = vmatpush.msra.mxu3 %v551_v33  ;;  %v587_v58 = vunpack.c.h.bf16 %v4181_v50  ;;  %v4313_v33 = vld [vmem:[%s6674_s2 + $0xf8] sm:$0xff]  ;;  %v4456_v39 = vld [vmem:[%s6674_s2 + $0x3a8] sm:$0xff] }
  0x57   :  { %844 = vmatpush.msra.mxu0 %v427_v15  ;;  %904 = vmatpush.msrb.mxu2 %v619_v24  ;;  %v515_v15 = vunpack.c.h.bf16 %v4202_v4  ;;  %v583_v24 = vunpack.c.h.bf16 %v4195_v8  ;;  %v4321_v50 = vld [vmem:[%s6674_s2 + $0x1f8] sm:$0xff]  ;;  %v6794_v4 = vld [vmem:[#allocation20_spill] sm:$0xff]  ;;  %v316_v8 = vunpack.c.l.bf16 %v4313_v33  ;;  %6800 = vst [vmem:[#allocation7_spill] sm:$0xff] %v4456_v39 }
  0x58   :  { %866 = vmatpush.msra.mxu1 %v483_v54  ;;  %886 = vmatpush.msra.mxu3 %v547_v42  ;;  %v447_v54 = vunpack.c.h.bf16 %v6792_v28  ;;  %v387_v42 = vunpack.c.h.bf16 %v6794_v4  ;;  %v4467_v28 = vld [vmem:[%s6674_s2 + $0x188] sm:$0xff]  ;;  %v436_v4 = vunpack.c.l.bf16 %v4449_v16 }
  0x59   :  { %845 = vmatpush.msra.mxu0 %v423_v26  ;;  %905 = vmatpush.msrb.mxu2 %v615_v32  ;;  %v6793_v26 = vld [vmem:[#allocation29_spill] sm:$0xff]  ;;  %v4330_v32 = vld [vmem:[%s6674_s2 + $0xe8] sm:$0xff] }
  0x5a   :  { %867 = vmatpush.msra.mxu1 %v479_v61  ;;  %887 = vmatpush.msra.mxu3 %v543_v48  ;;  %v579_v61 = vunpack.c.h.bf16 %v4209_v29  ;;  %v380_v29 = vunpack.c.l.bf16 %v4321_v50  ;;  %v575_v48 = vunpack.c.h.bf16 %v4223_v37  ;;  %v4355_v37 = vld [vmem:[%s6674_s2 + $0x1d8] sm:$0xff] }
  0x5b   :  { %846 = vmatpush.msra.mxu0 %v419_v35  ;;  %906 = vmatpush.msrb.mxu2 %v611_v38  ;;  %v6795_v35 = vld [vmem:[#allocation22_spill] sm:$0xff]  ;;  %v312_v38 = vunpack.c.l.bf16 %v4330_v32  ;;  %v372_v23 = vunpack.c.l.bf16 %v4355_v37 }
  0x5c   :  { %868 = vmatpush.msra.mxu1 %v475_v30  ;;  %888 = vmatpush.msra.mxu3 %v539_v63  ;;  %v383_v43 = vunpack.c.h.bf16 %v6795_v35  ;;  %v4348_v30 = vld [vmem:[%s6674_s2 + $0xd8] sm:$0xff]  ;;  %v508_v63 = vunpack.c.l.bf16 %v4343_v19 }
  0x5d   :  { %847 = vmatpush.msra.mxu0 %v415_v51  ;;  %907 = vmatpush.msrb.mxu2 %v607_v53  ;;  %v4360_v51 = vld [vmem:[%s6674_s2 + $0x3e8] sm:$0xff]  ;;  %v308_v22 = vunpack.c.l.bf16 %v4348_v30  ;;  %v4491_v35 = vld [vmem:[%s6674_s2 + $0x178] sm:$0xff] }
  0x5e   :  { %869 = vmatpush.msra.mxu1 %v471_v44  ;;  %889 = vmatpush.msra.mxu3 %v535_v60  ;;  %v4367_v44 = vld [vmem:[%s6674_s2 + $0xc8] sm:$0xff]  ;;  %v6796_v60 = vld [vmem:[#allocation24_spill] sm:$0xff] }
  0x5f   :  { %848 = vmatpush.msra.mxu0 %v411_v46  ;;  %908 = vmatpush.msrb.mxu2 %v603_v52  ;;  %v4372_v53 = vld [vmem:[%s6674_s2 + $0x1c8] sm:$0xff]  ;;  %v4379_v46 = vld [vmem:[%s6674_s2 + $0x3d8] sm:$0xff]  ;;  %v643_v13 = vunpack.c.h.bf16 %v6796_v60 }
  0x60   :  { %870 = vmatpush.msra.mxu1 %v467_v31  ;;  %890 = vmatpush.msra.mxu3 %v531_v20  ;;  %v504_v31 = vunpack.c.l.bf16 %v4360_v51  ;;  %v4386_v52 = vld [vmem:[%s6674_s2 + $0xb8] sm:$0xff]  ;;  %v304_v20 = vunpack.c.l.bf16 %v4367_v44  ;;  %v368_v25 = vunpack.c.l.bf16 %v4372_v53  ;;  %v4522_v60 = vld [vmem:[%s6674_s2 + $0x2a8] sm:$0xff] }
  0x61   :  { %849 = vmatpush.msra.mxu0 %v407_v9  ;;  %909 = vmatpush.msrb.mxu2 %v599_v41  ;;  %v6797_v9 = vld [vmem:[#allocation26_spill] sm:$0xff]  ;;  %v4405_v41 = vld [vmem:[%s6674_s2 + $0x3c8] sm:$0xff]  ;;  %6803 = vst [vmem:[#allocation6_spill] sm:$0xff] %v4522_v60 }
  0x62   :  { %871 = vmatpush.msra.mxu1 %v463_v62  ;;  %891 = vmatpush.msra.mxu3 %v527_v3  ;;  %v4400_v62 = vld [vmem:[%s6674_s2 + $0x2f8] sm:$0xff]  ;;  %v500_v3 = vunpack.c.l.bf16 %v4379_v46 }
  0x63   :  { %850 = vmatpush.msra.mxu0 %v403_v12  ;;  %910 = vmatpush.msrb.mxu2 %v595_v55  ;;  %v639_v12 = vunpack.c.h.bf16 %v6798_v59  ;;  %v4412_v55 = vld [vmem:[%s6674_s2 + $0xa8] sm:$0xff]  ;;  %v444_v18 = vunpack.c.l.bf16 %v4400_v62  ;;  %v4541_v59 = vld [vmem:[%s6674_s2 + $0x158] sm:$0xff] }
  0x64   :  { %816 = vmatmul.f32.vlgmr.msrb.gmra.mxu3 %v6789_v21  ;;  %872 = vmatpush.msra.mxu1 %v459_v47  ;;  %v6799_v47 = vld [vmem:[#allocation28_spill] sm:$0xff]  ;;  %v4444_v21 = vld [vmem:[%s6674_s2 + $0x198] sm:$0xff] }
  0x65   :  { %892 = vmatpush.msra.mxu3 %v523_v2  ;;  %851 = vmatpush.msra.mxu0 %v399_v5  ;;  %v300_v2 = vunpack.c.l.bf16 %v4386_v52  ;;  %v4425_v5 = vld [vmem:[%s6674_s2 + $0x2e8] sm:$0xff] }
  0x66   :  { %911 = vmatpush.msrb.mxu2 %v591_v49  ;;  %873 = vmatpush.msra.mxu1 %v455_v34  ;;  %v4430_v49 = vld [vmem:[%s6674_s2 + $0x3b8] sm:$0xff]  ;;  %v496_v34 = vunpack.c.l.bf16 %v4405_v41 }
  0x67   :  { %836 = vmatmul.f32.vlgmr.msra.gmra.mxu2 %v6793_v26  ;;  %893 = vmatpush.msra.mxu3 %v519_v11  ;;  %v360_v11 = vunpack.c.l.bf16 %v4417_v10 }
  0x68   :  { %852 = vmatpush.msra.mxu0 %v395_v57  ;;  %912 = vmatpush.msrb.mxu2 %v587_v58  ;;  %v296_v57 = vunpack.c.l.bf16 %v4412_v55  ;;  %v492_v58 = vunpack.c.l.bf16 %v4430_v49 }
  0x69   :  { %874 = vmatpush.msra.mxu1 %v451_v27  ;;  %894 = vmatpush.msra.mxu3 %v515_v15  ;;  %v440_v27 = vunpack.c.l.bf16 %v4425_v5  ;;  %v292_v15 = vunpack.c.l.bf16 %v4437_v56 }
  0x6a   :  { %853 = vmatpush.msra.mxu0 %v391_v17  ;;  %913 = vmatpush.msrb.mxu2 %v583_v24  ;;  %v4461_v17 = vld [vmem:[%s6674_s2 + $0x88] sm:$0xff]  ;;  %v356_v24 = vunpack.c.l.bf16 %v4444_v21 }
  0x6b   :  { %875 = vmatpush.msra.mxu1 %v447_v54  ;;  %895 = vmatpush.msra.mxu3 %v511_v7  ;;  %v4472_v54 = vld [vmem:[%s6674_s2 + $0x2c8] sm:$0xff]  ;;  %v4484_v7 = vld [vmem:[%s6674_s2 + $0x78] sm:$0xff] }
  0x6c   :  { %854 = vmatpush.msra.mxu0 %v387_v42  ;;  %914 = vmatpush.msrb.mxu2 %v579_v61  ;;  %v4479_v42 = vld [vmem:[%s6674_s2 + $0x398] sm:$0xff]  ;;  %v488_v61 = vunpack.c.l.bf16 %v4456_v39 }
  0x6d   :  { %940 = vmatpush.msrb.mxu1 %v316_v8  ;;  %960 = vmatpush.msrb.mxu3 %v380_v29  ;;  %6801 = vst [vmem:[#allocation5_spill] sm:$0xff] %v4479_v42  ;;  %v288_v8 = vunpack.c.l.bf16 %v4461_v17  ;;  %v352_v29 = vunpack.c.l.bf16 %v4467_v28 }
  0x6e   :  { %855 = vmatpush.msra.mxu0 %v383_v43  ;;  %896 = vmatmul.f32.vlgmr.msra.gmra.mxu3 %v4241_v36  ;;  %v4496_v43 = vld [vmem:[%s6674_s2 + $0x2b8] sm:$0xff] }
  0x6f   :  { %915 = vmatpush.msrb.mxu2 %v575_v48  ;;  %941 = vmatpush.msrb.mxu1 %v312_v38  ;;  %v432_v48 = vunpack.c.l.bf16 %v4472_v54  ;;  %v4503_v38 = vld [vmem:[%s6674_s2 + $0x388] sm:$0xff] }
  0x70   :  { %961 = vmatpush.msrb.mxu3 %v376_v1  ;;  %856 = vmatmul.f32.vlgmr.msra.gmra.mxu0 %v6797_v9  ;;  %6802 = vst [vmem:[#allocation9_spill] sm:$0xff] %v4503_v38  ;;  %v4508_v1 = vld [vmem:[%s6674_s2 + $0x68] sm:$0xff]  ;;  %v4534_v9 = vld [vmem:[%s6674_s2 + $0x58] sm:$0xff] }
  0x71   :  { %916 = vmatmul.f32.vlgmr.msrb.gmra.mxu2 %v4251_v6  ;;  %942 = vmatpush.msrb.mxu1 %v308_v22  ;;  %v284_v22 = vunpack.c.l.bf16 %v4484_v7 }
  0x72   :  { %1000 = vmatpush.msra.mxu2 %v508_v63  ;;  %962 = vmatpush.msrb.mxu3 %v372_v23  ;;  %v484_v63 = vunpack.c.l.bf16 %v4479_v42  ;;  %v4517_v23 = vld [vmem:[%s6674_s2 + $0x168] sm:$0xff] }
  0x73   :  { %876 = vmatmul.f32.vlgmr.msra.gmra.mxu1 %v6799_v47  ;;  %934 = vmatpush.msrb.mxu0 %v643_v13  ;;  %v348_v13 = vunpack.c.l.bf16 %v4491_v35  ;;  %v424_v47 = vunpack.c.l.bf16 %v4522_v60 }
  0x74   :  { %1001 = vmatpush.msra.mxu2 %v504_v31  ;;  %943 = vmatpush.msrb.mxu1 %v304_v20  ;;  %v4529_v31 = vld [vmem:[%s6674_s2 + $0x378] sm:$0xff]  ;;  %v480_v20 = vunpack.c.l.bf16 %v4503_v38 }
  0x75   :  { %963 = vmatpush.msrb.mxu3 %v368_v25  ;;  %935 = vmatpush.msrb.mxu0 %v639_v12  ;;  %6804 = vst [vmem:[#allocation11_spill] sm:$0xff] %v4529_v31  ;;  %v280_v25 = vunpack.c.l.bf16 %v4508_v1  ;;  %v4546_v12 = vld [vmem:[%s6674_s2 + $0x298] sm:$0xff] }
  0x76   :  { %1002 = vmatpush.msra.mxu2 %v500_v3  ;;  %944 = vmatpush.msrb.mxu1 %v300_v2  ;;  %6805 = vst [vmem:[#allocation8_spill] sm:$0xff] %v4546_v12  ;;  %v344_v3 = vunpack.c.l.bf16 %v4517_v23  ;;  %v4553_v2 = vld [vmem:[%s6674_s2 + $0x368] sm:$0xff] }
  0x77   :  { %964 = vmatpush.msrb.mxu3 %v364_v40  ;;  %980 = vmatpush.msra.mxu0 %v444_v18  ;;  %6806 = vst [vmem:[#allocation13_spill] sm:$0xff] %v4553_v2  ;;  %v4558_v40 = vld [vmem:[%s6674_s2 + $0x48] sm:$0xff]  ;;  %v476_v18 = vunpack.c.l.bf16 %v4529_v31 }
  0x78   :  { %1003 = vmatpush.msra.mxu2 %v496_v34  ;;  %945 = vmatpush.msrb.mxu1 %v296_v57  ;;  %v276_v34 = vunpack.c.l.bf16 %v4534_v9  ;;  %v4565_v57 = vld [vmem:[%s6674_s2 + $0x148] sm:$0xff] }
  0x79   :  { %965 = vmatpush.msrb.mxu3 %v360_v11  ;;  %981 = vmatpush.msra.mxu0 %v440_v27  ;;  %v4570_v11 = vld [vmem:[%s6674_s2 + $0x288] sm:$0xff]  ;;  %v340_v27 = vunpack.c.l.bf16 %v4541_v59 }
  0x7a   :  { %1004 = vmatpush.msra.mxu2 %v492_v58  ;;  %3346 = vmatmul.msk.f32.vlgmr.msrb.gmra.mxu0 %vm656_vm0, %v4232_v14  ;;  %v428_v14 = vunpack.c.l.bf16 %v4496_v43  ;;  %6807 = vst [vmem:[#allocation10_spill] sm:$0xff] %v4570_v11  ;;  %v420_v58 = vunpack.c.l.bf16 %v4546_v12 }
  0x7b   :  { %946 = vmatpush.msrb.mxu1 %v292_v15  ;;  %966 = vmatpush.msrb.mxu3 %v356_v24  ;;  %v4577_v15 = vld [vmem:[%s6674_s2 + $0x358] sm:$0xff] }
  0x7c   :  { %982 = vmatpush.msra.mxu0 %v436_v4  ;;  %1005 = vmatpush.msra.mxu2 %v488_v61  ;;  %6808 = vst [vmem:[#allocation15_spill] sm:$0xff] %v4577_v15  ;;  %v4582_v24 = vld [vmem:[%s6674_s2 + $0x38] sm:$0xff]  ;;  %v472_v4 = vunpack.c.l.bf16 %v4553_v2  ;;  %v272_v61 = vunpack.c.l.bf16 %v4558_v40 }
  0x7d   :  { %947 = vmatpush.msrb.mxu1 %v288_v8  ;;  %967 = vmatpush.msrb.mxu3 %v352_v29  ;;  %v4589_v8 = vld [vmem:[%s6674_s2 + $0x138] sm:$0xff] }
  0x7e   :  { %983 = vmatpush.msra.mxu0 %v432_v48  ;;  %1006 = vmatpush.msra.mxu2 %v484_v63  ;;  %v4594_v29 = vld [vmem:[%s6674_s2 + $0x278] sm:$0xff]  ;;  %v336_v48 = vunpack.c.l.bf16 %v4565_v57  ;;  %v416_v63 = vunpack.c.l.bf16 %v4570_v11 }
  0x7f   :  { %948 = vmatpush.msrb.mxu1 %v284_v22  ;;  %968 = vmatpush.msrb.mxu3 %v348_v13  ;;  %6809 = vst [vmem:[#allocation12_spill] sm:$0xff] %v4594_v29  ;;  %v4601_v22 = vld [vmem:[%s6674_s2 + $0x348] sm:$0xff] }
  0x80   :  { %984 = vmatpush.msra.mxu0 %v428_v14  ;;  %1007 = vmatpush.msra.mxu2 %v480_v20  ;;  %6810 = vst [vmem:[#allocation17_spill] sm:$0xff] %v4601_v22  ;;  %v4606_v13 = vld [vmem:[%s6674_s2 + $0x28] sm:$0xff]  ;;  %v468_v14 = vunpack.c.l.bf16 %v4577_v15  ;;  %v268_v20 = vunpack.c.l.bf16 %v4582_v24  ;;  %v4630_v15 = vld [vmem:[%s6674_s2 + $0x18] sm:$0xff]  ;;  %v464_v2 = vunpack.c.l.bf16 %v4601_v22 }
  0x81   :  { %949 = vmatpush.msrb.mxu1 %v280_v25  ;;  %969 = vmatpush.msrb.mxu3 %v344_v3  ;;  %v4613_v25 = vld [vmem:[%s6674_s2 + $0x128] sm:$0xff] }
  0x82   :  { %985 = vmatpush.msra.mxu0 %v424_v47  ;;  %1008 = vmatpush.msra.mxu2 %v476_v18  ;;  %v4618_v3 = vld [vmem:[%s6674_s2 + $0x268] sm:$0xff]  ;;  %v332_v47 = vunpack.c.l.bf16 %v4589_v8  ;;  %v412_v18 = vunpack.c.l.bf16 %v4594_v29  ;;  %v4642_v29 = vld [vmem:[%s6674_s2 + $0x258] sm:$0xff]  ;;  %v328_v11 = vunpack.c.l.bf16 %v4613_v25 }
  0x83   :  { %950 = vmatpush.msrb.mxu1 %v276_v34  ;;  %6811 = vst [vmem:[#allocation14_spill] sm:$0xff] %v4618_v3  ;;  %970 = vmatpush.msrb.mxu3 %v340_v27  ;;  %v4625_v34 = vld [vmem:[%s6674_s2 + $0x338] sm:$0xff]  ;;  %v264_v27 = vunpack.c.l.bf16 %v4606_v13  ;;  %v4654_v22 = vld [vmem:[%s6674_s2 + $0x8] sm:$0xff] }
  0x84   :  { %986 = vmatpush.msra.mxu0 %v420_v58  ;;  %6812 = vst [vmem:[#allocation19_spill] sm:$0xff] %v4625_v34  ;;  %1009 = vmatpush.msra.mxu2 %v472_v4  ;;  %v4637_v58 = vld [vmem:[%s6674_s2 + $0x118] sm:$0xff]  ;;  %v408_v4 = vunpack.c.l.bf16 %v4618_v3  ;;  %v460_v31 = vunpack.c.l.bf16 %v4625_v34  ;;  %v4666_v3 = vld [vmem:[%s6674_s2 + $0x248] sm:$0xff] }
  0x85   :  { %951 = vmatpush.msrb.mxu1 %v272_v61  ;;  %6813 = vst [vmem:[#allocation16_spill] sm:$0xff] %v4642_v29  ;;  %971 = vmatpush.msrb.mxu3 %v336_v48  ;;  %v4649_v61 = vld [vmem:[%s6674_s2 + $0x328] sm:$0xff]  ;;  %v260_v48 = vunpack.c.l.bf16 %v4630_v15  ;;  %v324_v12 = vunpack.c.l.bf16 %v4637_v58  ;;  %v4678_v34 = vld [vmem:[%s6674_s2 + $0x4f8] sm:$0xff] }
  0x86   :  { %987 = vmatpush.msra.mxu0 %v416_v63  ;;  %6814 = vst [vmem:[#allocation27_spill] sm:$0xff] %v4649_v61  ;;  %1010 = vmatpush.msra.mxu2 %v468_v14  ;;  %v4661_v63 = vld [vmem:[%s6674_s2 + $0x108] sm:$0xff]  ;;  %v404_v14 = vunpack.c.l.bf16 %v4642_v29  ;;  %v456_v38 = vunpack.c.l.bf16 %v4649_v61  ;;  %v4690_v29 = vld [vmem:[%s6674_s2 + $0x238] sm:$0xff] }
  0x87   :  { %952 = vmatpush.msrb.mxu1 %v268_v20  ;;  %6815 = vst [vmem:[#allocation21_spill] sm:$0xff] %v4661_v63  ;;  %972 = vmatpush.msrb.mxu3 %v332_v47  ;;  %v4673_v20 = vld [vmem:[%s6674_s2 + $0x318] sm:$0xff]  ;;  %v256_v47 = vunpack.c.l.bf16 %v4654_v22  ;;  %v320_v60 = vunpack.c.l.bf16 %v4661_v63  ;;  %v4702_v61 = vld [vmem:[%s6674_s2 + $0x4e8] sm:$0xff] }
  0x88   :  { %6816 = vst [vmem:[#allocation18_spill] sm:$0xff] %v4666_v3  ;;  %988 = vmatpush.msra.mxu0 %v412_v18  ;;  %1011 = vmatpush.msra.mxu2 %v464_v2  ;;  %v4685_v18 = vld [vmem:[%s6674_s2 + $0x5f8] sm:$0xff]  ;;  %v400_v2 = vunpack.c.l.bf16 %v4666_v3  ;;  %v452_v42 = vunpack.c.l.bf16 %v4673_v20  ;;  %v4714_v3 = vld [vmem:[%s6674_s2 + $0x228] sm:$0xff] }
  0x89   :  { %6817 = vst [vmem:[#allocation23_spill] sm:$0xff] %v4673_v20  ;;  %953 = vmatpush.msrb.mxu1 %v264_v27  ;;  %973 = vmatpush.msrb.mxu3 %v328_v11  ;;  %v4697_v27 = vld [vmem:[%s6674_s2 + $0x308] sm:$0xff]  ;;  %v572_v11 = vunpack.c.l.bf16 %v4678_v34  ;;  %v636_v39 = vunpack.c.l.bf16 %v4685_v18  ;;  %v568_v20 = vunpack.c.l.bf16 %v4702_v61  ;;  %v4723_v63 = vld [vmem:[%s6674_s2 + $0x4d8] sm:$0xff] }
  0x8a   :  { %6818 = vst [vmem:[#allocation29_spill] sm:$0xff] %v4690_v29  ;;  %989 = vmatpush.msra.mxu0 %v408_v4  ;;  %1012 = vmatpush.msra.mxu2 %v460_v31  ;;  %v4709_v4 = vld [vmem:[%s6674_s2 + $0x5e8] sm:$0xff]  ;;  %v396_v31 = vunpack.c.l.bf16 %v4690_v29 }
  0x8b   :  { %6819 = vst [vmem:[#allocation20_spill] sm:$0xff] %v4697_v27  ;;  %954 = vmatpush.msrb.mxu1 %v260_v48  ;;  %974 = vmatpush.msrb.mxu3 %v324_v12  ;;  %v448_v48 = vunpack.c.l.bf16 %v4697_v27  ;;  %v4728_v12 = vld [vmem:[%s6674_s2 + $0x5d8] sm:$0xff]  ;;  %v317_v27 = vunpack.c.h.bf16 %v4313_v33  ;;  %v4741_v29 = vld [vmem:[%s6674_s2 + $0x4c8] sm:$0xff] }
  0x8c   :  { %6820 = vst [vmem:[#allocation22_spill] sm:$0xff] %v4714_v3  ;;  %990 = vmatpush.msra.mxu0 %v404_v14  ;;  %1013 = vmatpush.msra.mxu2 %v456_v38  ;;  %v632_v14 = vunpack.c.l.bf16 %v4709_v4  ;;  %v392_v38 = vunpack.c.l.bf16 %v4714_v3  ;;  %v628_v3 = vunpack.c.l.bf16 %v4728_v12  ;;  %v4753_v33 = vld [vmem:[%s6674_s2 + $0x208] sm:$0xff] }
  0x8d   :  { %955 = vmatpush.msrb.mxu1 %v256_v47  ;;  %6821 = vst [vmem:[#allocation24_spill] sm:$0xff] %v4728_v12  ;;  %975 = vmatpush.msrb.mxu3 %v320_v60  ;;  %v4735_v47 = vld [vmem:[%s6674_s2 + $0x218] sm:$0xff]  ;;  %v4746_v60 = vld [vmem:[%s6674_s2 + $0x5c8] sm:$0xff] }
  0x8e   :  { %991 = vmatpush.msra.mxu0 %v400_v2  ;;  %6822 = vst [vmem:[#allocation26_spill] sm:$0xff] %v4735_v47  ;;  %1014 = vmatpush.msra.mxu2 %v452_v42  ;;  %v564_v2 = vunpack.c.l.bf16 %v4723_v63  ;;  %v388_v42 = vunpack.c.l.bf16 %v4735_v47  ;;  %v624_v12 = vunpack.c.l.bf16 %v4746_v60  ;;  %v4792_v47 = vld [vmem:[%s6674_s2 + $0x608] sm:$0xff] }
  0x8f   :  { %1020 = vmatpush.msra.mxu1 %v572_v11  ;;  %1040 = vmatpush.msra.mxu3 %v636_v39  ;;  %6823 = vst [vmem:[#allocation25_spill] sm:$0xff] %v4753_v33  ;;  %v313_v11 = vunpack.c.h.bf16 %v4330_v32  ;;  %v4760_v39 = vld [vmem:[%s6674_s2 + $0x4b8] sm:$0xff]  ;;  %v384_v32 = vunpack.c.l.bf16 %v4753_v33 }
  0x90   :  { %992 = vmatpush.msra.mxu0 %v396_v31  ;;  %1015 = vmatpush.msra.mxu2 %v448_v48  ;;  %v560_v31 = vunpack.c.l.bf16 %v4741_v29  ;;  %v4767_v48 = vld [vmem:[%s6674_s2 + $0x5b8] sm:$0xff]  ;;  %6827 = vst [vmem:[#allocation32_spill] sm:$0xff] %v4792_v47 }
  0x91   :  { %1021 = vmatpush.msra.mxu1 %v568_v20  ;;  %1041 = vmatpush.msra.mxu3 %v632_v14  ;;  %6824 = vst [vmem:[#allocation28_spill] sm:$0xff] %v4767_v48  ;;  %v4774_v20 = vld [vmem:[%s6674_s2 + $0x618] sm:$0xff]  ;;  %v4779_v14 = vld [vmem:[%s6674_s2 + $0x4a8] sm:$0xff]  ;;  %v620_v33 = vunpack.c.l.bf16 %v4767_v48 }
  0x92   :  { %993 = vmatpush.msra.mxu0 %v392_v38  ;;  %976 = vmatmul.f32.vlgmr.msrb.gmra.mxu3 %v6793_v26  ;;  %6825 = vst [vmem:[#allocation30_spill] sm:$0xff] %v4774_v20  ;;  %v556_v38 = vunpack.c.l.bf16 %v4760_v39  ;;  %v4785_v26 = vld [vmem:[%s6674_s2 + $0x5a8] sm:$0xff] }
  0x93   :  { %1080 = vmatpush.msrb.mxu2 %v317_v27  ;;  %1022 = vmatpush.msra.mxu1 %v564_v2  ;;  %6826 = vst [vmem:[#allocation31_spill] sm:$0xff] %v4785_v26  ;;  %v309_v27 = vunpack.c.h.bf16 %v4348_v30  ;;  %v644_v2 = vunpack.c.l.bf16 %v4774_v20  ;;  %v4804_v30 = vld [vmem:[%s6770_s17] sm:$0xff]  ;;  %v616_v48 = vunpack.c.l.bf16 %v4785_v26  ;;  %v640_v20 = vunpack.c.l.bf16 %v4792_v47  ;;  %v4831_v26 = vld [vmem:[%s6674_s2 + $0x588] sm:$0xff] }
  0x94   :  { %1042 = vmatpush.msra.mxu3 %v628_v3  ;;  %994 = vmatpush.msra.mxu0 %v388_v42  ;;  %v4797_v3 = vld [vmem:[%s6674_s2 + $0x498] sm:$0xff]  ;;  %v552_v42 = vunpack.c.l.bf16 %v4779_v14  ;;  %6828 = vst [vmem:[#allocation33_spill] sm:$0xff] %v4804_v30 }
  0x95   :  { %1081 = vmatpush.msrb.mxu2 %v313_v11  ;;  %1023 = vmatpush.msra.mxu1 %v560_v31  ;;  %v305_v11 = vunpack.c.h.bf16 %v4367_v44  ;;  %v4817_v31 = vld [vmem:[%s6770_s17 + $0x18] sm:$0xff]  ;;  %v4825_v44 = vld [vmem:[%s6674_s2 + $0x488] sm:$0xff] }
  0x96   :  { %1043 = vmatpush.msra.mxu3 %v624_v12  ;;  %956 = vmatmul.f32.vlgmr.msrb.gmra.mxu1 %v4804_v30  ;;  %v4812_v12 = vld [vmem:[%s6674_s2 + $0x598] sm:$0xff]  ;;  %6829 = vst [vmem:[#allocation34_spill] sm:$0xff] %v4817_v31  ;;  %v301_v30 = vunpack.c.h.bf16 %v4386_v52  ;;  %v297_v52 = vunpack.c.h.bf16 %v4412_v55  ;;  %v4857_v55 = vld [vmem:[%s6770_s17 + $0x10] sm:$0xff] }
  0x97   :  { %995 = vmatpush.msra.mxu0 %v384_v32  ;;  %1016 = vmatmul.f32.vlgmr.msra.gmra.mxu2 %v4817_v31  ;;  %v548_v32 = vunpack.c.l.bf16 %v4797_v3  ;;  %v612_v47 = vunpack.c.l.bf16 %v4812_v12  ;;  %v4838_v31 = vld [vmem:[%s6674_s2 + $0x478] sm:$0xff]  ;;  %6830 = vst [vmem:[#allocation35_spill] sm:$0xff] %v4857_v55 }
  0x98   :  { %1024 = vmatpush.msra.mxu1 %v556_v38  ;;  %1082 = vmatpush.msrb.mxu2 %v309_v27  ;;  %v381_v38 = vunpack.c.h.bf16 %v4321_v50  ;;  %v4845_v27 = vld [vmem:[%s6674_s2 + $0x578] sm:$0xff]  ;;  %v377_v50 = vunpack.c.h.bf16 %v4335_v0  ;;  %v4865_v0 = vld [vmem:[%s6674_s2 + $0x568] sm:$0xff] }
  0x99   :  { %1044 = vmatpush.msra.mxu3 %v620_v33  ;;  %1074 = vmatpush.msrb.mxu0 %v644_v2  ;;  %v544_v33 = vunpack.c.l.bf16 %v4825_v44  ;;  %v608_v2 = vunpack.c.l.bf16 %v4831_v26 }
  0x9a   :  { %1025 = vmatpush.msra.mxu1 %v552_v42  ;;  %1083 = vmatpush.msrb.mxu2 %v305_v11  ;;  %v4852_v42 = vld [vmem:[%s6674_s2 + $0x468] sm:$0xff]  ;;  %v373_v11 = vunpack.c.h.bf16 %v4355_v37  ;;  %v369_v37 = vunpack.c.h.bf16 %v4372_v53  ;;  %v365_v53 = vunpack.c.h.bf16 %v4391_v45  ;;  %v361_v45 = vunpack.c.h.bf16 %v4417_v10 }
  0x9b   :  { %1045 = vmatpush.msra.mxu3 %v616_v48  ;;  %1075 = vmatpush.msrb.mxu0 %v640_v20  ;;  %v293_v48 = vunpack.c.h.bf16 %v4437_v56  ;;  %v540_v20 = vunpack.c.l.bf16 %v4838_v31  ;;  %v289_v56 = vunpack.c.h.bf16 %v4461_v17  ;;  %v285_v17 = vunpack.c.h.bf16 %v4484_v7 }
  0x9c   :  { %1026 = vmatpush.msra.mxu1 %v548_v32  ;;  %996 = vmatmul.f32.vlgmr.msra.gmra.mxu0 %v4857_v55  ;;  %v604_v32 = vunpack.c.l.bf16 %v4845_v27  ;;  %v4872_v55 = vld [vmem:[%s6674_s2 + $0x458] sm:$0xff]  ;;  %v281_v7 = vunpack.c.h.bf16 %v4508_v1  ;;  %v277_v1 = vunpack.c.h.bf16 %v4534_v9  ;;  %v357_v10 = vunpack.c.h.bf16 %v4444_v21 }
  0x9d   :  { %1084 = vmatpush.msrb.mxu2 %v301_v30  ;;  %1100 = vmatpush.msra.mxu0 %v381_v38  ;;  %v536_v30 = vunpack.c.l.bf16 %v4852_v42  ;;  %v4879_v38 = vld [vmem:[%s6674_s2 + $0x558] sm:$0xff]  ;;  %v273_v9 = vunpack.c.h.bf16 %v4558_v40  ;;  %v353_v21 = vunpack.c.h.bf16 %v4467_v28  ;;  %v269_v40 = vunpack.c.h.bf16 %v4582_v24 }
  0x9e   :  { %1046 = vmatpush.msra.mxu3 %v612_v47  ;;  %1027 = vmatpush.msra.mxu1 %v544_v33  ;;  %v600_v47 = vunpack.c.l.bf16 %v4865_v0  ;;  %v532_v33 = vunpack.c.l.bf16 %v4872_v55  ;;  %v349_v28 = vunpack.c.h.bf16 %v4491_v35  ;;  %v345_v24 = vunpack.c.h.bf16 %v4517_v23 }
  0x9f   :  { %1085 = vmatpush.msrb.mxu2 %v297_v52  ;;  %1101 = vmatpush.msra.mxu0 %v377_v50  ;;  %v4886_v52 = vld [vmem:[%s6674_s2 + $0x448] sm:$0xff]  ;;  %v261_v35 = vunpack.c.h.bf16 %v4630_v15  ;;  %v257_v23 = vunpack.c.h.bf16 %v4654_v22  ;;  %v505_v15 = vunpack.c.h.bf16 %v4360_v51  ;;  %v497_v51 = vunpack.c.h.bf16 %v4405_v41  ;;  %v6832_v41 = vld [vmem:[#allocation21_spill] sm:$0xff] }
  0xa0   :  { %1047 = vmatpush.msra.mxu3 %v608_v2  ;;  %1028 = vmatpush.msra.mxu1 %v540_v20  ;;  %v4893_v50 = vld [vmem:[%s6674_s2 + $0x548] sm:$0xff]  ;;  %v596_v2 = vunpack.c.l.bf16 %v4879_v38  ;;  %v528_v20 = vunpack.c.l.bf16 %v4886_v52  ;;  %v493_v22 = vunpack.c.h.bf16 %v4430_v49  ;;  %v557_v49 = vunpack.c.h.bf16 %v4760_v39 }
  0xa1   :  { %1086 = vmatpush.msrb.mxu2 %v293_v48  ;;  %1102 = vmatpush.msra.mxu0 %v373_v11  ;;  %v4900_v48 = vld [vmem:[%s6674_s2 + $0x438] sm:$0xff] }
  0xa2   :  { %1048 = vmatpush.msra.mxu3 %v604_v32  ;;  %1029 = vmatpush.msra.mxu1 %v536_v30  ;;  %v4907_v11 = vld [vmem:[%s6674_s2 + $0x538] sm:$0xff]  ;;  %v592_v32 = vunpack.c.l.bf16 %v4893_v50  ;;  %v524_v30 = vunpack.c.l.bf16 %v4900_v48 }
  0xa3   :  { %1087 = vmatpush.msrb.mxu2 %v289_v56  ;;  %1103 = vmatpush.msra.mxu0 %v369_v37  ;;  %v4914_v56 = vld [vmem:[%s6674_s2 + $0x428] sm:$0xff] }
  0xa4   :  { %1049 = vmatpush.msra.mxu3 %v600_v47  ;;  %1030 = vmatpush.msra.mxu1 %v532_v33  ;;  %v4921_v37 = vld [vmem:[%s6674_s2 + $0x528] sm:$0xff]  ;;  %v588_v47 = vunpack.c.l.bf16 %v4907_v11  ;;  %v520_v33 = vunpack.c.l.bf16 %v4914_v56 }
  0xa5   :  { %1088 = vmatpush.msrb.mxu2 %v285_v17  ;;  %6831 = vst [vmem:[#allocation36_spill] sm:$0xff] %v4921_v37  ;;  %1104 = vmatpush.msra.mxu0 %v365_v53  ;;  %v4928_v17 = vld [vmem:[%s6674_s2 + $0x418] sm:$0xff] }
  0xa6   :  { %1050 = vmatpush.msra.mxu3 %v596_v2  ;;  %1031 = vmatpush.msra.mxu1 %v528_v20  ;;  %v4935_v53 = vld [vmem:[%s6674_s2 + $0x518] sm:$0xff]  ;;  %v584_v2 = vunpack.c.l.bf16 %v4921_v37  ;;  %v516_v20 = vunpack.c.l.bf16 %v4928_v17 }
  0xa7   :  { %1089 = vmatpush.msrb.mxu2 %v281_v7  ;;  %1105 = vmatpush.msra.mxu0 %v361_v45  ;;  %v4942_v7 = vld [vmem:[%s6674_s2 + $0x408] sm:$0xff] }
  0xa8   :  { %1051 = vmatpush.msra.mxu3 %v592_v32  ;;  %1032 = vmatpush.msra.mxu1 %v524_v30  ;;  %v4949_v45 = vld [vmem:[%s6674_s2 + $0x508] sm:$0xff]  ;;  %v580_v32 = vunpack.c.l.bf16 %v4935_v53  ;;  %v512_v30 = vunpack.c.l.bf16 %v4942_v7 }
  0xa9   :  { %1090 = vmatpush.msrb.mxu2 %v277_v1  ;;  %1106 = vmatpush.msra.mxu0 %v357_v10  ;;  %v265_v1 = vunpack.c.h.bf16 %v4606_v13  ;;  %v576_v37 = vunpack.c.l.bf16 %v4949_v45  ;;  %v341_v10 = vunpack.c.h.bf16 %v4541_v59  ;;  %v509_v13 = vunpack.c.h.bf16 %v4343_v19 }
  0xaa   :  { %1052 = vmatpush.msra.mxu3 %v588_v47  ;;  %1033 = vmatpush.msra.mxu1 %v520_v33  ;;  %v445_v47 = vunpack.c.h.bf16 %v4400_v62  ;;  %v573_v59 = vunpack.c.h.bf16 %v4678_v34  ;;  %v333_v19 = vunpack.c.h.bf16 %v4589_v8  ;;  %v441_v62 = vunpack.c.h.bf16 %v4425_v5  ;;  %v6835_v33 = vld [vmem:[#allocation6_spill] sm:$0xff] }
  0xab   :  { %1091 = vmatpush.msrb.mxu2 %v273_v9  ;;  %1107 = vmatpush.msra.mxu0 %v353_v21  ;;  %v337_v9 = vunpack.c.h.bf16 %v4565_v57  ;;  %v569_v57 = vunpack.c.h.bf16 %v4702_v61  ;;  %v565_v8 = vunpack.c.h.bf16 %v4723_v63  ;;  %v433_v5 = vunpack.c.h.bf16 %v4472_v54  ;;  %v6833_v61 = vld [vmem:[#allocation7_spill] sm:$0xff]  ;;  %v4985_v54 = vld [vmem:[%s6770_s17 + $0x30] sm:$0xff] }
  0xac   :  { %1053 = vmatpush.msra.mxu3 %v584_v2  ;;  %1034 = vmatpush.msra.mxu1 %v516_v20  ;;  %v321_v34 = vunpack.c.h.bf16 %v6832_v41  ;;  %v489_v63 = vunpack.c.h.bf16 %v6833_v61  ;;  %v425_v21 = vunpack.c.h.bf16 %v6835_v33  ;;  %v553_v2 = vunpack.c.h.bf16 %v4779_v14  ;;  %v6836_v20 = vld [vmem:[#allocation9_spill] sm:$0xff] }
  0xad   :  { %1092 = vmatpush.msrb.mxu2 %v269_v40  ;;  %1108 = vmatpush.msra.mxu0 %v349_v28  ;;  %v633_v40 = vunpack.c.h.bf16 %v4709_v4  ;;  %v481_v28 = vunpack.c.h.bf16 %v6836_v20  ;;  %v545_v4 = vunpack.c.h.bf16 %v4825_v44  ;;  %v609_v41 = vunpack.c.h.bf16 %v4831_v26  ;;  %v6856_v20 = vld [vmem:[#allocation22_spill] sm:$0xff] }
  0xae   :  { %1054 = vmatpush.msra.mxu3 %v580_v32  ;;  %1035 = vmatpush.msra.mxu1 %v512_v30  ;;  %v6837_v32 = vld [vmem:[#allocation8_spill] sm:$0xff]  ;;  %v521_v26 = vunpack.c.h.bf16 %v4914_v56  ;;  %v597_v56 = vunpack.c.h.bf16 %v4879_v38  ;;  %v593_v38 = vunpack.c.h.bf16 %v4893_v50 }
  0xaf   :  { %1093 = vmatpush.msrb.mxu2 %v265_v1  ;;  %1109 = vmatpush.msra.mxu0 %v345_v24  ;;  %v421_v39 = vunpack.c.h.bf16 %v6837_v32  ;;  %v6838_v1 = vld [vmem:[#allocation24_spill] sm:$0xff]  ;;  %v6839_v24 = vld [vmem:[#allocation11_spill] sm:$0xff] }
  0xb0   :  { %1055 = vmatpush.msra.mxu3 %v576_v37  ;;  %1036 = vmatmul.f32.vlgmr.msra.gmra.mxu1 %v4241_v36  ;;  %v501_v37 = vunpack.c.h.bf16 %v4379_v46  ;;  %v329_v36 = vunpack.c.h.bf16 %v4613_v25  ;;  %v325_v46 = vunpack.c.h.bf16 %v4637_v58  ;;  %v429_v25 = vunpack.c.h.bf16 %v4496_v43  ;;  %v6834_v43 = vld [vmem:[#allocation5_spill] sm:$0xff]  ;;  %v5044_v32 = vld [vmem:[%s6676_s4 + $0x70] sm:$0xff] }
  0xb1   :  { %1056 = vmatmul.f32.vlgmr.msra.gmra.mxu3 %v4251_v6  ;;  %1094 = vmatpush.msrb.mxu2 %v261_v35  ;;  %v437_v6 = vunpack.c.h.bf16 %v4449_v16  ;;  %v561_v16 = vunpack.c.h.bf16 %v4741_v29  ;;  %v637_v29 = vunpack.c.h.bf16 %v4685_v18  ;;  %v485_v58 = vunpack.c.h.bf16 %v6834_v43  ;;  %v6853_v43 = vld [vmem:[#allocation23_spill] sm:$0xff] }
  0xb2   :  { %1110 = vmatpush.msra.mxu0 %v341_v10  ;;  %1140 = vmatpush.msrb.mxu3 %v509_v13  ;;  %v549_v18 = vunpack.c.h.bf16 %v4797_v3  ;;  %v629_v30 = vunpack.c.h.bf16 %v6838_v1  ;;  %v477_v35 = vunpack.c.h.bf16 %v6839_v24  ;;  %v6840_v10 = vld [vmem:[#allocation10_spill] sm:$0xff]  ;;  %v625_v13 = vunpack.c.h.bf16 %v4746_v60 }
  0xb3   :  { %1120 = vmatpush.msrb.mxu1 %v445_v47  ;;  %1095 = vmatpush.msrb.mxu2 %v257_v23  ;;  %v417_v14 = vunpack.c.h.bf16 %v6840_v10  ;;  %v6841_v47 = vld [vmem:[#allocation13_spill] sm:$0xff]  ;;  %v537_v60 = vunpack.c.h.bf16 %v4852_v42  ;;  %v529_v42 = vunpack.c.h.bf16 %v4886_v52  ;;  %v513_v24 = vunpack.c.h.bf16 %v4942_v7  ;;  %v5055_v10 = vld [vmem:[%s6676_s4 + $0x68] sm:$0xff] }
  0xb4   :  { %1111 = vmatpush.msra.mxu0 %v337_v9  ;;  %1141 = vmatpush.msrb.mxu3 %v505_v15  ;;  %v473_v23 = vunpack.c.h.bf16 %v6841_v47  ;;  %v6842_v9 = vld [vmem:[#allocation12_spill] sm:$0xff]  ;;  %v541_v15 = vunpack.c.h.bf16 %v4838_v31  ;;  %v6854_v52 = vld [vmem:[#allocation29_spill] sm:$0xff]  ;;  %v589_v7 = vunpack.c.h.bf16 %v4907_v11  ;;  %v6859_v47 = vld [vmem:[#allocation34_spill] sm:$0xff] }
  0xb5   :  { %1160 = vmatpush.msra.mxu2 %v573_v59  ;;  %1121 = vmatpush.msrb.mxu1 %v441_v62  ;;  %v413_v3 = vunpack.c.h.bf16 %v6842_v9  ;;  %v6843_v59 = vld [vmem:[#allocation28_spill] sm:$0xff]  ;;  %v6844_v62 = vld [vmem:[#allocation15_spill] sm:$0xff]  ;;  %v397_v33 = vunpack.c.h.bf16 %v6854_v52  ;;  %v697_v9 = vpop.f32.mrf.mxu1  ;;  %v5070_v11 = vld [vmem:[%s6676_s4 + $0x58] sm:$0xff] }
  0xb6   :  { %1112 = vmatpush.msra.mxu0 %v333_v19  ;;  %1142 = vmatpush.msrb.mxu3 %v501_v37  ;;  %v621_v19 = vunpack.c.h.bf16 %v6843_v59  ;;  %v469_v37 = vunpack.c.h.bf16 %v6844_v62  ;;  %v6861_v59 = vld [vmem:[#allocation30_spill] sm:$0xff]  ;;  %v5076_v62 = vld [vmem:[%s6676_s4 + $0xf8] sm:$0xff] }
  0xb7   :  { %1161 = vmatpush.msra.mxu2 %v569_v57  ;;  %1122 = vmatpush.msrb.mxu1 %v437_v6  ;;  %v6845_v57 = vld [vmem:[#allocation14_spill] sm:$0xff]  ;;  %v5137_v52 = vld [vmem:[%s6676_s4 + $0xd8] sm:$0xff] }
  0xb8   :  { %1113 = vmatpush.msra.mxu0 %v329_v36  ;;  %1143 = vmatpush.msrb.mxu3 %v497_v51  ;;  %v409_v44 = vunpack.c.h.bf16 %v6845_v57  ;;  %v6846_v36 = vld [vmem:[#allocation31_spill] sm:$0xff]  ;;  %v6847_v51 = vld [vmem:[#allocation17_spill] sm:$0xff]  ;;  %v3471_v57 = vld [vmem:[%s6770_s17 + $0x20] sm:$0xff] }
  0xb9   :  { %1162 = vmatpush.msra.mxu2 %v565_v8  ;;  %3347 = vmatmul.msk.f32.vlgmr.msrb.gmra.mxu0 %vm656_vm0, %v4985_v54  ;;  %v617_v6 = vunpack.c.h.bf16 %v6846_v36  ;;  %v465_v8 = vunpack.c.h.bf16 %v6847_v51  ;;  %v5089_v36 = vld [vmem:[%s6676_s4 + $0x50] sm:$0xff] }
  0xba   :  { %1123 = vmatpush.msrb.mxu1 %v433_v5  ;;  %1114 = vmatpush.msra.mxu0 %v325_v46  ;;  %v6848_v5 = vld [vmem:[#allocation16_spill] sm:$0xff]  ;;  %v533_v46 = vunpack.c.h.bf16 %v4872_v55  ;;  %v605_v55 = vunpack.c.h.bf16 %v4845_v27  ;;  %v5035_v27 = vld [vmem:[%s6675_s3] sm:$0xf] }
  0xbb   :  { %1144 = vmatpush.msrb.mxu3 %v493_v22  ;;  %1163 = vmatpush.msra.mxu2 %v561_v16  ;;  %v405_v31 = vunpack.c.h.bf16 %v6848_v5  ;;  %v613_v22 = vunpack.c.h.bf16 %v4812_v12  ;;  %v6849_v16 = vld [vmem:[#allocation19_spill] sm:$0xff]  ;;  %v525_v12 = vunpack.c.h.bf16 %v4900_v48  ;;  %v6855_v48 = vld [vmem:[#allocation20_spill] sm:$0xff] }
  0xbc   :  { %1124 = vmatpush.msrb.mxu1 %v429_v25  ;;  %1115 = vmatpush.msra.mxu0 %v321_v34  ;;  %v461_v25 = vunpack.c.h.bf16 %v6849_v16  ;;  %v6850_v34 = vld [vmem:[#allocation27_spill] sm:$0xff]  ;;  %v577_v16 = vunpack.c.h.bf16 %v4949_v45  ;;  %v5115_v45 = vld [vmem:[%s6676_s4 + $0x40] sm:$0xff] }
  0xbd   :  { %1145 = vmatpush.msrb.mxu3 %v489_v63  ;;  %1164 = vmatpush.msra.mxu2 %v557_v49  ;;  %v457_v61 = vunpack.c.h.bf16 %v6850_v34  ;;  %v6851_v63 = vld [vmem:[#allocation18_spill] sm:$0xff]  ;;  %v6863_v5 = vld [vmem:[#allocation35_spill] sm:$0xff] }
  0xbe   :  { %1180 = vmatpush.msrb.mxu0 %v637_v29  ;;  %1125 = vmatpush.msrb.mxu1 %v425_v21  ;;  %v401_v49 = vunpack.c.h.bf16 %v6851_v63  ;;  %v6852_v29 = vld [vmem:[#allocation33_spill] sm:$0xff]  ;;  %v601_v21 = vunpack.c.h.bf16 %v4865_v0  ;;  %v517_v0 = vunpack.c.h.bf16 %v4928_v17  ;;  %v677_v17 = vpop.f32.mrf.mxu0 }
  0xbf   :  { %1146 = vmatpush.msrb.mxu3 %v485_v58  ;;  %1165 = vmatpush.msra.mxu2 %v553_v2  ;;  %v453_v58 = vunpack.c.h.bf16 %v6853_v43  ;;  %v5030_v2 = vld [vmem:[%s6676_s4 + $0x78] sm:$0xff]  ;;  %v3472_v43 = vld [vmem:[%s6770_s17 + $0x28] sm:$0xff] }
  0xc0   :  { %1181 = vmatpush.msrb.mxu0 %v633_v40  ;;  %1126 = vmatpush.msrb.mxu1 %v421_v39  ;;  %v449_v40 = vunpack.c.h.bf16 %v6855_v48  ;;  %v1312_v39 = vunpack.c.l.bf16 %v5030_v2 }
  0xc1   :  { %1147 = vmatpush.msrb.mxu3 %v481_v28  ;;  %1166 = vmatpush.msra.mxu2 %v549_v18  ;;  %v393_v28 = vunpack.c.h.bf16 %v6856_v20  ;;  %v6857_v18 = vld [vmem:[#allocation26_spill] sm:$0xff]  ;;  %v5151_v20 = vld [vmem:[%s6676_s4 + $0xd0] sm:$0xff] }
  0xc2   :  { %1182 = vmatpush.msrb.mxu0 %v629_v30  ;;  %1127 = vmatpush.msrb.mxu1 %v417_v14  ;;  %v389_v1 = vunpack.c.h.bf16 %v6857_v18  ;;  %v648_v30 = vperm.slane %v5035_v27, 0  ;;  %v6858_v14 = vld [vmem:[#allocation25_spill] sm:$0xff]  ;;  %v5163_v18 = vld [vmem:[%s6676_s4 + $0xc8] sm:$0xff] }
  0xc3   :  { %1148 = vmatpush.msrb.mxu3 %v477_v35  ;;  %1167 = vmatpush.msra.mxu2 %v545_v4  ;;  %v1310_v35 = vunpack.c.l.bf16 %v5044_v32  ;;  %v385_v4 = vunpack.c.h.bf16 %v6858_v14  ;;  %v5181_v14 = vld [vmem:[%s6676_s4 + $0x18] sm:$0xff] }
  0xc4   :  { %1183 = vmatpush.msrb.mxu0 %v625_v13  ;;  %1128 = vmatpush.msrb.mxu1 %v413_v3  ;;  %v5062_v13 = vld [vmem:[%s6676_s4 + $0x60] sm:$0xff]  ;;  %v678_v50 = vadd.f32 %v677_v17, %v648_v30  ;;  %v6860_v3 = vld [vmem:[#allocation36_spill] sm:$0xff] }
  0xc5   :  { %1149 = vmatpush.msrb.mxu3 %v473_v23  ;;  %1168 = vmatpush.msra.mxu2 %v541_v15  ;;  %v1308_v23 = vunpack.c.l.bf16 %v5055_v10  ;;  %v585_v15 = vunpack.c.h.bf16 %v6860_v3  ;;  %v5168_v30 = vld [vmem:[%s6676_s4 + $0x20] sm:$0xff] }
  0xc6   :  { %1184 = vmatpush.msrb.mxu0 %v621_v19  ;;  %1129 = vmatpush.msrb.mxu1 %v409_v44  ;;  %v645_v19 = vunpack.c.h.bf16 %v6861_v59  ;;  %v1306_v44 = vunpack.c.l.bf16 %v5062_v13 }
  0xc7   :  { %1150 = vmatpush.msrb.mxu3 %v469_v37  ;;  %1169 = vmatpush.msra.mxu2 %v537_v60  ;;  %v3470_v37 = vld [vmem:[%s6770_s17 + $0x8] sm:$0xff]  ;;  %v581_v60 = vunpack.c.h.bf16 %v4935_v53  ;;  %v717_v53 = vpop.f32.mrf.mxu2 }
  0xc8   :  { %1185 = vmatpush.msrb.mxu0 %v617_v6  ;;  %1130 = vmatpush.msrb.mxu1 %v405_v31  ;;  %v6862_v6 = vld [vmem:[#allocation32_spill] sm:$0xff]  ;;  %v1304_v31 = vunpack.c.l.bf16 %v5070_v11 }
  0xc9   :  { %1151 = vmatpush.msrb.mxu3 %v465_v8  ;;  %1170 = vmatpush.msra.mxu2 %v533_v46  ;;  %v641_v51 = vunpack.c.h.bf16 %v6862_v6  ;;  %v698_v8 = vadd.f32 %v697_v9, %v678_v50  ;;  %v1344_v46 = vunpack.c.l.bf16 %v5076_v62  ;;  %v1290_v50 = vunpack.c.l.bf16 %v5168_v30 }
  0xca   :  { %1186 = vmatpush.msrb.mxu0 %v613_v22  ;;  %1096 = vmatmul.f32.vlgmr.msrb.gmra.mxu2 %v6852_v29  ;;  %v5098_v22 = vld [vmem:[%s6676_s4 + $0xf0] sm:$0xff] }
  0xcb   :  { %1152 = vmatpush.msrb.mxu3 %v461_v25  ;;  %1171 = vmatpush.msra.mxu2 %v529_v42  ;;  %v5104_v25 = vld [vmem:[%s6676_s4 + $0x48] sm:$0xff]  ;;  %v1302_v42 = vunpack.c.l.bf16 %v5089_v36  ;;  %v1342_v34 = vunpack.c.l.bf16 %v5098_v22 }
  0xcc   :  { %1187 = vmatpush.msrb.mxu0 %v609_v41  ;;  %1131 = vmatpush.msrb.mxu1 %v401_v49  ;;  %v5110_v41 = vld [vmem:[%s6676_s4 + $0xe8] sm:$0xff]  ;;  %v1300_v63 = vunpack.c.l.bf16 %v5104_v25  ;;  %v5122_v49 = vld [vmem:[%s6676_s4 + $0xe0] sm:$0xff] }
  0xcd   :  { %1153 = vmatpush.msrb.mxu3 %v457_v61  ;;  %1172 = vmatpush.msra.mxu2 %v525_v12  ;;  %v718_v61 = vadd.f32 %v717_v53, %v698_v8  ;;  %v737_v12 = vpop.f32.mrf.mxu3  ;;  %v1340_v29 = vunpack.c.l.bf16 %v5110_v41  ;;  %v5217_v8 = vld [vmem:[%s6676_s4] sm:$0xff] }
  0xce   :  { %1188 = vmatpush.msrb.mxu0 %v605_v55  ;;  %1132 = vmatpush.msrb.mxu1 %v397_v33  ;;  %v5127_v55 = vld [vmem:[%s6676_s4 + $0x38] sm:$0xff]  ;;  %v757_v33 = vpop.f32.mrf.mxu0  ;;  %v5224_v53 = vld [vmem:[%s6676_s4 + $0xa0] sm:$0xff] }
  0xcf   :  { %1154 = vmatpush.msrb.mxu3 %v453_v58  ;;  %1173 = vmatpush.msra.mxu2 %v521_v26  ;;  %v1298_v58 = vunpack.c.l.bf16 %v5115_v45  ;;  %v5142_v26 = vld [vmem:[%s6676_s4 + $0x30] sm:$0xff]  ;;  %v738_v48 = vadd.f32 %v737_v12, %v718_v61 }
  0xd0   :  { %1189 = vmatpush.msrb.mxu0 %v601_v21  ;;  %1133 = vmatpush.msrb.mxu1 %v393_v28  ;;  %v1338_v21 = vunpack.c.l.bf16 %v5122_v49  ;;  %v5156_v28 = vld [vmem:[%s6676_s4 + $0x28] sm:$0xff] }
  0xd1   :  { %1155 = vmatpush.msrb.mxu3 %v449_v40  ;;  %1174 = vmatpush.msra.mxu2 %v517_v0  ;;  %v1296_v40 = vunpack.c.l.bf16 %v5127_v55  ;;  %v1336_v0 = vunpack.c.l.bf16 %v5137_v52  ;;  %v1292_v17 = vunpack.c.l.bf16 %v5156_v28 }
  0xd2   :  { %1190 = vmatpush.msrb.mxu0 %v597_v56  ;;  %1134 = vmatpush.msrb.mxu1 %v389_v1  ;;  %v758_v56 = vadd.f32 %v757_v33, %v738_v48  ;;  %v777_v1 = vpop.f32.mrf.mxu1  ;;  %v5238_v33 = vld [vmem:[%s6676_s4 + $0x90] sm:$0xff] }
  0xd3   :  { %1391 = vmatpush.msra.mxu3 %v1312_v39  ;;  %1175 = vmatpush.msra.mxu2 %v513_v24  ;;  %v797_v39 = vpop.f32.mrf.mxu2  ;;  %v1334_v24 = vunpack.c.l.bf16 %v5151_v20 }
  0xd4   :  { %1156 = vmatmul.f32.vlgmr.msrb.gmra.mxu3 %v6859_v47  ;;  %1191 = vmatpush.msrb.mxu0 %v593_v38  ;;  %v649_v38 = vperm.slane %v5035_v27, 1  ;;  %v5188_v47 = vld [vmem:[%s6676_s4 + $0xb8] sm:$0xff] }
  0xd5   :  { %1392 = vmatpush.msra.mxu3 %v1310_v35  ;;  %1116 = vmatmul.f32.vlgmr.msra.gmra.mxu0 %v3470_v37  ;;  %v5176_v35 = vld [vmem:[%s6676_s4 + $0xc0] sm:$0xff]  ;;  %v5205_v37 = vld [vmem:[%s6676_s4 + $0x8] sm:$0xff] }
  0xd6   :  { %1176 = vmatmul.f32.vlgmr.msra.gmra.mxu2 %v3471_v57  ;;  %1135 = vmatpush.msrb.mxu1 %v385_v4  ;;  %v1332_v4 = vunpack.c.l.bf16 %v5163_v18  ;;  %v1330_v3 = vunpack.c.l.bf16 %v5176_v35  ;;  %v1328_v57 = vunpack.c.l.bf16 %v5188_v47 }
  0xd7   :  { %1192 = vmatpush.msrb.mxu0 %v589_v7  ;;  %1393 = vmatpush.msra.mxu3 %v1308_v23  ;;  %v778_v7 = vadd.f32 %v777_v1, %v758_v56  ;;  %v5193_v23 = vld [vmem:[%s6676_s4 + $0x10] sm:$0xff]  ;;  %v1341_v1 = vunpack.c.h.bf16 %v5110_v41 }
  0xd8   :  { %1136 = vmatmul.f32.vlgmr.msrb.gmra.mxu1 %v6863_v5 }
  0xd9   :  { %1193 = vmatpush.msrb.mxu0 %v585_v15  ;;  %1214 = vmatpush.msra.mxu1 %v645_v19  ;;  %v1288_v15 = vunpack.c.l.bf16 %v5181_v14  ;;  %v5200_v19 = vld [vmem:[%s6676_s4 + $0xb0] sm:$0xff] }
  0xda   :  { %1394 = vmatpush.msra.mxu3 %v1306_v44  ;;  %v798_v44 = vadd.f32 %v797_v39, %v778_v7 }
  0xdb   :  { %1194 = vmatpush.msrb.mxu0 %v581_v60  ;;  %1215 = vmatpush.msra.mxu1 %v641_v51  ;;  %v1286_v60 = vunpack.c.l.bf16 %v5193_v23  ;;  %v5212_v51 = vld [vmem:[%s6676_s4 + $0xa8] sm:$0xff] }
  0xdc   :  { %1395 = vmatpush.msra.mxu3 %v1304_v31  ;;  %v1326_v31 = vunpack.c.l.bf16 %v5200_v19  ;;  %vm1220_vm1 = vcmp.gt.f32.partialorder %v798_v44, 0.0 }
  0xdd   :  { %1411 = vmatpush.msrb.mxu1 %v1344_v46  ;;  %1195 = vmatpush.msrb.mxu0 %v577_v16  ;;  %v1284_v46 = vunpack.c.l.bf16 %v5205_v37  ;;  %v1324_v16 = vunpack.c.l.bf16 %v5212_v51 }
  0xde   :  { %1396 = vmatpush.msra.mxu3 %v1302_v42  ;;  %1196 = vmatmul.f32.vlgmr.msrb.gmra.mxu0 %v3472_v43  ;;  %v1224_v42 = vmul.f32 0.2, %v798_v44  ;;  %v1345_v43 = vunpack.c.h.bf16 %v5076_v62  ;;  %v5247_v62 = vld [vmem:[%s6676_s4 + $0x88] sm:$0xff] }
  0xdf   :  { %1412 = vmatpush.msrb.mxu1 %v1342_v34  ;;  %v1282_v34 = vunpack.c.l.bf16 %v5217_v8 }
  0xe0   :  { %1397 = vmatpush.msra.mxu3 %v1300_v63  ;;  %3348 = vmatmul.msk.f32.vlgmr.msra.gmra.mxu1 %vm656_vm0, %v4985_v54  ;;  %v1294_v54 = vunpack.c.l.bf16 %v5142_v26  ;;  %v5231_v63 = vld [vmem:[%s6676_s4 + $0x98] sm:$0xff] }
  0xe1   :  { %1413 = vmatpush.msrb.mxu1 %v1340_v29  ;;  %v1322_v29 = vunpack.c.l.bf16 %v5224_v53  ;;  %v1320_v48 = vunpack.c.l.bf16 %v5231_v63 }
  0xe2   :  { %1398 = vmatpush.msra.mxu3 %v1298_v58 }
  0xe3   :  { %1414 = vmatpush.msrb.mxu1 %v1338_v21 }
  0xe4   :  { %1399 = vmatpush.msra.mxu3 %v1296_v40  ;;  %v5241_v40 = vsel %vm1220_vm1, %v798_v44, %v1224_v42  ;;  %v1331_v44 = vunpack.c.h.bf16 %v5176_v35  ;;  %v1275_v35 = vld [vmem:[%s6676_s4 + $0x158] sm:$0xff] }
  0xe5   :  { %1415 = vmatpush.msrb.mxu1 %v1336_v0  ;;  %v1343_v0 = vunpack.c.h.bf16 %v5098_v22  ;;  %v5255_v22 = vld [vmem:[%s6676_s4 + $0x80] sm:$0xff] }
  0xe6   :  { %1400 = vmatpush.msra.mxu3 %v1294_v54  ;;  %v1318_v54 = vunpack.c.l.bf16 %v5238_v33  ;;  %v1314_v7 = vunpack.c.l.bf16 %v5255_v22 }
  0xe7   :  { %1416 = vmatpush.msrb.mxu1 %v1334_v24  ;;  %v817_v9 = vpop.f32.mrf.mxu3 }
  0xe8   :  { %1401 = vmatpush.msra.mxu3 %v1292_v17  ;;  %v818_v59 = vadd.f32 %v817_v9, %v649_v38  ;;  %v1316_v38 = vunpack.c.l.bf16 %v5247_v62 }
  0xe9   :  { %1417 = vmatpush.msrb.mxu1 %v1332_v4  ;;  %v1339_v4 = vunpack.c.h.bf16 %v5122_v49  ;;  %v1279_v49 = vld [vmem:[%s6676_s4 + $0x178] sm:$0xff] }
  0xea   :  { %1402 = vmatpush.msra.mxu3 %v1290_v50  ;;  %v837_v6 = vpop.f32.mrf.mxu2  ;;  %v1337_v50 = vunpack.c.h.bf16 %v5137_v52  ;;  %v1278_v52 = vld [vmem:[%s6676_s4 + $0x170] sm:$0xff] }
  0xeb   :  { %1418 = vmatpush.msrb.mxu1 %v1330_v3  ;;  %v838_v5 = vadd.f32 %v837_v6, %v818_v59  ;;  %v1335_v3 = vunpack.c.h.bf16 %v5151_v20  ;;  %v1333_v59 = vunpack.c.h.bf16 %v5163_v18  ;;  %v1277_v20 = vld [vmem:[%s6676_s4 + $0x168] sm:$0xff]  ;;  %v1376_v18 = vunpack.c.l.bf16 %v1279_v49 }
  0xec   :  { %1403 = vmatpush.msra.mxu3 %v1288_v15  ;;  %v1374_v6 = vunpack.c.l.bf16 %v1278_v52  ;;  %v1373_v42 = vunpack.c.h.bf16 %v1277_v20 }
  0xed   :  { %1419 = vmatpush.msrb.mxu1 %v1328_v57  ;;  %v857_v61 = vpop.f32.mrf.mxu0  ;;  %1431 = vmatpush.msrb.mxu2 %v1376_v18 }
  0xee   :  { %1404 = vmatpush.msra.mxu3 %v1286_v60  ;;  %v858_v12 = vadd.f32 %v857_v61, %v838_v5  ;;  %v1377_v60 = vunpack.c.h.bf16 %v1279_v49  ;;  %v1375_v5 = vunpack.c.h.bf16 %v1278_v52  ;;  %v1267_v49 = vld [vmem:[%s6676_s4 + $0x118] sm:$0xff] }
  0xef   :  { %1420 = vmatpush.msrb.mxu1 %v1326_v31  ;;  %v1276_v31 = vld [vmem:[%s6676_s4 + $0x160] sm:$0xff]  ;;  %1432 = vmatpush.msrb.mxu2 %v1374_v6  ;;  %v1352_v52 = vunpack.c.l.bf16 %v1267_v49 }
  0xf0   :  { %1405 = vmatpush.msra.mxu3 %v1284_v46  ;;  %v877_v58 = vpop.f32.mrf.mxu1  ;;  %v1329_v46 = vunpack.c.h.bf16 %v5188_v47  ;;  %v1370_v61 = vunpack.c.l.bf16 %v1276_v31  ;;  %v1325_v47 = vunpack.c.h.bf16 %v5212_v51  ;;  %v1321_v51 = vunpack.c.h.bf16 %v5231_v63  ;;  %v1264_v6 = vld [vmem:[%s6676_s4 + $0x100] sm:$0xff] }
  0xf1   :  { %v878_v21 = vadd.f32 %v877_v58, %v858_v12  ;;  %1421 = vmatpush.msrb.mxu1 %v1324_v16  ;;  %v897_v56 = vpop.f32.mrf.mxu3  ;;  %v1372_v16 = vunpack.c.l.bf16 %v1277_v20  ;;  %v1371_v12 = vunpack.c.h.bf16 %v1276_v31  ;;  %v1369_v58 = vunpack.c.h.bf16 %v1275_v35 }
  0xf2   :  { %1406 = vmatpush.msra.mxu3 %v1282_v34  ;;  %v1327_v34 = vunpack.c.h.bf16 %v5200_v19  ;;  %v1323_v19 = vunpack.c.h.bf16 %v5224_v53  ;;  %v1319_v53 = vunpack.c.h.bf16 %v5238_v33  ;;  %v1270_v33 = vld [vmem:[%s6676_s4 + $0x130] sm:$0xff]  ;;  %v1353_v20 = vunpack.c.h.bf16 %v1267_v49 }
  0xf3   :  { %1407 = vmatmul.f32.vlgmr.msra.gmra.mxu3 %v5241_v40  ;;  %v898_v39 = vadd.f32 %v897_v56, %v878_v21  ;;  %1422 = vmatpush.msrb.mxu1 %v1322_v29  ;;  %v1274_v29 = vld [vmem:[%s6676_s4 + $0x150] sm:$0xff]  ;;  %v1273_v21 = vld [vmem:[%s6676_s4 + $0x148] sm:$0xff]  ;;  %v1272_v56 = vld [vmem:[%s6676_s4 + $0x140] sm:$0xff] }
  0xf4   :  { %1491 = vmatpush.msrb.mxu3 %v1345_v43  ;;  %v917_v24 = vpop.f32.mrf.mxu2  ;;  %1433 = vmatpush.msrb.mxu2 %v1372_v16  ;;  %v1368_v43 = vunpack.c.l.bf16 %v1275_v35  ;;  %v1347_v16 = vunpack.c.h.bf16 %v1264_v6  ;;  %v1280_v35 = vld [vmem:[%s6676_s4 + $0x180] sm:$0xff] }
  0xf5   :  { %v918_v17 = vadd.f32 %v917_v24, %v898_v39  ;;  %1423 = vmatpush.msrb.mxu1 %v1320_v48  ;;  %v1366_v48 = vunpack.c.l.bf16 %v1274_v29  ;;  %v1364_v39 = vunpack.c.l.bf16 %v1273_v21  ;;  %v1362_v24 = vunpack.c.l.bf16 %v1272_v56 }
  0xf6   :  { %1492 = vmatpush.msrb.mxu3 %v1343_v0  ;;  %1434 = vmatpush.msrb.mxu2 %v1370_v61  ;;  %v1367_v0 = vunpack.c.h.bf16 %v1274_v29  ;;  %v1378_v61 = vunpack.c.l.bf16 %v1280_v35  ;;  %v650_v29 = vperm.slane %v5035_v27, 2 }
  0xf7   :  { %1424 = vmatpush.msrb.mxu1 %v1318_v54  ;;  %v937_v41 = vpop.f32.mrf.mxu0  ;;  %v1365_v54 = vunpack.c.h.bf16 %v1273_v21 }
  0xf8   :  { %1493 = vmatpush.msrb.mxu3 %v1341_v1  ;;  %v938_v9 = vadd.f32 %v937_v41, %v918_v17  ;;  %1435 = vmatpush.msrb.mxu2 %v1368_v43  ;;  %v1271_v1 = vld [vmem:[%s6676_s4 + $0x138] sm:$0xff]  ;;  %v1363_v17 = vunpack.c.h.bf16 %v1272_v56  ;;  %v1358_v41 = vunpack.c.l.bf16 %v1270_v33  ;;  %v1311_v43 = vunpack.c.h.bf16 %v5044_v32 }
  0xf9   :  { %1425 = vmatpush.msrb.mxu1 %v1316_v38  ;;  %v1317_v38 = vunpack.c.h.bf16 %v5247_v62  ;;  %v1360_v63 = vunpack.c.l.bf16 %v1271_v1  ;;  %v1268_v62 = vld [vmem:[%s6676_s4 + $0x120] sm:$0xff]  ;;  %v1305_v32 = vunpack.c.h.bf16 %v5070_v11  ;;  %v1295_v11 = vunpack.c.h.bf16 %v5142_v26 }
  0xfa   :  { %1494 = vmatpush.msrb.mxu3 %v1339_v4  ;;  %vm1221_vm2 = vcmp.gt.f32.partialorder %v938_v9, 0.0  ;;  %v1225_v15 = vmul.f32 0.2, %v938_v9  ;;  %1436 = vmatpush.msrb.mxu2 %v1366_v48  ;;  %v1361_v4 = vunpack.c.h.bf16 %v1271_v1  ;;  %v1283_v26 = vunpack.c.h.bf16 %v5217_v8 }
  0xfb   :  { %1426 = vmatpush.msrb.mxu1 %v1314_v7  ;;  %v1315_v7 = vunpack.c.h.bf16 %v5255_v22 }
  0xfc   :  { %1495 = vmatpush.msrb.mxu3 %v1337_v50  ;;  %v5263_v57 = vsel %vm1221_vm2, %v938_v9, %v1225_v15  ;;  %1437 = vmatpush.msrb.mxu2 %v1364_v39  ;;  %v1269_v50 = vld [vmem:[%s6676_s4 + $0x128] sm:$0xff]  ;;  %v1359_v9 = vunpack.c.h.bf16 %v1270_v33  ;;  %v1354_v15 = vunpack.c.l.bf16 %v1268_v62  ;;  %v1297_v33 = vunpack.c.h.bf16 %v5127_v55 }
  0xfd   :  { %1427 = vmatmul.f32.vlgmr.msrb.gmra.mxu1 %v5263_v57  ;;  %v1357_v22 = vunpack.c.h.bf16 %v1269_v50  ;;  %v1287_v55 = vunpack.c.h.bf16 %v5193_v23 }
  0xfe   :  { %1496 = vmatpush.msrb.mxu3 %v1335_v3  ;;  %1511 = vmatpush.msra.mxu1 %v1377_v60  ;;  %v1356_v3 = vunpack.c.l.bf16 %v1269_v50  ;;  %v1265_v60 = vld [vmem:[%s6676_s4 + $0x108] sm:$0xff] }
  0xff   :  { %1438 = vmatpush.msrb.mxu2 %v1362_v24  ;;  %v1349_v31 = vunpack.c.h.bf16 %v1265_v60 }
 0x100   :  { %1497 = vmatpush.msrb.mxu3 %v1333_v59  ;;  %1512 = vmatpush.msra.mxu1 %v1375_v5  ;;  %v1355_v59 = vunpack.c.h.bf16 %v1268_v62  ;;  %v1348_v5 = vunpack.c.l.bf16 %v1265_v60  ;;  %v1379_v62 = vunpack.c.h.bf16 %v1280_v35  ;;  %v3423_v60 = vld [vmem:[%s6678_s6 + $0x30] sm:$0xff]  }
 0x101   :  { %1439 = vmatpush.msrb.mxu2 %v1360_v63  ;;  %v1301_v63 = vunpack.c.h.bf16 %v5104_v25  ;;  %v1291_v25 = vunpack.c.h.bf16 %v5168_v30 }
 0x102   :  { %1498 = vmatpush.msrb.mxu3 %v1331_v44  ;;  %1513 = vmatpush.msra.mxu1 %v1373_v42  ;;  %v1266_v44 = vld [vmem:[%s6676_s4 + $0x110] sm:$0xff]  ;;  %v1281_v42 = vld [vmem:[%s6676_s4 + $0x188] sm:$0xff] }
 0x103   :  { %1440 = vmatpush.msrb.mxu2 %v1358_v41  ;;  %v1350_v18 = vunpack.c.l.bf16 %v1266_v44  ;;  %v1381_v50 = vunpack.c.h.bf16 %v1281_v42  ;;  %v1285_v41 = vunpack.c.h.bf16 %v5205_v37 }
 0x104   :  { %1499 = vmatpush.msrb.mxu3 %v1329_v46  ;;  %1514 = vmatpush.msra.mxu1 %v1371_v12  ;;  %v1346_v46 = vunpack.c.l.bf16 %v1264_v6  ;;  %v1313_v12 = vunpack.c.h.bf16 %v5030_v2  ;;  %v1307_v2 = vunpack.c.h.bf16 %v5062_v13  ;;  %v1299_v13 = vunpack.c.h.bf16 %v5115_v45 }
 0x105   :  { %1441 = vmatpush.msrb.mxu2 %v1356_v3  ;;  %v1289_v45 = vunpack.c.h.bf16 %v5181_v14 }
 0x106   :  { %1500 = vmatpush.msrb.mxu3 %v1327_v34  ;;  %1515 = vmatpush.msra.mxu1 %v1369_v58  ;;  %v1380_v34 = vunpack.c.l.bf16 %v1281_v42  ;;  %v1309_v58 = vunpack.c.h.bf16 %v5055_v10  ;;  %v1303_v10 = vunpack.c.h.bf16 %v5089_v36  ;;  %v1293_v36 = vunpack.c.h.bf16 %v5156_v28  ;;  %v3421_v42 = vld [vmem:[%s6678_s6 + $0x20] sm:$0xff]  }
 0x107   :  { %1442 = vmatpush.msrb.mxu2 %v1354_v15  ;;  %v651_v28 = vperm.slane %v5035_v27, 3  ;;  %v3424_v27 = vld [vmem:[%s6678_s6 + $0x38] sm:$0xff]  }
 0x108   :  { %1501 = vmatpush.msrb.mxu3 %v1325_v47  ;;  %1516 = vmatpush.msra.mxu1 %v1367_v0  ;;  %v3401_v6 = vunpack.c.h.bf16 %v3424_v27 }
 0x109   :  { %1443 = vmatpush.msrb.mxu2 %v1352_v52  ;;  %1465 = vmatpush.msra.mxu0 %v1380_v34  ;;  %v3389_v34 = vunpack.c.h.bf16 %v3421_v42 }
 0x10a   :  { %1502 = vmatpush.msrb.mxu3 %v1323_v19  ;;  %1517 = vmatpush.msra.mxu1 %v1365_v54 }
 0x10b   :  { %1444 = vmatpush.msrb.mxu2 %v1350_v18  ;;  %1466 = vmatpush.msra.mxu0 %v1378_v61  ;;  %v3420_v61 = vld [vmem:[%s6678_s6 + $0x18] sm:$0xff]  }
 0x10c   :  { %1503 = vmatpush.msrb.mxu3 %v1321_v51  ;;  %1518 = vmatpush.msra.mxu1 %v1363_v17 }
 0x10d   :  { %1445 = vmatpush.msrb.mxu2 %v1348_v5  ;;  %1471 = vmatpush.msrb.mxu0 %v1313_v12  ;;  %v3400_v5 = vunpack.c.l.bf16 %v3424_v27  ;;  %v3388_v12 = vunpack.c.l.bf16 %v3421_v42  ;;  %v1740_v42 = vld [vmem:[%s6682_s10 + $0xf0] sm:$0xff] }
 0x10e   :  { %1504 = vmatpush.msrb.mxu3 %v1319_v53  ;;  %1519 = vmatpush.msra.mxu1 %v1361_v4 }
 0x10f   :  { %1446 = vmatpush.msrb.mxu2 %v1346_v46  ;;  %1472 = vmatpush.msrb.mxu0 %v1311_v43  ;;  %v3422_v46 = vld [vmem:[%s6678_s6 + $0x28] sm:$0xff]   ;;  %v3384_v43 = vunpack.c.l.bf16 %v3420_v61 }
 0x110   :  { %1505 = vmatpush.msrb.mxu3 %v1317_v38  ;;  %1520 = vmatpush.msra.mxu1 %v1359_v9  ;;  %v3392_v35 = vunpack.c.l.bf16 %v3422_v46 }
 0x111   :  { %1473 = vmatpush.msrb.mxu0 %v1309_v58  ;;  %1545 = vmatpush.msra.mxu2 %v1381_v50 }
 0x112   :  { %1506 = vmatpush.msrb.mxu3 %v1315_v7  ;;  %1521 = vmatpush.msra.mxu1 %v1357_v22 }
 0x113   :  { %1507 = vmatmul.f32.vlgmr.msrb.gmra.mxu3 %v5263_v57  ;;  %v1351_v57 = vunpack.c.h.bf16 %v1266_v44  ;;  %v957_v47 = vpop.f32.mrf.mxu1  ;;  %1474 = vmatpush.msrb.mxu0 %v1307_v2 }
 0x114   :  { %1522 = vmatpush.msra.mxu1 %v1355_v59  ;;  %v958_v21 = vadd.f32 %v957_v47, %v650_v29  ;;  %1546 = vmatpush.msra.mxu2 %v1379_v62  ;;  %v3385_v29 = vunpack.c.h.bf16 %v3420_v61  ;;  %v3419_v47 = vld [vmem:[%s6678_s6 + $0x10] sm:$0xff]   ;;  %v1820_v61 = vunpack.c.l.bf16 %v1740_v42 }
 0x115   :  { %v977_v19 = vpop.f32.mrf.mxu3  ;;  %1475 = vmatpush.msrb.mxu0 %v1305_v32  ;;  %v3381_v58 = vunpack.c.h.bf16 %v3419_v47 }
 0x116   :  { %1523 = vmatpush.msra.mxu1 %v1353_v20  ;;  %v978_v48 = vadd.f32 %v977_v19, %v958_v21  ;;  %v3418_v21 = vld [vmem:[%s6678_s6 + $0x8] sm:$0xff]   ;;  %v3380_v19 = vunpack.c.l.bf16 %v3419_v47  ;;  %1873 = vmatpush.msra.mxu3 %v1820_v61 }
 0x117   :  { %1476 = vmatpush.msrb.mxu0 %v1303_v10 }
 0x118   :  { %1524 = vmatpush.msra.mxu1 %v1351_v57 }
 0x119   :  { %v997_v0 = vpop.f32.mrf.mxu0  ;;  %1477 = vmatpush.msrb.mxu0 %v1301_v63 }
 0x11a   :  { %1525 = vmatpush.msra.mxu1 %v1349_v31  ;;  %v998_v56 = vadd.f32 %v997_v0, %v978_v48  ;;  %v1017_v51 = vpop.f32.mrf.mxu2  ;;  %v3397_v31 = vunpack.c.h.bf16 %v3423_v60  ;;  %v3377_v48 = vunpack.c.h.bf16 %v3418_v21  ;;  %v3376_v0 = vunpack.c.l.bf16 %v3418_v21  ;;  %v1754_v21 = vld [vmem:[%s6682_s10 + $0x160] sm:$0xff] }
 0x11b   :  { %1478 = vmatpush.msrb.mxu0 %v1299_v13  ;;  %v3425_v13 = vld [vmem:[%s6678_s6 + $0x40] sm:$0xff]  }
 0x11c   :  { %1526 = vmatpush.msra.mxu1 %v1347_v16  ;;  %v1018_v54 = vadd.f32 %v1017_v51, %v998_v56  ;;  %v3396_v16 = vunpack.c.l.bf16 %v3423_v60  ;;  %v3371_v56 = vld [vmem:[%s6678_s6] sm:$0xff]  }
 0x11d   :  { %1479 = vmatpush.msrb.mxu0 %v1297_v33  ;;  %v1581_v51 = vld [vmem:[%s6678_s6 + $0x60] sm:$0xf]  ;;  %v3373_v2 = vunpack.c.h.bf16 %v3371_v56  ;;  %v3404_v33 = vunpack.c.l.bf16 %v3425_v13 }
 0x11f   :  { %1480 = vmatpush.msrb.mxu0 %v1295_v11  ;;  %v1382_v11 = vld [vmem:[%s6677_s5] sm:$0x3] }
 0x120   :  { %v1384_v50 = vperm.slane %v1382_v11, 0 }
 0x121   :  { %1481 = vmatpush.msrb.mxu0 %v1293_v36  ;;  %v1655_v36 = vld [vmem:[%s6673_s1] sm:$0xff] }
 0x122   :  { %1657 = vrot.lane.b32.xlu0 %v1655_v36, %s3499_s21 }
 0x123   :  { %1482 = vmatpush.msrb.mxu0 %v1291_v25 }
 0x125   :  { %1483 = vmatpush.msrb.mxu0 %v1289_v45 }
 0x127   :  { %1484 = vmatpush.msrb.mxu0 %v1287_v55 }
 0x129   :  { %1485 = vmatpush.msrb.mxu0 %v1285_v41 }
 0x12b   :  { %1486 = vmatpush.msrb.mxu0 %v1283_v26 }
 0x12d   :  { %v1037_v39 = vpop.f32.mrf.mxu1 }
 0x12e   :  { %v1038_v1 = vadd.f32 %v1037_v39, %v1018_v54  ;;  %v1606_v39 = vunpack.c.l.bf16 %v1581_v51  ;;  %v3372_v54 = vunpack.c.l.bf16 %v3371_v56  ;;  %v1734_v51 = vld [vmem:[%s6682_s10 + $0xc0] sm:$0xff] }
 0x134   :  { %v1057_v53 = vpop.f32.mrf.mxu3 }
 0x135   :  { %v1058_v24 = vadd.f32 %v1057_v53, %v1038_v1  ;;  %v3428_v1 = vld [vmem:[%s6678_s6 + $0x58] sm:$0xff]  }
 0x136   :  { %v1077_v17 = vpop.f32.mrf.mxu0  ;;  %v3417_v53 = vunpack.c.h.bf16 %v3428_v1  ;;  %v3416_v32 = vunpack.c.l.bf16 %v3428_v1 }
 0x137   :  { %v1078_v38 = vadd.f32 %v1077_v17, %v1058_v24  ;;  %v3427_v24 = vld [vmem:[%s6678_s6 + $0x50] sm:$0xff]  }
 0x138   :  { %v3413_v10 = vunpack.c.h.bf16 %v3427_v24  ;;  %v3412_v17 = vunpack.c.l.bf16 %v3427_v24  ;;  %v1750_v24 = vld [vmem:[%s6682_s10 + $0x140] sm:$0xff] }
 0x139   :  { %vm1222_vm3 = vcmp.gt.f32.partialorder %v1078_v38, 0.0  ;;  %v1226_v4 = vmul.f32 0.2, %v1078_v38  ;;  %v1841_v36 = vunpack.c.h.bf16 %v1750_v24 }
 0x13b   :  { %v1230_v7 = vsel %vm1222_vm3, %v1078_v38, %v1226_v4  ;;  %v3426_v38 = vld [vmem:[%s6678_s6 + $0x48] sm:$0xff]   ;;  %s3500_s6 = smov 126  }
 0x13c   :  { %1447 = vmatmul.f32.vlgmr.msrb.gmra.mxu2 %v1230_v7  ;;  %1527 = vmatmul.f32.vlgmr.msra.gmra.mxu1 %v1230_v7  ;;  %v3409_v63 = vunpack.c.h.bf16 %v3426_v38  ;;  %v3408_v4 = vunpack.c.l.bf16 %v3426_v38  ;;  %v3405_v7 = vunpack.c.h.bf16 %v3425_v13  ;;  %v1809_v38 = vunpack.c.h.bf16 %v1734_v51  ;;  %v1748_v13 = vld [vmem:[%s6682_s10 + $0x130] sm:$0xff] }
 0x13d   :  { %1615 = vmatpush.msrb.mxu2 %v3401_v6 }
 0x13f   :  { %1616 = vmatpush.msrb.mxu2 %v3400_v5 }
 0x141   :  { %1617 = vmatpush.msrb.mxu2 %v3397_v31 }
 0x143   :  { %1618 = vmatpush.msrb.mxu2 %v3396_v16  ;;  %v3502_v16 = vmov 1  }
 0x144   :  { %3436 = vset.pattern.permute.xlu0 %v3502_v16 }
 0x14d   :  { %v1097_v9 = vpop.f32.mrf.mxu2 }
 0x14e   :  { %v1098_v3 = vadd.f32 %v1097_v9, %v651_v28 }
 0x152   :  { %v1117_v30 = vpop.f32.mrf.mxu0 }
 0x153   :  { %v1118_v22 = vadd.f32 %v1117_v30, %v1098_v3 }
 0x155   :  { %v1137_v15 = vpop.f32.mrf.mxu1 }
 0x156   :  { %v1138_v14 = vadd.f32 %v1137_v15, %v1118_v22  ;;  %v1385_v22 = vperm.slane %v1382_v11, 1 }
 0x157   :  { %v1157_v59 = vpop.f32.mrf.mxu3 }
 0x158   :  { %v1158_v49 = vadd.f32 %v1157_v59, %v1138_v14 }
 0x159   :  { %v1177_v52 = vpop.f32.mrf.mxu2 }
 0x15a   :  { %v1178_v23 = vadd.f32 %v1177_v52, %v1158_v49 }
 0x15b   :  { %v1197_v20 = vpop.f32.mrf.mxu0 }
 0x15c   :  { %v1198_v44 = vadd.f32 %v1197_v20, %v1178_v23 }
 0x15d   :  { %v1217_v37 = vpop.f32.mrf.mxu1 }
 0x15e   :  { %v1218_v18 = vadd.f32 %v1217_v37, %v1198_v44 }
 0x160   :  { %vm1223_vm4 = vcmp.gt.f32.partialorder %v1218_v18, 0.0  ;;  %v1227_v8 = vmul.f32 0.2, %v1218_v18 }
 0x162   :  { %v1231_v57 = vsel %vm1223_vm4, %v1218_v18, %v1227_v8  ;;  %v3437_v8 = vld [vmem:[%s6679_s7] ss:$0 sm:$0xff] }
 0x163   :  { %3349 = vmatmul.msk.f32.vlgmr.msra.gmra.mxu0 %vm656_vm0, %v1231_v57  ;;  %3350 = vmatmul.msk.f32.vlgmr.msra.gmra.mxu2 %vm656_vm0, %v1231_v57 }
 0x164   :  { %1642 = vmatpush.msra.mxu0 %v1606_v39 }
 0x166   :  { %1643 = vmatpush.msra.mxu0 %v3417_v53  ;;  %v1849_v53 = vunpack.c.h.bf16 %v1754_v21 }
 0x168   :  { %1644 = vmatpush.msra.mxu0 %v3416_v32  ;;  %v1732_v32 = vld [vmem:[%s6682_s10 + $0xb0] sm:$0xff] }
 0x169   :  { %v1805_v11 = vunpack.c.h.bf16 %v1732_v32 }
 0x16a   :  { %1645 = vmatpush.msra.mxu0 %v3413_v10  ;;  %v1808_v10 = vunpack.c.l.bf16 %v1734_v51 }
 0x16b   :  { %1487 = vmatmul.f32.vlgmr.msrb.gmra.mxu0 %v5241_v40  ;;  %v3393_v40 = vunpack.c.h.bf16 %v3422_v46  ;;  %v3501_v46 = vmov 0  }
 0x16c   :  { %1646 = vmatpush.msra.mxu0 %v3412_v17  ;;  %3434 = vset.pattern.permute.xlu1 %v3501_v46 }
 0x16d   :  { %1619 = vmatpush.msrb.mxu2 %v3393_v40 }
 0x16e   :  { %1647 = vmatpush.msra.mxu0 %v3409_v63 }
 0x16f   :  { %1620 = vmatpush.msrb.mxu2 %v3392_v35  ;;  %v1758_v35 = vld [vmem:[%s6682_s10 + $0x180] sm:$0xff] }
 0x170   :  { %1648 = vmatpush.msra.mxu0 %v3408_v4  ;;  %v1857_v47 = vunpack.c.h.bf16 %v1758_v35  ;;  %v1730_v4 = vld [vmem:[%s6682_s10 + $0xa0] sm:$0xff] }
 0x171   :  { %1621 = vmatpush.msrb.mxu2 %v3389_v34  ;;  %v1738_v34 = vld [vmem:[%s6682_s10 + $0xe0] sm:$0xff] }
 0x172   :  { %1649 = vmatpush.msra.mxu0 %v3405_v7  ;;  %v1804_v7 = vunpack.c.l.bf16 %v1732_v32 }
 0x173   :  { %1622 = vmatpush.msrb.mxu2 %v3388_v12  ;;  %v1856_v12 = vunpack.c.l.bf16 %v1758_v35 }
 0x174   :  { %1650 = vmatpush.msra.mxu0 %v3404_v33  ;;  %v1840_v33 = vunpack.c.l.bf16 %v1750_v24 }
 0x175   :  { %1623 = vmatpush.msrb.mxu2 %v3385_v29  ;;  %v1821_v29 = vunpack.c.h.bf16 %v1740_v42  ;;  %1900 = vmatpush.msrb.mxu1 %v1856_v12  ;;  %v1737_v42 = vld [vmem:[%s6682_s10 + $0xd8] sm:$0xff] }
 0x176   :  { %v1408_v25 = vpop.f32.mrf.mxu3 }
 0x177   :  { %1624 = vmatpush.msrb.mxu2 %v3384_v43  ;;  %v1409_v45 = vadd.f32 %v1408_v25, %v1384_v50  ;;  %v1756_v43 = vld [vmem:[%s6682_s10 + $0x170] sm:$0xff]  ;;  %1913 = vmatpush.msrb.mxu0 %v1821_v29  ;;  %v1746_v25 = vld [vmem:[%s6682_s10 + $0x120] sm:$0xff] }
 0x178   :  { %v1853_v56 = vunpack.c.h.bf16 %v1756_v43  ;;  %v1728_v50 = vld [vmem:[%s6682_s10 + $0x90] sm:$0xff] }
 0x179   :  { %1625 = vmatpush.msrb.mxu2 %v3381_v58  ;;  %v1736_v58 = vld [vmem:[%s6682_s10 + $0xd0] sm:$0xff] }
 0x17a   :  { %v1428_v62 = vpop.f32.mrf.mxu1  ;;  %v1812_v39 = vunpack.c.l.bf16 %v1736_v58  ;;  %v1813_v1 = vunpack.c.h.bf16 %v1736_v58  ;;  %v1815_v58 = vunpack.c.h.bf16 %v1737_v42 }
 0x17b   :  { %1626 = vmatpush.msrb.mxu2 %v3380_v19  ;;  %v1429_v41 = vadd.f32 %v1428_v62, %v1409_v45  ;;  %v1816_v19 = vunpack.c.l.bf16 %v1738_v34  ;;  %v1800_v62 = vunpack.c.l.bf16 %v1730_v4  ;;  %v1836_v45 = vunpack.c.l.bf16 %v1748_v13 }
 0x17d   :  { %1627 = vmatpush.msrb.mxu2 %v3377_v48  ;;  %v1852_v48 = vunpack.c.l.bf16 %v1756_v43  ;;  %1874 = vmatpush.msra.mxu3 %v1816_v19  ;;  %v1814_v43 = vunpack.c.l.bf16 %v1737_v42 }
 0x17f   :  { %1628 = vmatpush.msrb.mxu2 %v3376_v0  ;;  %v1817_v0 = vunpack.c.h.bf16 %v1738_v34  ;;  %1901 = vmatpush.msrb.mxu1 %v1852_v48  ;;  %v1735_v48 = vld [vmem:[%s6682_s10 + $0xc8] sm:$0xff] }
 0x180   :  { %1875 = vmatpush.msra.mxu3 %v1812_v39  ;;  %v1811_v51 = vunpack.c.h.bf16 %v1735_v48 }
 0x181   :  { %1629 = vmatpush.msrb.mxu2 %v3373_v2  ;;  %v1752_v2 = vld [vmem:[%s6682_s10 + $0x150] sm:$0xff]  ;;  %1914 = vmatpush.msrb.mxu0 %v1817_v0 }
 0x182   :  { %v1844_v17 = vunpack.c.l.bf16 %v1752_v2  ;;  %v1845_v63 = vunpack.c.h.bf16 %v1752_v2  ;;  %1876 = vmatpush.msra.mxu3 %v1808_v10  ;;  %v1716_v0 = vld [vmem:[%s6682_s10 + $0x30] sm:$0xff] }
 0x183   :  { %1630 = vmatpush.msrb.mxu2 %v3372_v54  ;;  %v1848_v54 = vunpack.c.l.bf16 %v1754_v21  ;;  %1915 = vmatpush.msrb.mxu0 %v1813_v1  ;;  %v1772_v2 = vunpack.c.l.bf16 %v1716_v0  ;;  %v1773_v39 = vunpack.c.h.bf16 %v1716_v0  ;;  %v1731_v1 = vld [vmem:[%s6682_s10 + $0xa8] sm:$0xff] }
 0x184   :  { %1877 = vmatpush.msra.mxu3 %v1804_v7 }
 0x185   :  { %1940 = vmatpush.msra.mxu2 %v1857_v47  ;;  %1902 = vmatpush.msrb.mxu1 %v1848_v54  ;;  %v1714_v54 = vld [vmem:[%s6682_s10 + $0x20] sm:$0xff] }
 0x186   :  { %1916 = vmatpush.msrb.mxu0 %v1809_v38  ;;  %1878 = vmatpush.msra.mxu3 %v1800_v62  ;;  %v1768_v10 = vunpack.c.l.bf16 %v1714_v54  ;;  %v1729_v38 = vld [vmem:[%s6682_s10 + $0x98] sm:$0xff]  ;;  %v1727_v62 = vld [vmem:[%s6682_s10 + $0x88] sm:$0xff] }
 0x187   :  { %1941 = vmatpush.msra.mxu2 %v1853_v56  ;;  %1903 = vmatpush.msrb.mxu1 %v1844_v17  ;;  %v1733_v56 = vld [vmem:[%s6682_s10 + $0xb8] sm:$0xff]  ;;  %v1769_v17 = vunpack.c.h.bf16 %v1714_v54 }
 0x188   :  { %1917 = vmatpush.msrb.mxu0 %v1805_v11  ;;  %v1806_v32 = vunpack.c.l.bf16 %v1733_v56  ;;  %v1807_v24 = vunpack.c.h.bf16 %v1733_v56  ;;  %v1798_v11 = vunpack.c.l.bf16 %v1729_v38 }
 0x189   :  { %1942 = vmatpush.msra.mxu2 %v1849_v53  ;;  %1904 = vmatpush.msrb.mxu1 %v1840_v33  ;;  %v1712_v53 = vld [vmem:[%s6682_s10 + $0x10] sm:$0xff] }
 0x18a   :  { %v1764_v7 = vunpack.c.l.bf16 %v1712_v53  ;;  %v1765_v33 = vunpack.c.h.bf16 %v1712_v53 }
 0x18b   :  { %1943 = vmatpush.msra.mxu2 %v1845_v63  ;;  %1905 = vmatpush.msrb.mxu1 %v1836_v45  ;;  %v1802_v63 = vunpack.c.l.bf16 %v1731_v1  ;;  %v1759_v45 = vld [vmem:[%s6682_s10 + $0x188] sm:$0xff] }
 0x18d   :  { %1944 = vmatpush.msra.mxu2 %v1841_v36  ;;  %v1799_v36 = vunpack.c.h.bf16 %v1729_v38  ;;  %v1666_v38 = vld [vmem:[%s6680_s8] sm:$0x3] }
 0x194   :  { %v1658_v6 = vpop.permute.xlu0 %1657 }
 0x196   :  { %v1508_v59 = vpop.f32.mrf.mxu3 }
 0x1b9   :  { %v1528_v52 = vpop.f32.mrf.mxu1 }
 0x1bf   :  { %v1448_v55 = vpop.f32.mrf.mxu2 }
 0x1c0   :  { %v1449_v26 = vadd.f32 %v1448_v55, %v1429_v41  ;;  %v1801_v55 = vunpack.c.h.bf16 %v1730_v4  ;;  %v1837_v41 = vunpack.c.h.bf16 %v1748_v13  ;;  %v1803_v4 = vunpack.c.h.bf16 %v1731_v1  ;;  %v1710_v13 = vld [vmem:[%s6682_s10] sm:$0xff] }
 0x1c2   :  { %1918 = vmatpush.msrb.mxu0 %v1801_v55  ;;  %1945 = vmatpush.msra.mxu2 %v1837_v41  ;;  %v1794_v55 = vunpack.c.l.bf16 %v1727_v62  ;;  %v1858_v41 = vunpack.c.l.bf16 %v1759_v45 }
 0x1e0   :  { %v1468_v28 = vpop.f32.mrf.mxu0 }
 0x1e1   :  { %v1469_v9 = vadd.f32 %v1468_v28, %v1449_v26  ;;  %v1726_v26 = vld [vmem:[%s6682_s10 + $0x80] sm:$0xff]  ;;  %v1744_v28 = vld [vmem:[%s6682_s10 + $0x110] sm:$0xff] }
 0x1e3   :  { %vm1551_vm5 = vcmp.gt.f32.partialorder %v1469_v9, 0.0  ;;  %v1553_v3 = vmul.f32 0.2, %v1469_v9 }
 0x1e5   :  { %v1555_v30 = vsel %vm1551_vm5, %v1469_v9, %v1553_v3  ;;  %v1796_v9 = vunpack.c.l.bf16 %v1728_v50  ;;  %v1832_v3 = vunpack.c.l.bf16 %v1746_v25 }
 0x1e6   :  { %1631 = vmatmul.f32.vlgmr.msrb.gmra.mxu2 %v1555_v30  ;;  %v1548_v20 = vpop.f32.mrf.mxu2  ;;  %v1797_v30 = vunpack.c.h.bf16 %v1728_v50  ;;  %v1760_v50 = vunpack.c.l.bf16 %v1710_v13 }
 0x1e7   :  { %1879 = vmatpush.msra.mxu3 %v1796_v9  ;;  %1906 = vmatpush.msrb.mxu1 %v1832_v3  ;;  %v1725_v9 = vld [vmem:[%s6682_s10 + $0x78] sm:$0xff] }
 0x1e8   :  { %v1488_v15 = vpop.f32.mrf.mxu0  ;;  %1919 = vmatpush.msrb.mxu0 %v1797_v30  ;;  %v1757_v3 = vld [vmem:[%s6682_s10 + $0x178] sm:$0xff]  ;;  %v1790_v30 = vunpack.c.l.bf16 %v1725_v9 }
 0x1e9   :  { %v1489_v14 = vadd.f32 %v1488_v15, %v1385_v22  ;;  %v1833_v22 = vunpack.c.h.bf16 %v1746_v25  ;;  %v1724_v15 = vld [vmem:[%s6682_s10 + $0x70] sm:$0xff]  ;;  %v1761_v25 = vunpack.c.h.bf16 %v1710_v13 }
 0x1eb   :  { %v1509_v49 = vadd.f32 %v1508_v59, %v1489_v14  ;;  %v1742_v14 = vld [vmem:[%s6682_s10 + $0x100] sm:$0xff]  ;;  %v1792_v59 = vunpack.c.l.bf16 %v1726_v26  ;;  %1946 = vmatpush.msra.mxu2 %v1833_v22  ;;  %v1854_v22 = vunpack.c.l.bf16 %v1757_v3 }
 0x1ed   :  { %v1529_v23 = vadd.f32 %v1528_v52, %v1509_v49  ;;  %v1828_v49 = vunpack.c.l.bf16 %v1744_v28  ;;  %v1793_v52 = vunpack.c.h.bf16 %v1726_v26  ;;  %1880 = vmatpush.msra.mxu3 %v1792_v59  ;;  %v1795_v26 = vunpack.c.h.bf16 %v1727_v62  ;;  %v1723_v59 = vld [vmem:[%s6682_s10 + $0x68] sm:$0xff] }
 0x1ef   :  { %v1549_v44 = vadd.f32 %v1548_v20, %v1529_v23  ;;  %v1829_v23 = vunpack.c.h.bf16 %v1744_v28  ;;  %v1741_v20 = vld [vmem:[%s6682_s10 + $0xf8] sm:$0xff]  ;;  %1907 = vmatpush.msrb.mxu1 %v1828_v49  ;;  %1920 = vmatpush.msrb.mxu0 %v1793_v52  ;;  %v1859_v28 = vunpack.c.h.bf16 %v1759_v45  ;;  %v1755_v49 = vld [vmem:[%s6682_s10 + $0x168] sm:$0xff]  ;;  %v1786_v52 = vunpack.c.l.bf16 %v1723_v59  ;;  %v1696_v45 = vld [vmem:[%s6681_s9] sm:$0x3] }
 0x1f1   :  { %vm1552_vm6 = vcmp.gt.f32.partialorder %v1549_v44, 0.0  ;;  %v1554_v37 = vmul.f32 0.2, %v1549_v44  ;;  %1947 = vmatpush.msra.mxu2 %v1829_v23  ;;  %v1850_v23 = vunpack.c.l.bf16 %v1755_v49 }
 0x1f3   :  { %v1556_v18 = vsel %vm1552_vm6, %v1549_v44, %v1554_v37  ;;  %v1788_v44 = vunpack.c.l.bf16 %v1724_v15  ;;  %v1824_v37 = vunpack.c.l.bf16 %v1742_v14 }
 0x1f4   :  { %3351 = vmatmul.msk.f32.vlgmr.msra.gmra.mxu0 %vm1611_vm7, %v1556_v18  ;;  %v1722_v18 = vld [vmem:[%s6682_s10 + $0x60] sm:$0xff] }
 0x1f5   :  { %v1784_v46 = vunpack.c.l.bf16 %v1722_v18  ;;  %1881 = vmatpush.msra.mxu3 %v1788_v44  ;;  %1908 = vmatpush.msrb.mxu1 %v1824_v37  ;;  %v1851_v44 = vunpack.c.h.bf16 %v1755_v49  ;;  %v1721_v37 = vld [vmem:[%s6682_s10 + $0x58] sm:$0xff]  ;;  %v5573_v49 = vld [vmem:[%s6684_s12 + $0x1a4] sm:$0xff] }
 0x1f7   :  { %1882 = vmatpush.msra.mxu3 %v1784_v46 }
 0x269   :  { %v1632_v57 = vpop.f32.mrf.mxu2 }
 0x26a   :  { %v1633_v27 = vadd.f32 %v3437_v8, %v1632_v57  ;;  %v1789_v8 = vunpack.c.h.bf16 %v1724_v15  ;;  %v1825_v57 = vunpack.c.h.bf16 %v1742_v14  ;;  %v1791_v15 = vunpack.c.h.bf16 %v1725_v9 }
 0x26b   :  { %v1855_v14 = vunpack.c.h.bf16 %v1757_v3 }
 0x26c   :  { %1921 = vmatpush.msrb.mxu0 %v1789_v8  ;;  %1948 = vmatpush.msra.mxu2 %v1825_v57  ;;  %v1782_v8 = vunpack.c.l.bf16 %v1721_v37 }
 0x271   :  { %v1652_v60 = vpop.f32.mrf.mxu0 }
 0x272   :  { %v5400_v5 = vadd.f32 %v1652_v60, %v1633_v27  ;;  %v1739_v27 = vld [vmem:[%s6682_s10 + $0xe8] sm:$0xff]  ;;  %v1822_v60 = vunpack.c.l.bf16 %v1741_v20 }
 0x273   :  { %v1818_v35 = vunpack.c.l.bf16 %v1739_v27  ;;  %v1819_v61 = vunpack.c.h.bf16 %v1739_v27  ;;  %v1783_v27 = vunpack.c.h.bf16 %v1721_v37 }
 0x274   :  { %v1660_v31 = vmul.f32 %v1658_v6, %v5400_v5  ;;  %3317 = vrot.lane.b32.xlu2 %v5400_v5, %s3500_s6  ;;  %3315 = vst.msk [vmem:[%s6687_s15] sm:$0xff] %vm3314_vm8, %v5400_v5  ;;  %v1823_v6 = vunpack.c.h.bf16 %v1741_v20  ;;  %1953 = vmatpush.msra.mxu1 %v1822_v60  ;;  %v1787_v20 = vunpack.c.h.bf16 %v1723_v59 }
 0x276   :  { %1662 = vrot.lane.b32.xlu0 %v1660_v31, %s3500_s6  ;;  %v1720_v31 = vld [vmem:[%s6682_s10 + $0x50] sm:$0xff]  ;;  %1993 = vmatpush.msrb.mxu2 %v1823_v6  ;;  %v1719_v6 = vld [vmem:[%s6682_s10 + $0x48] sm:$0xff] }
 0x277   :  { %v1780_v12 = vunpack.c.l.bf16 %v1720_v31  ;;  %v1781_v47 = vunpack.c.h.bf16 %v1720_v31  ;;  %1954 = vmatpush.msra.mxu1 %v1818_v35  ;;  %v1751_v31 = vld [vmem:[%s6682_s10 + $0x148] sm:$0xff]  ;;  %v1778_v46 = vunpack.c.l.bf16 %v1719_v6  ;;  %v1779_v42 = vunpack.c.h.bf16 %v1719_v6 }
 0x278   :  { %1994 = vmatpush.msrb.mxu2 %v1819_v61  ;;  %v1843_v35 = vunpack.c.h.bf16 %v1751_v31  ;;  %v1749_v61 = vld [vmem:[%s6682_s10 + $0x138] sm:$0xff]  ;;  %v5600_v6 = vld [vmem:[%s6684_s12 + $0x32c] sm:$0xff] }
 0x279   :  { %1883 = vmatpush.msra.mxu3 %v1780_v12  ;;  %1955 = vmatpush.msra.mxu1 %v1814_v43  ;;  %v1839_v43 = vunpack.c.h.bf16 %v1749_v61 }
 0x27a   :  { %1995 = vmatpush.msrb.mxu2 %v1815_v58  ;;  %v1715_v58 = vld [vmem:[%s6682_s10 + $0x28] sm:$0xff] }
 0x27b   :  { %v1771_v0 = vunpack.c.h.bf16 %v1715_v58 }
 0x27c   :  { %1996 = vmatpush.msrb.mxu2 %v1811_v51  ;;  %v1711_v51 = vld [vmem:[%s6682_s10 + $0x8] sm:$0xff] }
 0x27e   :  { %1997 = vmatpush.msrb.mxu2 %v1807_v24 }
 0x280   :  { %1998 = vmatpush.msrb.mxu2 %v1803_v4 }
 0x282   :  { %1999 = vmatpush.msrb.mxu2 %v1799_v36 }
 0x284   :  { %2000 = vmatpush.msrb.mxu2 %v1795_v26 }
 0x286   :  { %2001 = vmatpush.msrb.mxu2 %v1791_v15 }
 0x288   :  { %2002 = vmatpush.msrb.mxu2 %v1787_v20  ;;  %v5588_v20 = vld [vmem:[%s6684_s12 + $0x348] sm:$0xff] }
 0x28a   :  { %2003 = vmatpush.msrb.mxu2 %v1783_v27 }
 0x28c   :  { %2004 = vmatpush.msrb.mxu2 %v1779_v42  ;;  %v2448_v42 = vunpack.c.l.bf16 %v5600_v6 }
 0x2ce   :  { %v3318_v40 = vpop.permute.xlu2 %3317 }
 0x2cf   :  { %3320 = vst.msk [vmem:[%s6688_s16] sm:$0xff] %vm3314_vm8, %v3318_v40  ;;  %v1785_v40 = vunpack.c.h.bf16 %v1722_v18  ;;  %v1753_v18 = vld [vmem:[%s6682_s10 + $0x158] sm:$0xff] }
 0x2d0   :  { %v1846_v57 = vunpack.c.l.bf16 %v1753_v18  ;;  %v1847_v60 = vunpack.c.h.bf16 %v1753_v18  ;;  %v2350_v18 = vunpack.c.l.bf16 %v5573_v49 }
 0x2d1   :  { %1922 = vmatpush.msrb.mxu0 %v1785_v40  ;;  %v1842_v40 = vunpack.c.l.bf16 %v1751_v31 }
 0x2d3   :  { %1923 = vmatpush.msrb.mxu0 %v1781_v47 }
 0x2e8   :  { %v1663_v34 = vpop.permute.xlu0 %1662 }
 0x2e9   :  { %v1665_v29 = vadd.f32 %v1663_v34, %v5400_v5  ;;  %v1718_v5 = vld [vmem:[%s6682_s10 + $0x40] sm:$0xff]  ;;  %v1717_v34 = vld [vmem:[%s6682_s10 + $0x38] sm:$0xff] }
 0x2ea   :  { %v1776_v21 = vunpack.c.l.bf16 %v1718_v5  ;;  %v1777_v19 = vunpack.c.h.bf16 %v1718_v5  ;;  %v1774_v12 = vunpack.c.l.bf16 %v1717_v34  ;;  %v1775_v47 = vunpack.c.h.bf16 %v1717_v34  ;;  %v1747_v5 = vld [vmem:[%s6682_s10 + $0x128] sm:$0xff]  ;;  %v5616_v34 = vld [vmem:[%s6684_s12 + $0x310] sm:$0xff] }
 0x2eb   :  { %1670 = vperm.xlu1 %3434, %v1665_v29   ;;  %v1835_v56 = vunpack.c.h.bf16 %v1747_v5 }
 0x2ec   :  { %1884 = vmatpush.msra.mxu3 %v1776_v21  ;;  %1924 = vmatpush.msrb.mxu0 %v1777_v19  ;;  %v1713_v21 = vld [vmem:[%s6682_s10 + $0x18] sm:$0xff]  ;;  %v1770_v19 = vunpack.c.l.bf16 %v1715_v58 }
 0x2ed   :  { %2005 = vmatpush.msrb.mxu2 %v1775_v47  ;;  %v1767_v1 = vunpack.c.h.bf16 %v1713_v21  ;;  %v5638_v58 = vld [vmem:[%s6684_s12 + $0x118] sm:$0xff] }
 0x2ee   :  { %1885 = vmatpush.msra.mxu3 %v1772_v2  ;;  %1925 = vmatpush.msrb.mxu0 %v1773_v39  ;;  %v1743_v2 = vld [vmem:[%s6682_s10 + $0x108] sm:$0xff]  ;;  %v1766_v39 = vunpack.c.l.bf16 %v1713_v21 }
 0x2ef   :  { %v1826_v24 = vunpack.c.l.bf16 %v1743_v2  ;;  %2006 = vmatpush.msrb.mxu2 %v1771_v0 }
 0x2f0   :  { %1886 = vmatpush.msra.mxu3 %v1768_v10  ;;  %1926 = vmatpush.msrb.mxu0 %v1769_v17  ;;  %v1763_v10 = vunpack.c.h.bf16 %v1711_v51  ;;  %v1827_v17 = vunpack.c.h.bf16 %v1743_v2  ;;  %v5669_v2 = vld [vmem:[%s6684_s12 + $0x2bc] sm:$0xff] }
 0x2f1   :  { %2007 = vmatpush.msrb.mxu2 %v1767_v1  ;;  %v5680_v1 = vld [vmem:[%s6684_s12 + $0x540] sm:$0xff] }
 0x2f2   :  { %1887 = vmatpush.msra.mxu3 %v1764_v7  ;;  %1927 = vmatpush.msrb.mxu0 %v1765_v33 }
 0x2f3   :  { %3435 = vset.pattern.permute.xlu1 %v3502_v16  ;;  %v1810_v16 = vunpack.c.l.bf16 %v1735_v48  ;;  %v1834_v48 = vunpack.c.l.bf16 %v1747_v5  ;;  %2008 = vmatpush.msrb.mxu2 %v1763_v10  ;;  %v5643_v5 = vld [vmem:[%s6684_s12 + $0x2d8] sm:$0xff]  ;;  %v5688_v10 = vld [vmem:[%s6684_s12 + $0xe0] sm:$0xff] }
 0x2f4   :  { %1683 = vperm.xlu1 %3435, %v1665_v29   ;;  %1888 = vmatpush.msra.mxu3 %v1760_v50  ;;  %v1838_v29 = vunpack.c.l.bf16 %v1749_v61  ;;  %v5621_v61 = vld [vmem:[%s6684_s12 + $0x134] sm:$0xff] }
 0x2f5   :  { %1956 = vmatpush.msra.mxu1 %v1810_v16  ;;  %1928 = vmatpush.msrb.mxu0 %v1761_v25  ;;  %v1745_v16 = vld [vmem:[%s6682_s10 + $0x118] sm:$0xff]  ;;  %v2322_v0 = vunpack.c.l.bf16 %v5621_v61 }
 0x2f6   :  { %1980 = vmatpush.msrb.mxu3 %v1858_v41  ;;  %v1830_v54 = vunpack.c.l.bf16 %v1745_v16  ;;  %v1831_v53 = vunpack.c.h.bf16 %v1745_v16  ;;  %v1699_v41 = vperm.slane %v1696_v45, 1  ;;  %v5662_v16 = vld [vmem:[%s6684_s12 + $0xfc] sm:$0xff] }
 0x2f7   :  { %1957 = vmatpush.msra.mxu1 %v1806_v32  ;;  %2020 = vmatpush.msra.mxu0 %v1859_v28  ;;  %v1762_v32 = vunpack.c.l.bf16 %v1711_v51 }
 0x2f8   :  { %1981 = vmatpush.msrb.mxu3 %v1854_v22 }
 0x2f9   :  { %1958 = vmatpush.msra.mxu1 %v1802_v63  ;;  %2021 = vmatpush.msra.mxu0 %v1855_v14  ;;  %v1667_v63 = vunpack.c.l.bf16 %v1666_v38 }
 0x2fa   :  { %1982 = vmatpush.msrb.mxu3 %v1850_v23  ;;  %v5583_v23 = vld [vmem:[%s6684_s12 + $0x188] sm:$0xff] }
 0x2fb   :  { %1959 = vmatpush.msra.mxu1 %v1798_v11  ;;  %2022 = vmatpush.msra.mxu0 %v1851_v44  ;;  %v1674_v13 = vperm.slane %v1667_v63, 0  ;;  %v1675_v7 = vperm.slane %v1667_v63, 2  ;;  %v1686_v33 = vperm.slane %v1667_v63, 1  ;;  %v1687_v11 = vperm.slane %v1667_v63, 3 }
 0x2fc   :  { %1983 = vmatpush.msrb.mxu3 %v1846_v57  ;;  %v2343_v31 = vunpack.c.l.bf16 %v5583_v23  ;;  %v2351_v63 = vunpack.c.h.bf16 %v5573_v49  ;;  %v5757_v49 = vld [vmem:[%s6684_s12 + $0x47c] sm:$0xff] }
 0x2fd   :  { %1960 = vmatpush.msra.mxu1 %v1794_v55  ;;  %2023 = vmatpush.msra.mxu0 %v1847_v60  ;;  %v1678_v36 = vperm.slane %v1674_v13, 0  ;;  %v1679_v50 = vperm.slane %v1675_v7, 0  ;;  %v1690_v25 = vperm.slane %v1686_v33, 1  ;;  %v1691_v62 = vperm.slane %v1687_v11, 1  ;;  %v5595_v60 = vld [vmem:[%s6684_s12 + $0x16c] sm:$0xff]  ;;  %v5707_v33 = vld [vmem:[%s6684_s12 + $0xc4] sm:$0xff] }
 0x2fe   :  { %1984 = vmatpush.msrb.mxu3 %v1842_v40  ;;  %v1698_v55 = vperm.slane %v1696_v45, 0  ;;  %v2336_v40 = vunpack.c.l.bf16 %v5595_v60  ;;  %v2308_v13 = vunpack.c.l.bf16 %v5662_v16  ;;  %v2420_v7 = vunpack.c.l.bf16 %v5669_v2  ;;  %v5712_v11 = vld [vmem:[%s6684_s12 + $0x284] sm:$0xff] }
 0x2ff   :  { %1961 = vmatpush.msra.mxu1 %v1790_v30  ;;  %2024 = vmatpush.msra.mxu0 %v1843_v35  ;;  %v5611_v35 = vld [vmem:[%s6684_s12 + $0x150] sm:$0xff] }
 0x300   :  { %1985 = vmatpush.msrb.mxu3 %v1838_v29  ;;  %v5631_v29 = vld [vmem:[%s6684_s12 + $0x524] sm:$0xff]  ;;  %v2329_v47 = vunpack.c.l.bf16 %v5611_v35 }
 0x301   :  { %1962 = vmatpush.msra.mxu1 %v1786_v52  ;;  %2025 = vmatpush.msra.mxu0 %v1839_v43  ;;  %v5578_v52 = vld [vmem:[%s6684_s12 + $0x364] sm:$0xff]  ;;  %v2441_v43 = vunpack.c.l.bf16 %v5616_v34  ;;  %v2574_v21 = vunpack.c.l.bf16 %v5631_v29 }
 0x302   :  { %1986 = vmatpush.msrb.mxu3 %v1834_v48  ;;  %v5654_v48 = vld [vmem:[%s6684_s12 + $0x55c] sm:$0xff] }
 0x303   :  { %1963 = vmatpush.msra.mxu1 %v1782_v8  ;;  %2026 = vmatpush.msra.mxu0 %v1835_v56  ;;  %v2462_v8 = vunpack.c.l.bf16 %v5578_v52  ;;  %v2588_v51 = vunpack.c.l.bf16 %v5654_v48 }
 0x304   :  { %1987 = vmatpush.msrb.mxu3 %v1830_v54  ;;  %v5675_v54 = vld [vmem:[%s6684_s12 + $0x4ec] sm:$0xff] }
 0x305   :  { %1964 = vmatpush.msra.mxu1 %v1778_v46  ;;  %2027 = vmatpush.msra.mxu0 %v1831_v53  ;;  %v2455_v46 = vunpack.c.l.bf16 %v5588_v20  ;;  %v2315_v53 = vunpack.c.l.bf16 %v5638_v58  ;;  %v2560_v38 = vunpack.c.l.bf16 %v5675_v54 }
 0x306   :  { %1988 = vmatpush.msrb.mxu3 %v1826_v24  ;;  %v2581_v24 = vunpack.c.l.bf16 %v5680_v1 }
 0x307   :  { %1965 = vmatpush.msra.mxu1 %v1774_v12  ;;  %2028 = vmatpush.msra.mxu0 %v1827_v17  ;;  %v5626_v12 = vld [vmem:[%s6684_s12 + $0x2f4] sm:$0xff]  ;;  %v5693_v17 = vld [vmem:[%s6684_s12 + $0x2a0] sm:$0xff] }
 0x308   :  { %v2434_v56 = vunpack.c.l.bf16 %v5626_v12  ;;  %v2413_v45 = vunpack.c.l.bf16 %v5693_v17 }
 0x309   :  { %1966 = vmatpush.msra.mxu1 %v1770_v19  ;;  %v5649_v19 = vld [vmem:[%s6684_s12 + $0x508] sm:$0xff] }
 0x30b   :  { %1967 = vmatpush.msra.mxu1 %v1766_v39  ;;  %v2567_v39 = vunpack.c.l.bf16 %v5649_v19 }
 0x30d   :  { %1968 = vmatpush.msra.mxu1 %v1762_v32  ;;  %v2427_v32 = vunpack.c.l.bf16 %v5643_v5 }
 0x35d   :  { %v1671_v4 = vpop.permute.xlu1 %1670 }
 0x35e   :  { %v1680_v28 = vmul.f32 %v1678_v36, %v1671_v4  ;;  %v1681_v9 = vmul.f32 %v1679_v50, %v1671_v4  ;;  %v5700_v4 = vld [vmem:[%s6684_s12 + $0x4d0] sm:$0xff]  ;;  %v2344_v50 = vunpack.c.h.bf16 %v5583_v23 }
 0x35f   :  { %v2553_v36 = vunpack.c.l.bf16 %v5700_v4 }
 0x366   :  { %v1684_v26 = vpop.permute.xlu1 %1683 }
 0x367   :  { %v1692_v3 = vmul.f32 %v1690_v25, %v1684_v26  ;;  %v1693_v30 = vmul.f32 %v1691_v62, %v1684_v26  ;;  %v5719_v25 = vld [vmem:[%s6684_s12 + $0x4b4] sm:$0xff]  ;;  %v2301_v62 = vunpack.c.l.bf16 %v5688_v10 }
 0x368   :  { %v2546_v26 = vunpack.c.l.bf16 %v5719_v25 }
 0x369   :  { %v1694_v22 = vadd.f32 %v1692_v3, %v1680_v28  ;;  %v1695_v15 = vadd.f32 %v1693_v30, %v1681_v9  ;;  %v2337_v28 = vunpack.c.h.bf16 %v5595_v60  ;;  %v5738_v9 = vld [vmem:[%s6684_s12 + $0x498] sm:$0xff]  ;;  %v2294_v3 = vunpack.c.l.bf16 %v5707_v33 }
 0x36a   :  { %v2406_v30 = vunpack.c.l.bf16 %v5712_v11 }
 0x36b   :  { %v1702_v14 = vadd.f32 %v1698_v55, %v1694_v22  ;;  %v1703_v59 = vadd.f32 %v1699_v41, %v1695_v15  ;;  %v5726_v55 = vld [vmem:[%s6684_s12 + $0xa8] sm:$0xff] }
 0x36c   :  { %v5731_v41 = vld [vmem:[%s6684_s12 + $0x268] sm:$0xff]  ;;  %v2287_v23 = vunpack.c.l.bf16 %v5726_v55 }
 0x36d   :  { %v1707_v44 = vmul.f32 0.2, %v1703_v59  ;;  %vm1704_vm9 = vcmp.gt.f32.partialorder %v1702_v14, 0.0  ;;  %v1706_v37 = vmul.f32 0.2, %v1702_v14  ;;  %vm1705_vm10 = vcmp.gt.f32.partialorder %v1703_v59, 0.0 }
 0x36e   :  { %v5745_v22 = vld [vmem:[%s6684_s12 + $0x8c] sm:$0xff] }
 0x36f   :  { %v1708_v57 = vsel %vm1704_vm9, %v1702_v14, %v1706_v37  ;;  %v1709_v27 = vsel %vm1705_vm10, %v1703_v59, %v1707_v44  ;;  %v5750_v15 = vld [vmem:[%s6684_s12 + $0x24c] sm:$0xff]  ;;  %v2539_v14 = vunpack.c.l.bf16 %v5738_v9  ;;  %v2330_v59 = vunpack.c.h.bf16 %v5611_v35  ;;  %v5790_v35 = vld [vmem:[%s6684_s12 + $0x38] sm:$0xff] }
 0x370   :  { %1889 = vmatmul.f32.vlgmr.msra.gmra.mxu3 %v1708_v57  ;;  %3352 = vmatmul.msk.f32.vlgmr.msrb.gmra.mxu1 %vm1611_vm7, %v1709_v27  ;;  %v2399_v44 = vunpack.c.l.bf16 %v5731_v41  ;;  %v5764_v37 = vld [vmem:[%s6684_s12 + $0x70] sm:$0xff]  ;;  %v2392_v60 = vunpack.c.l.bf16 %v5750_v15 }
 0x371   :  { %1929 = vmatmul.f32.vlgmr.msrb.gmra.mxu0 %v1708_v57  ;;  %3353 = vmatmul.msk.f32.vlgmr.msra.gmra.mxu2 %vm1611_vm7, %v1709_v27 }
 0x372   :  { %2614 = vmatpush.msra.mxu3 %v2350_v18  ;;  %2634 = vmatpush.msrb.mxu1 %v2462_v8  ;;  %v5769_v18 = vld [vmem:[%s6684_s12 + $0x230] sm:$0xff]  ;;  %v2532_v8 = vunpack.c.l.bf16 %v5757_v49 }
 0x373   :  { %2654 = vmatpush.msrb.mxu0 %v2574_v21  ;;  %2688 = vmatpush.msra.mxu2 %v2588_v51  ;;  %v5802_v21 = vld [vmem:[%s6684_s12 + $0x1c] sm:$0xff] }
 0x374   :  { %2615 = vmatpush.msra.mxu3 %v2343_v31  ;;  %2635 = vmatpush.msrb.mxu1 %v2455_v46  ;;  %v5778_v31 = vld [vmem:[%s6684_s12 + $0x54] sm:$0xff] }
 0x375   :  { %2655 = vmatpush.msrb.mxu0 %v2567_v39  ;;  %2689 = vmatpush.msra.mxu2 %v2581_v24  ;;  %v5783_v46 = vld [vmem:[%s6684_s12 + $0x214] sm:$0xff]  ;;  %v5814_v39 = vld [vmem:[%s6684_s12] sm:$0xff] }
 0x376   :  { %2616 = vmatpush.msra.mxu3 %v2336_v40  ;;  %2636 = vmatpush.msrb.mxu1 %v2448_v42  ;;  %v2273_v40 = vunpack.c.l.bf16 %v5764_v37  ;;  %v2385_v42 = vunpack.c.l.bf16 %v5769_v18 }
 0x377   :  { %2656 = vmatpush.msrb.mxu0 %v2560_v38  ;;  %v2245_v38 = vunpack.c.l.bf16 %v5814_v39 }
 0x378   :  { %1969 = vmatmul.f32.vlgmr.msra.gmra.mxu1 %v1708_v57  ;;  %3354 = vmatmul.msk.f32.vlgmr.msrb.gmra.mxu3 %vm1611_vm7, %v1709_v27 }
 0x379   :  { %2009 = vmatmul.f32.vlgmr.msrb.gmra.mxu2 %v1708_v57  ;;  %3355 = vmatmul.msk.f32.vlgmr.msra.gmra.mxu0 %vm1611_vm7, %v1709_v27  ;;  %v2323_v57 = vunpack.c.h.bf16 %v5621_v61  ;;  %v2280_v27 = vunpack.c.l.bf16 %v5745_v22  ;;  %v5795_v61 = vld [vmem:[%s6684_s12 + $0x1f8] sm:$0xff] }
 0x37a   :  { %2617 = vmatpush.msra.mxu3 %v2329_v47  ;;  %2637 = vmatpush.msrb.mxu1 %v2441_v43  ;;  %v2266_v47 = vunpack.c.l.bf16 %v5778_v31  ;;  %v2378_v43 = vunpack.c.l.bf16 %v5783_v46  ;;  %v2371_v51 = vunpack.c.l.bf16 %v5795_v61 }
 0x37b   :  { %2694 = vmatpush.msrb.mxu2 %v2351_v63  ;;  %2657 = vmatpush.msrb.mxu0 %v2553_v36  ;;  %v2456_v36 = vunpack.c.h.bf16 %v5588_v20  ;;  %v2435_v20 = vunpack.c.h.bf16 %v5626_v12  ;;  %v2407_v12 = vunpack.c.h.bf16 %v5712_v11 }
 0x37c   :  { %2618 = vmatpush.msra.mxu3 %v2322_v0  ;;  %2638 = vmatpush.msrb.mxu1 %v2434_v56  ;;  %v5807_v0 = vld [vmem:[%s6684_s12 + $0x1dc] sm:$0xff]  ;;  %v2259_v56 = vunpack.c.l.bf16 %v5790_v35 }
 0x37d   :  { %2695 = vmatpush.msrb.mxu2 %v2344_v50  ;;  %2658 = vmatpush.msrb.mxu0 %v2546_v26  ;;  %v2364_v24 = vunpack.c.l.bf16 %v5807_v0  ;;  %v2568_v50 = vunpack.c.h.bf16 %v5649_v19  ;;  %v2547_v19 = vunpack.c.h.bf16 %v5719_v25  ;;  %v2428_v26 = vunpack.c.h.bf16 %v5643_v5  ;;  %v2205_v5 = vld [vmem:[%s6684_s12 + $0x460] sm:$0xff] }
 0x37e   :  { %2619 = vmatpush.msra.mxu3 %v2315_v53  ;;  %2639 = vmatpush.msrb.mxu1 %v2427_v32  ;;  %v5819_v53 = vld [vmem:[%s6684_s12 + $0x1c0] sm:$0xff]  ;;  %v2252_v32 = vunpack.c.l.bf16 %v5802_v21  ;;  %v2525_v25 = vunpack.c.l.bf16 %v2205_v5 }
 0x37f   :  { %2696 = vmatpush.msrb.mxu2 %v2337_v28  ;;  %2659 = vmatpush.msrb.mxu0 %v2539_v14  ;;  %v2357_v63 = vunpack.c.l.bf16 %v5819_v53  ;;  %v2526_v28 = vunpack.c.h.bf16 %v2205_v5  ;;  %v2393_v14 = vunpack.c.h.bf16 %v5750_v15  ;;  %v5909_v5 = vld [vmem:[%s6684_s12 + $0x510] sm:$0xff] }
 0x380   :  { %2620 = vmatpush.msra.mxu3 %v2308_v13  ;;  %2640 = vmatpush.msrb.mxu1 %v2420_v7  ;;  %v2463_v13 = vunpack.c.h.bf16 %v5578_v52  ;;  %v2575_v7 = vunpack.c.h.bf16 %v5631_v29  ;;  %v2442_v52 = vunpack.c.h.bf16 %v5616_v34  ;;  %v2554_v29 = vunpack.c.h.bf16 %v5700_v4 }
 0x381   :  { %2697 = vmatpush.msrb.mxu2 %v2330_v59  ;;  %2660 = vmatpush.msrb.mxu0 %v2532_v8  ;;  %v2533_v34 = vunpack.c.h.bf16 %v5757_v49  ;;  %v2414_v4 = vunpack.c.h.bf16 %v5693_v17  ;;  %v2201_v17 = vld [vmem:[%s6684_s12 + $0x444] sm:$0xff]  ;;  %v2302_v49 = vunpack.c.h.bf16 %v5688_v10  ;;  %v2295_v8 = vunpack.c.h.bf16 %v5707_v33  ;;  %v2185_v33 = vld [vmem:[%s6684_s12 + $0x3d4] sm:$0xff] }
 0x382   :  { %2621 = vmatpush.msra.mxu3 %v2301_v62  ;;  %2641 = vmatpush.msrb.mxu1 %v2413_v45  ;;  %v2449_v62 = vunpack.c.h.bf16 %v5600_v6  ;;  %v2561_v45 = vunpack.c.h.bf16 %v5675_v54  ;;  %v2540_v6 = vunpack.c.h.bf16 %v5738_v9  ;;  %v2421_v54 = vunpack.c.h.bf16 %v5669_v2  ;;  %v2197_v59 = vld [vmem:[%s6684_s12 + $0x428] sm:$0xff] }
 0x383   :  { %2698 = vmatpush.msrb.mxu2 %v2323_v57  ;;  %v2316_v2 = vunpack.c.h.bf16 %v5638_v58  ;;  %v2400_v9 = vunpack.c.h.bf16 %v5731_v41  ;;  %2661 = vmatpush.msrb.mxu0 %v2525_v25  ;;  %v2519_v11 = vunpack.c.h.bf16 %v2201_v17  ;;  %v2511_v58 = vunpack.c.l.bf16 %v2197_v59 }
 0x384   :  { %2622 = vmatpush.msra.mxu3 %v2294_v3  ;;  %2642 = vmatpush.msrb.mxu1 %v2406_v30  ;;  %v2518_v3 = vunpack.c.l.bf16 %v2201_v17  ;;  %v2309_v30 = vunpack.c.h.bf16 %v5662_v16  ;;  %v2512_v41 = vunpack.c.h.bf16 %v2197_v59  ;;  %v2193_v16 = vld [vmem:[%s6684_s12 + $0x40c] sm:$0xff]  ;;  %v2379_v10 = vunpack.c.h.bf16 %v5783_v46 }
 0x385   :  { %2699 = vmatpush.msrb.mxu2 %v2316_v2  ;;  %v2504_v15 = vunpack.c.l.bf16 %v2193_v16  ;;  %v2490_v46 = vunpack.c.l.bf16 %v2185_v33  ;;  %v2569_v59 = vunpack.c.l.bf16 %v5909_v5 }
 0x386   :  { %2623 = vmatpush.msra.mxu3 %v2287_v23  ;;  %2643 = vmatpush.msrb.mxu1 %v2399_v44  ;;  %v2386_v23 = vunpack.c.h.bf16 %v5769_v18  ;;  %v2505_v44 = vunpack.c.h.bf16 %v2193_v16  ;;  %v2189_v18 = vld [vmem:[%s6684_s12 + $0x3f0] sm:$0xff] }
 0x387   :  { %2662 = vmatpush.msrb.mxu0 %v2518_v3  ;;  %2700 = vmatpush.msrb.mxu2 %v2309_v30  ;;  %v2497_v57 = vunpack.c.l.bf16 %v2189_v18  ;;  %v5918_v3 = vld [vmem:[%s6684_s12 + $0x4f4] sm:$0xff] }
 0x388   :  { %2624 = vmatpush.msra.mxu3 %v2280_v27  ;;  %2644 = vmatpush.msrb.mxu1 %v2392_v60  ;;  %v2498_v27 = vunpack.c.h.bf16 %v2189_v18  ;;  %v2288_v60 = vunpack.c.h.bf16 %v5726_v55  ;;  %v2181_v55 = vld [vmem:[%s6684_s12 + $0x3b8] sm:$0xff]  ;;  %v2562_v16 = vunpack.c.l.bf16 %v5918_v3 }
 0x389   :  { %2663 = vmatpush.msrb.mxu0 %v2511_v58  ;;  %2701 = vmatpush.msrb.mxu2 %v2302_v49 }
 0x38a   :  { %2625 = vmatpush.msra.mxu3 %v2273_v40  ;;  %2645 = vmatpush.msrb.mxu1 %v2385_v42  ;;  %v2372_v40 = vunpack.c.h.bf16 %v5795_v61  ;;  %v2491_v42 = vunpack.c.h.bf16 %v2185_v33  ;;  %v2483_v61 = vunpack.c.l.bf16 %v2181_v55 }
 0x38b   :  { %2664 = vmatpush.msrb.mxu0 %v2504_v15  ;;  %2702 = vmatpush.msrb.mxu2 %v2295_v8  ;;  %v5933_v15 = vld [vmem:[%s6684_s12 + $0x4d8] sm:$0xff] }
 0x38c   :  { %2626 = vmatpush.msra.mxu3 %v2266_v47  ;;  %2646 = vmatpush.msrb.mxu1 %v2378_v43  ;;  %v2281_v47 = vunpack.c.h.bf16 %v5745_v22  ;;  %v2365_v43 = vunpack.c.h.bf16 %v5807_v0  ;;  %v2177_v22 = vld [vmem:[%s6684_s12 + $0x39c] sm:$0xff] }
 0x38d   :  { %2665 = vmatpush.msrb.mxu0 %v2497_v57  ;;  %2703 = vmatpush.msrb.mxu2 %v2288_v60  ;;  %v2476_v0 = vunpack.c.l.bf16 %v2177_v22  ;;  %v2102_v57 = vld [vmem:[%s6684_s12 + $0x190] sm:$0xff] }
 0x38e   :  { %2627 = vmatpush.msra.mxu3 %v2259_v56  ;;  %2647 = vmatpush.msrb.mxu1 %v2371_v51  ;;  %v2484_v56 = vunpack.c.h.bf16 %v2181_v55  ;;  %v2274_v51 = vunpack.c.h.bf16 %v5764_v37 }
 0x38f   :  { %2666 = vmatpush.msrb.mxu0 %v2490_v46  ;;  %2704 = vmatpush.msrb.mxu2 %v2281_v47  ;;  %v5947_v46 = vld [vmem:[%s6684_s12 + $0x4bc] sm:$0xff]  ;;  %v2098_v47 = vld [vmem:[%s6684_s12 + $0x174] sm:$0xff] }
 0x390   :  { %2628 = vmatpush.msra.mxu3 %v2252_v32  ;;  %2648 = vmatpush.msrb.mxu1 %v2364_v24  ;;  %v2358_v32 = vunpack.c.h.bf16 %v5819_v53  ;;  %v2477_v24 = vunpack.c.h.bf16 %v2177_v22  ;;  %v2346_v22 = vunpack.c.h.bf16 %v2102_v57 }
 0x391   :  { %2667 = vmatpush.msrb.mxu0 %v2483_v61  ;;  %2705 = vmatpush.msrb.mxu2 %v2274_v51  ;;  %v2345_v61 = vunpack.c.l.bf16 %v2102_v57  ;;  %v5964_v51 = vld [vmem:[%s6684_s12 + $0x4a0] sm:$0xff] }
 0x392   :  { %2629 = vmatpush.msra.mxu3 %v2245_v38  ;;  %2649 = vmatpush.msrb.mxu1 %v2357_v63  ;;  %v2267_v38 = vunpack.c.h.bf16 %v5778_v31  ;;  %v2173_v63 = vld [vmem:[%s6684_s12 + $0x380] sm:$0xff]  ;;  %v2582_v31 = vunpack.c.h.bf16 %v5680_v1 }
 0x393   :  { %2668 = vmatpush.msrb.mxu0 %v2476_v0  ;;  %v2469_v37 = vunpack.c.l.bf16 %v2173_v63  ;;  %v2470_v53 = vunpack.c.h.bf16 %v2173_v63  ;;  %v5894_v1 = vld [vmem:[%s6684_s12 + $0x564] sm:$0xff]  ;;  %v2094_v0 = vld [vmem:[%s6684_s12 + $0x158] sm:$0xff]  ;;  %v2338_v63 = vunpack.c.l.bf16 %v2098_v47 }
 0x394   :  { %2714 = vmatpush.msrb.mxu3 %v2463_v13  ;;  %2734 = vmatpush.msra.mxu1 %v2575_v7  ;;  %v2260_v13 = vunpack.c.h.bf16 %v5790_v35  ;;  %v2589_v7 = vunpack.c.h.bf16 %v5654_v48  ;;  %v2590_v25 = vunpack.c.l.bf16 %v5894_v1 }
 0x395   :  { %2706 = vmatpush.msrb.mxu2 %v2267_v38  ;;  %2669 = vmatpush.msrb.mxu0 %v2469_v37 }
 0x396   :  { %2715 = vmatpush.msrb.mxu3 %v2456_v36  ;;  %2735 = vmatpush.msra.mxu1 %v2568_v50  ;;  %v2253_v36 = vunpack.c.h.bf16 %v5802_v21  ;;  %v2246_v50 = vunpack.c.h.bf16 %v5814_v39  ;;  %v5899_v39 = vld [vmem:[%s6684_s12 + $0x52c] sm:$0xff] }
 0x397   :  { %2707 = vmatpush.msrb.mxu2 %v2260_v13  ;;  %2768 = vmatpush.msra.mxu0 %v2589_v7  ;;  %v2576_v2 = vunpack.c.l.bf16 %v5899_v39  ;;  %v2541_v13 = vunpack.c.l.bf16 %v5964_v51  ;;  %v2339_v7 = vunpack.c.h.bf16 %v2098_v47  ;;  %v6074_v47 = vld [vmem:[%s6684_s12 + $0x28c] sm:$0xff] }
 0x398   :  { %2716 = vmatpush.msrb.mxu3 %v2449_v62  ;;  %2736 = vmatpush.msra.mxu1 %v2561_v45  ;;  %v1860_v62 = vld [vmem:[%s6683_s11] sm:$0xf] }
 0x399   :  { %2708 = vmatpush.msrb.mxu2 %v2253_v36  ;;  %2769 = vmatpush.msra.mxu0 %v2582_v31  ;;  %v1863_v45 = vperm.slane %v1860_v62, 1  ;;  %v1865_v17 = vperm.slane %v1860_v62, 3  ;;  %v5991_v36 = vld [vmem:[%s6684_s12 + $0x318] sm:$0xff]  ;;  %v2331_v31 = vunpack.c.l.bf16 %v2094_v0 }
 0x39a   :  { %2717 = vmatpush.msrb.mxu3 %v2442_v52  ;;  %2737 = vmatpush.msra.mxu1 %v2554_v29  ;;  %v1862_v52 = vperm.slane %v1860_v62, 0 }
 0x39b   :  { %2709 = vmatpush.msrb.mxu2 %v2246_v50 }
 0x39c   :  { %2718 = vmatpush.msrb.mxu3 %v2435_v20  ;;  %2738 = vmatpush.msra.mxu1 %v2547_v19 }
 0x39e   :  { %2719 = vmatpush.msrb.mxu3 %v2428_v26  ;;  %2739 = vmatpush.msra.mxu1 %v2540_v6 }
 0x3a0   :  { %2720 = vmatpush.msrb.mxu3 %v2421_v54  ;;  %2740 = vmatpush.msra.mxu1 %v2533_v34  ;;  %v1864_v54 = vperm.slane %v1860_v62, 2  ;;  %v5904_v34 = vld [vmem:[%s6684_s12 + $0x548] sm:$0xff]  ;;  %v2090_v62 = vld [vmem:[%s6684_s12 + $0x13c] sm:$0xff] }
 0x3a2   :  { %2721 = vmatpush.msrb.mxu3 %v2414_v4  ;;  %2741 = vmatpush.msra.mxu1 %v2526_v28 }
 0x3a4   :  { %2722 = vmatpush.msrb.mxu3 %v2407_v12  ;;  %2742 = vmatpush.msra.mxu1 %v2519_v11  ;;  %v2583_v11 = vunpack.c.l.bf16 %v5904_v34 }
 0x3a6   :  { %2723 = vmatpush.msrb.mxu3 %v2400_v9  ;;  %2743 = vmatpush.msra.mxu1 %v2512_v41  ;;  %v2106_v41 = vld [vmem:[%s6684_s12 + $0x1ac] sm:$0xff] }
 0x3a7   :  { %v2352_v18 = vunpack.c.l.bf16 %v2106_v41  ;;  %v2353_v33 = vunpack.c.h.bf16 %v2106_v41 }
 0x3a8   :  { %2724 = vmatpush.msrb.mxu3 %v2393_v14  ;;  %2744 = vmatpush.msra.mxu1 %v2505_v44 }
 0x3aa   :  { %2725 = vmatpush.msrb.mxu3 %v2386_v23  ;;  %2745 = vmatpush.msra.mxu1 %v2498_v27  ;;  %v5941_v27 = vld [vmem:[%s6684_s12 + $0x36c] sm:$0xff] }
 0x3ac   :  { %2726 = vmatpush.msrb.mxu3 %v2379_v10  ;;  %2746 = vmatpush.msra.mxu1 %v2491_v42 }
 0x3ae   :  { %2727 = vmatpush.msrb.mxu3 %v2372_v40  ;;  %2747 = vmatpush.msra.mxu1 %v2484_v56  ;;  %v2555_v40 = vunpack.c.l.bf16 %v5933_v15  ;;  %v2464_v56 = vunpack.c.l.bf16 %v5941_v27 }
 0x3b0   :  { %2728 = vmatpush.msrb.mxu3 %v2365_v43  ;;  %2748 = vmatpush.msra.mxu1 %v2477_v24  ;;  %v5957_v43 = vld [vmem:[%s6684_s12 + $0x350] sm:$0xff] }
 0x3b1   :  { %v5974_v24 = vld [vmem:[%s6684_s12 + $0x334] sm:$0xff]  ;;  %v2457_v37 = vunpack.c.l.bf16 %v5957_v43 }
 0x3b2   :  { %2729 = vmatpush.msrb.mxu3 %v2358_v32  ;;  %2749 = vmatpush.msra.mxu1 %v2470_v53  ;;  %v2548_v32 = vunpack.c.l.bf16 %v5947_v46  ;;  %v5982_v53 = vld [vmem:[%s6684_s12 + $0x484] sm:$0xff]  ;;  %v2450_v50 = vunpack.c.l.bf16 %v5974_v24 }
 0x3ed   :  { %v1910_v35 = vpop.f32.mrf.mxu1 }
 0x3ee   :  { %v1930_v48 = vpop.f32.mrf.mxu0 }
 0x3ef   :  { %v1931_v29 = vadd.f32 %v1930_v48, %v1863_v45  ;;  %v2534_v45 = vunpack.c.l.bf16 %v5982_v53  ;;  %v2332_v48 = vunpack.c.h.bf16 %v2094_v0 }
 0x3f3   :  { %v1890_v20 = vpop.f32.mrf.mxu3 }
 0x3f4   :  { %v1891_v19 = vadd.f32 %v1890_v20, %v1862_v52  ;;  %v1950_v26 = vpop.f32.mrf.mxu2  ;;  %v2443_v52 = vunpack.c.l.bf16 %v5991_v36  ;;  %v2324_v20 = vunpack.c.l.bf16 %v2090_v62 }
 0x3f5   :  { %v1951_v21 = vadd.f32 %v1950_v26, %v1931_v29  ;;  %v1970_v12 = vpop.f32.mrf.mxu1  ;;  %v2086_v29 = vld [vmem:[%s6684_s12 + $0x120] sm:$0xff] }
 0x3f6   :  { %v1911_v6 = vadd.f32 %v1910_v35, %v1891_v19  ;;  %v1971_v14 = vadd.f32 %v1970_v12, %v1864_v54  ;;  %v2030_v8 = vpop.f32.mrf.mxu0  ;;  %v6000_v35 = vld [vmem:[%s6684_s12 + $0x468] sm:$0xff]  ;;  %v6011_v26 = vld [vmem:[%s6684_s12 + $0x2fc] sm:$0xff]  ;;  %v2325_v54 = vunpack.c.h.bf16 %v2090_v62 }
 0x3f7   :  { %vm2034_vm11 = vcmp.gt.f32.partialorder %v1951_v21, 0.0  ;;  %v2038_v4 = vmul.f32 0.2, %v1951_v21  ;;  %v2527_v19 = vunpack.c.l.bf16 %v6000_v35  ;;  %v6024_v12 = vld [vmem:[%s6684_s12 + $0x2e0] sm:$0xff] }
 0x3f8   :  { %vm2033_vm12 = vcmp.gt.f32.partialorder %v1911_v6, 0.0  ;;  %v2037_v28 = vmul.f32 0.2, %v1911_v6  ;;  %v2429_v41 = vunpack.c.l.bf16 %v6024_v12 }
 0x3f9   :  { %v5913_v9 = vsel %vm2034_vm11, %v1951_v21, %v2038_v4  ;;  %v6016_v21 = vld [vmem:[%s6684_s12 + $0x44c] sm:$0xff]  ;;  %v2317_v4 = vunpack.c.l.bf16 %v2086_v29 }
 0x3fa   :  { %v5921_v30 = vsel %vm2033_vm12, %v1911_v6, %v2037_v28  ;;  %2650 = vmatmul.f32.vlgmr.msrb.gmra.mxu1 %v5913_v9  ;;  %v2082_v6 = vld [vmem:[%s6684_s12 + $0x104] sm:$0xff]  ;;  %v2436_v28 = vunpack.c.l.bf16 %v6011_v26 }
 0x3fb   :  { %v1990_v58 = vpop.f32.mrf.mxu3  ;;  %2630 = vmatmul.f32.vlgmr.msra.gmra.mxu3 %v5921_v30  ;;  %2848 = vmatpush.msrb.mxu1 %v2590_v25  ;;  %v6029_v25 = vld [vmem:[%s6684_s12 + $0x430] sm:$0xff] }
 0x3fc   :  { %v1991_v49 = vadd.f32 %v1990_v58, %v1971_v14  ;;  %v2010_v23 = vpop.f32.mrf.mxu2  ;;  %2814 = vmatpush.msra.mxu3 %v2576_v2  ;;  %v2520_v2 = vunpack.c.l.bf16 %v6016_v21  ;;  %v2310_v14 = vunpack.c.l.bf16 %v2082_v6  ;;  %v6046_v58 = vld [vmem:[%s6684_s12 + $0x414] sm:$0xff] }
 0x3fd   :  { %v2011_v44 = vadd.f32 %v2010_v23, %v1865_v17  ;;  %2849 = vmatpush.msrb.mxu1 %v2583_v11  ;;  %v2078_v17 = vld [vmem:[%s6684_s12 + $0xe8] sm:$0xff]  ;;  %v2318_v11 = vunpack.c.h.bf16 %v2086_v29  ;;  %v2506_v57 = vunpack.c.l.bf16 %v6046_v58 }
 0x3fe   :  { %vm2035_vm13 = vcmp.gt.f32.partialorder %v1991_v49, 0.0  ;;  %v2039_v10 = vmul.f32 0.2, %v1991_v49  ;;  %2815 = vmatpush.msra.mxu3 %v2569_v59  ;;  %v6041_v59 = vld [vmem:[%s6684_s12 + $0x2c4] sm:$0xff]  ;;  %v2074_v23 = vld [vmem:[%s6684_s12 + $0xcc] sm:$0xff] }
 0x3ff   :  { %v2031_v60 = vadd.f32 %v2030_v8, %v2011_v44  ;;  %v2303_v44 = vunpack.c.l.bf16 %v2078_v17  ;;  %v6059_v8 = vld [vmem:[%s6684_s12 + $0x2a8] sm:$0xff] }
 0x400   :  { %v5949_v42 = vsel %vm2035_vm13, %v1991_v49, %v2039_v10  ;;  %2816 = vmatpush.msra.mxu3 %v2562_v16  ;;  %v2513_v49 = vunpack.c.l.bf16 %v6029_v25  ;;  %v2311_v16 = vunpack.c.h.bf16 %v2082_v6  ;;  %v6064_v10 = vld [vmem:[%s6684_s12 + $0x3f8] sm:$0xff] }
 0x401   :  { %vm2036_vm14 = vcmp.gt.f32.partialorder %v2031_v60, 0.0  ;;  %v2040_v55 = vmul.f32 0.2, %v2031_v60  ;;  %2670 = vmatmul.f32.vlgmr.msrb.gmra.mxu0 %v5949_v42 }
 0x402   :  { %2750 = vmatmul.f32.vlgmr.msra.gmra.mxu1 %v5949_v42  ;;  %2774 = vmatpush.msrb.mxu0 %v2352_v18  ;;  %v2422_v18 = vunpack.c.l.bf16 %v6041_v59 }
 0x403   :  { %v5976_v38 = vsel %vm2036_vm14, %v2031_v60, %v2040_v55  ;;  %2817 = vmatpush.msra.mxu3 %v2555_v40  ;;  %2854 = vmatpush.msra.mxu1 %v2353_v33  ;;  %v2070_v60 = vld [vmem:[%s6684_s12 + $0xb0] sm:$0xff]  ;;  %v2304_v40 = vunpack.c.h.bf16 %v2078_v17  ;;  %v2296_v33 = vunpack.c.l.bf16 %v2074_v23  ;;  %v6079_v55 = vld [vmem:[%s6684_s12 + $0x3dc] sm:$0xff] }
 0x404   :  { %3356 = vmatmul.msk.f32.vlgmr.msra.gmra.mxu2 %vm656_vm0, %v5976_v38  ;;  %2730 = vmatmul.f32.vlgmr.msrb.gmra.mxu3 %v5913_v9  ;;  %v2289_v0 = vunpack.c.l.bf16 %v2070_v60 }
 0x405   :  { %2775 = vmatpush.msrb.mxu0 %v2345_v61  ;;  %2794 = vmatpush.msra.mxu2 %v2464_v56  ;;  %v2415_v61 = vunpack.c.l.bf16 %v6059_v8  ;;  %v2499_v56 = vunpack.c.l.bf16 %v6064_v10 }
 0x406   :  { %2818 = vmatpush.msra.mxu3 %v2548_v32  ;;  %2855 = vmatpush.msra.mxu1 %v2346_v22  ;;  %v2066_v32 = vld [vmem:[%s6684_s12 + $0x94] sm:$0xff]  ;;  %v2297_v22 = vunpack.c.h.bf16 %v2074_v23 }
 0x407   :  { %2776 = vmatpush.msrb.mxu0 %v2338_v63  ;;  %2795 = vmatpush.msra.mxu2 %v2457_v37  ;;  %v6089_v63 = vld [vmem:[%s6684_s12 + $0x270] sm:$0xff]  ;;  %v6094_v37 = vld [vmem:[%s6684_s12 + $0x3c0] sm:$0xff]  ;;  %v2282_v62 = vunpack.c.l.bf16 %v2066_v32 }
 0x408   :  { %2819 = vmatpush.msra.mxu3 %v2541_v13  ;;  %2856 = vmatpush.msra.mxu1 %v2339_v7  ;;  %v2408_v13 = vunpack.c.l.bf16 %v6074_v47  ;;  %v2492_v7 = vunpack.c.l.bf16 %v6079_v55  ;;  %v2485_v29 = vunpack.c.l.bf16 %v6094_v37 }
 0x409   :  { %2777 = vmatpush.msrb.mxu0 %v2331_v31  ;;  %2796 = vmatpush.msra.mxu2 %v2450_v50  ;;  %v2062_v31 = vld [vmem:[%s6684_s12 + $0x78] sm:$0xff]  ;;  %v2290_v50 = vunpack.c.h.bf16 %v2070_v60 }
 0x40a   :  { %2820 = vmatpush.msra.mxu3 %v2534_v45  ;;  %2857 = vmatpush.msra.mxu1 %v2332_v48  ;;  %v6104_v45 = vld [vmem:[%s6684_s12 + $0x254] sm:$0xff]  ;;  %v6109_v48 = vld [vmem:[%s6684_s12 + $0x3a4] sm:$0xff]  ;;  %v2275_v6 = vunpack.c.l.bf16 %v2062_v31  ;;  %v2276_v17 = vunpack.c.h.bf16 %v2062_v31 }
 0x40b   :  { %3357 = vmatmul.msk.f32.vlgmr.msra.gmra.mxu0 %vm656_vm0, %v5976_v38  ;;  %2797 = vmatpush.msra.mxu2 %v2443_v52  ;;  %v2401_v52 = vunpack.c.l.bf16 %v6089_v63 }
 0x40c   :  { %2778 = vmatpush.msrb.mxu0 %v2324_v20  ;;  %2821 = vmatpush.msra.mxu3 %v2527_v19  ;;  %v2058_v20 = vld [vmem:[%s6684_s12 + $0x5c] sm:$0xff]  ;;  %v2283_v19 = vunpack.c.h.bf16 %v2066_v32 }
 0x40d   :  { %3358 = vmatmul.msk.f32.vlgmr.msrb.gmra.mxu1 %vm656_vm0, %v5976_v38  ;;  %2710 = vmatmul.f32.vlgmr.msrb.gmra.mxu2 %v5921_v30  ;;  %v6161_v32 = vld [vmem:[%s6684_s12 + $0x17c] sm:$0xff] }
 0x40e   :  { %2858 = vmatpush.msra.mxu1 %v2325_v54  ;;  %2779 = vmatpush.msrb.mxu0 %v2317_v4  ;;  %v6119_v54 = vld [vmem:[%s6684_s12 + $0x238] sm:$0xff]  ;;  %v6124_v4 = vld [vmem:[%s6684_s12 + $0x388] sm:$0xff] }
 0x40f   :  { %2798 = vmatpush.msra.mxu2 %v2436_v28  ;;  %2822 = vmatpush.msra.mxu3 %v2520_v2  ;;  %v2394_v28 = vunpack.c.l.bf16 %v6104_v45  ;;  %v2478_v2 = vunpack.c.l.bf16 %v6109_v48  ;;  %v2471_v23 = vunpack.c.l.bf16 %v6124_v4 }
 0x410   :  { %2859 = vmatpush.msra.mxu1 %v2318_v11  ;;  %2780 = vmatpush.msrb.mxu0 %v2310_v14  ;;  %v2268_v11 = vunpack.c.l.bf16 %v2058_v20  ;;  %v6131_v14 = vld [vmem:[%s6684_s12 + $0x1b4] sm:$0xff] }
 0x411   :  { %2799 = vmatpush.msra.mxu2 %v2429_v41  ;;  %2823 = vmatpush.msra.mxu3 %v2513_v49  ;;  %v2054_v41 = vld [vmem:[%s6684_s12 + $0x40] sm:$0xff]  ;;  %v2387_v49 = vunpack.c.l.bf16 %v6119_v54  ;;  %v2354_v60 = vunpack.c.l.bf16 %v6131_v14 }
 0x412   :  { %2860 = vmatpush.msra.mxu1 %v2311_v16  ;;  %2781 = vmatpush.msrb.mxu0 %v2303_v44  ;;  %v6141_v16 = vld [vmem:[%s6684_s12 + $0x21c] sm:$0xff]  ;;  %v2269_v44 = vunpack.c.h.bf16 %v2058_v20 }
 0x413   :  { %2800 = vmatpush.msra.mxu2 %v2422_v18  ;;  %2824 = vmatpush.msra.mxu3 %v2506_v57  ;;  %v6146_v18 = vld [vmem:[%s6684_s12 + $0x198] sm:$0xff]  ;;  %v2050_v57 = vld [vmem:[%s6684_s12 + $0x24] sm:$0xff] }
 0x414   :  { %2861 = vmatpush.msra.mxu1 %v2304_v40  ;;  %2782 = vmatpush.msrb.mxu0 %v2296_v33  ;;  %v2261_v40 = vunpack.c.l.bf16 %v2054_v41  ;;  %v6155_v33 = vld [vmem:[%s6684_s12 + $0x200] sm:$0xff] }
 0x415   :  { %2801 = vmatpush.msra.mxu2 %v2415_v61  ;;  %2825 = vmatpush.msra.mxu3 %v2499_v56  ;;  %v2380_v61 = vunpack.c.l.bf16 %v6141_v16  ;;  %v2262_v56 = vunpack.c.h.bf16 %v2054_v41  ;;  %v2373_v31 = vunpack.c.l.bf16 %v6155_v33  ;;  %v6193_v41 = vld [vmem:[%s6684_s12 + $0x144] sm:$0xff] }
 0x416   :  { %2862 = vmatpush.msra.mxu1 %v2297_v22  ;;  %2783 = vmatpush.msrb.mxu0 %v2289_v0  ;;  %v2046_v22 = vld [vmem:[%s6684_s12 + $0x8] sm:$0xff]  ;;  %v2347_v0 = vunpack.c.l.bf16 %v6146_v18 }
 0x417   :  { %2802 = vmatpush.msra.mxu2 %v2408_v13  ;;  %2826 = vmatpush.msra.mxu3 %v2492_v7  ;;  %v2254_v13 = vunpack.c.l.bf16 %v2050_v57  ;;  %v6170_v7 = vld [vmem:[%s6684_s12 + $0x1e4] sm:$0xff]  ;;  %v2248_v20 = vunpack.c.h.bf16 %v2046_v22 }
 0x418   :  { %2863 = vmatpush.msra.mxu1 %v2290_v50  ;;  %2784 = vmatpush.msrb.mxu0 %v2282_v62  ;;  %v2255_v50 = vunpack.c.h.bf16 %v2050_v57  ;;  %v2340_v62 = vunpack.c.l.bf16 %v6161_v32  ;;  %v6213_v57 = vld [vmem:[%s6684_s12 + $0x358] sm:$0xff] }
 0x419   :  { %2803 = vmatpush.msra.mxu2 %v2401_v52  ;;  %2827 = vmatpush.msra.mxu3 %v2485_v29  ;;  %v2247_v52 = vunpack.c.l.bf16 %v2046_v22  ;;  %v2366_v29 = vunpack.c.l.bf16 %v6170_v7  ;;  %v2459_v22 = vunpack.c.l.bf16 %v6213_v57 }
 0x41a   :  { %2864 = vmatpush.msra.mxu1 %v2283_v19  ;;  %2785 = vmatpush.msrb.mxu0 %v2275_v6  ;;  %v6179_v19 = vld [vmem:[%s6684_s12 + $0x160] sm:$0xff]  ;;  %v6184_v6 = vld [vmem:[%s6684_s12 + $0x1c8] sm:$0xff] }
 0x41b   :  { %2804 = vmatpush.msra.mxu2 %v2394_v28  ;;  %2828 = vmatpush.msra.mxu3 %v2478_v2  ;;  %v2465_v28 = vunpack.c.h.bf16 %v5941_v27  ;;  %v2591_v2 = vunpack.c.h.bf16 %v5894_v1  ;;  %v2458_v1 = vunpack.c.h.bf16 %v5957_v43  ;;  %v2577_v27 = vunpack.c.h.bf16 %v5899_v39 }
 0x41c   :  { %2865 = vmatpush.msra.mxu1 %v2276_v17  ;;  %2786 = vmatpush.msrb.mxu0 %v2268_v11  ;;  %v2333_v17 = vunpack.c.l.bf16 %v6179_v19  ;;  %v2359_v11 = vunpack.c.l.bf16 %v6184_v6  ;;  %v2326_v43 = vunpack.c.l.bf16 %v6193_v41  ;;  %v2451_v39 = vunpack.c.h.bf16 %v5974_v24 }
 0x41d   :  { %2805 = vmatpush.msra.mxu2 %v2387_v49  ;;  %2829 = vmatpush.msra.mxu3 %v2471_v23  ;;  %v6198_v49 = vld [vmem:[%s6684_s12 + $0x374] sm:$0xff]  ;;  %v2584_v23 = vunpack.c.h.bf16 %v5904_v34  ;;  %v2570_v34 = vunpack.c.h.bf16 %v5909_v5  ;;  %v2444_v5 = vunpack.c.h.bf16 %v5991_v36  ;;  %v2563_v24 = vunpack.c.h.bf16 %v5918_v3 }
 0x41e   :  { %2866 = vmatpush.msra.mxu1 %v2269_v44  ;;  %2830 = vmatmul.f32.vlgmr.msra.gmra.mxu3 %v5949_v42  ;;  %v6208_v44 = vld [vmem:[%s6684_s12 + $0x128] sm:$0xff]  ;;  %v2437_v3 = vunpack.c.h.bf16 %v6011_v26  ;;  %v2556_v36 = vunpack.c.h.bf16 %v5933_v15  ;;  %v2430_v15 = vunpack.c.h.bf16 %v6024_v12 }
 0x41f   :  { %2934 = vmatpush.msrb.mxu3 %v2354_v60  ;;  %2787 = vmatpush.msrb.mxu0 %v2261_v40  ;;  %v2466_v60 = vunpack.c.l.bf16 %v6198_v49  ;;  %v6222_v40 = vld [vmem:[%s6684_s12 + $0x10c] sm:$0xff] }
 0x420   :  { %2806 = vmatpush.msra.mxu2 %v2380_v61  ;;  %2867 = vmatpush.msra.mxu1 %v2262_v56  ;;  %v6227_v61 = vld [vmem:[%s6684_s12 + $0x33c] sm:$0xff]  ;;  %v2319_v56 = vunpack.c.l.bf16 %v6208_v44 }
 0x421   :  { %2935 = vmatpush.msrb.mxu3 %v2347_v0  ;;  %2788 = vmatpush.msrb.mxu0 %v2254_v13  ;;  %v6237_v0 = vld [vmem:[%s6684_s12 + $0xf0] sm:$0xff]  ;;  %v2312_v13 = vunpack.c.l.bf16 %v6222_v40 }
 0x422   :  { %2807 = vmatpush.msra.mxu2 %v2373_v31  ;;  %2868 = vmatpush.msra.mxu1 %v2255_v50  ;;  %v2452_v31 = vunpack.c.l.bf16 %v6227_v61  ;;  %v6244_v50 = vld [vmem:[%s6684_s12 + $0x320] sm:$0xff] }
 0x423   :  { %2936 = vmatpush.msrb.mxu3 %v2340_v62  ;;  %2789 = vmatpush.msrb.mxu0 %v2247_v52  ;;  %v6251_v62 = vld [vmem:[%s6684_s12 + $0xd4] sm:$0xff]  ;;  %v2305_v52 = vunpack.c.l.bf16 %v6237_v0  ;;  %v2445_v26 = vunpack.c.l.bf16 %v6244_v50 }
 0x424   :  { %2808 = vmatpush.msra.mxu2 %v2366_v29  ;;  %2869 = vmatpush.msra.mxu1 %v2248_v20  ;;  %v6257_v29 = vld [vmem:[%s6684_s12 + $0x304] sm:$0xff]  ;;  %v6264_v20 = vld [vmem:[%s6684_s12 + $0xb8] sm:$0xff] }
 0x425   :  { %2790 = vmatmul.f32.vlgmr.msrb.gmra.mxu0 %v5921_v30  ;;  %2870 = vmatmul.f32.vlgmr.msra.gmra.mxu1 %v5921_v30  ;;  %v2438_v12 = vunpack.c.l.bf16 %v6257_v29 }
 0x426   :  { %2874 = vmatpush.msra.mxu0 %v2465_v28  ;;  %2928 = vmatpush.msrb.mxu1 %v2591_v2  ;;  %v2549_v28 = vunpack.c.h.bf16 %v5947_v46  ;;  %v2298_v2 = vunpack.c.l.bf16 %v6251_v62  ;;  %v2542_v46 = vunpack.c.h.bf16 %v5964_v51  ;;  %v2535_v51 = vunpack.c.h.bf16 %v5982_v53 }
 0x427   :  { %2937 = vmatpush.msrb.mxu3 %v2333_v17  ;;  %2809 = vmatpush.msra.mxu2 %v2359_v11  ;;  %v6271_v17 = vld [vmem:[%s6684_s12 + $0x2e8] sm:$0xff]  ;;  %v2423_v11 = vunpack.c.h.bf16 %v6041_v59  ;;  %v2528_v53 = vunpack.c.h.bf16 %v6000_v35  ;;  %v2521_v35 = vunpack.c.h.bf16 %v6016_v21  ;;  %v2514_v21 = vunpack.c.h.bf16 %v6029_v25 }
 0x428   :  { %2810 = vmatmul.f32.vlgmr.msra.gmra.mxu2 %v5913_v9  ;;  %2875 = vmatpush.msra.mxu0 %v2458_v1  ;;  %v6278_v1 = vld [vmem:[%s6684_s12 + $0x9c] sm:$0xff]  ;;  %v2431_v59 = vunpack.c.l.bf16 %v6271_v17  ;;  %v2507_v25 = vunpack.c.h.bf16 %v6046_v58  ;;  %v6366_v58 = vld [vmem:[%s6684_s12 + $0x224] sm:$0xff] }
 0x429   :  { %2894 = vmatpush.msrb.mxu2 %v2577_v27  ;;  %2929 = vmatpush.msrb.mxu1 %v2584_v23  ;;  %v2291_v27 = vunpack.c.l.bf16 %v6264_v20  ;;  %v6287_v23 = vld [vmem:[%s6684_s12 + $0x2cc] sm:$0xff] }
 0x42a   :  { %2938 = vmatpush.msrb.mxu3 %v2326_v43  ;;  %2876 = vmatpush.msra.mxu0 %v2451_v39  ;;  %v2416_v43 = vunpack.c.h.bf16 %v6059_v8  ;;  %v2284_v39 = vunpack.c.l.bf16 %v6278_v1  ;;  %v2424_v8 = vunpack.c.l.bf16 %v6287_v23 }
 0x42b   :  { %2954 = vmatpush.msra.mxu1 %v2466_v60  ;;  %2895 = vmatpush.msrb.mxu2 %v2570_v34  ;;  %v6294_v60 = vld [vmem:[%s6684_s12 + $0x80] sm:$0xff]  ;;  %v6301_v34 = vld [vmem:[%s6684_s12 + $0x2b0] sm:$0xff] }
 0x42c   :  { %2939 = vmatpush.msrb.mxu3 %v2319_v56  ;;  %2877 = vmatpush.msra.mxu0 %v2444_v5  ;;  %v2409_v56 = vunpack.c.h.bf16 %v6074_v47  ;;  %v2277_v5 = vunpack.c.l.bf16 %v6294_v60  ;;  %v2417_v47 = vunpack.c.l.bf16 %v6301_v34 }
 0x42d   :  { %2955 = vmatpush.msra.mxu1 %v2459_v22  ;;  %2896 = vmatpush.msrb.mxu2 %v2563_v24  ;;  %v6308_v22 = vld [vmem:[%s6684_s12 + $0x64] sm:$0xff]  ;;  %v6315_v24 = vld [vmem:[%s6684_s12 + $0x294] sm:$0xff] }
 0x42e   :  { %2940 = vmatpush.msrb.mxu3 %v2312_v13  ;;  %2878 = vmatpush.msra.mxu0 %v2437_v3  ;;  %v2402_v13 = vunpack.c.h.bf16 %v6089_v63  ;;  %v2270_v3 = vunpack.c.l.bf16 %v6308_v22  ;;  %v2410_v63 = vunpack.c.l.bf16 %v6315_v24 }
 0x42f   :  { %2956 = vmatpush.msra.mxu1 %v2452_v31  ;;  %2897 = vmatpush.msrb.mxu2 %v2556_v36  ;;  %v6322_v31 = vld [vmem:[%s6684_s12 + $0x48] sm:$0xff]  ;;  %v6329_v36 = vld [vmem:[%s6684_s12 + $0x278] sm:$0xff] }
 0x430   :  { %3359 = vmatmul.msk.f32.vlgmr.msrb.gmra.mxu1 %vm656_vm0, %v5976_v38  ;;  %2941 = vmatpush.msrb.mxu3 %v2305_v52  ;;  %v2395_v52 = vunpack.c.h.bf16 %v6104_v45  ;;  %v2403_v45 = vunpack.c.l.bf16 %v6329_v36 }
 0x431   :  { %2957 = vmatpush.msra.mxu1 %v2445_v26  ;;  %2879 = vmatpush.msra.mxu0 %v2430_v15  ;;  %v6336_v26 = vld [vmem:[%s6684_s12 + $0x2c] sm:$0xff]  ;;  %v2263_v15 = vunpack.c.l.bf16 %v6322_v31 }
 0x432   :  { %2898 = vmatpush.msrb.mxu2 %v2549_v28  ;;  %2942 = vmatpush.msrb.mxu3 %v2298_v2  ;;  %v6343_v28 = vld [vmem:[%s6684_s12 + $0x25c] sm:$0xff]  ;;  %v2388_v2 = vunpack.c.h.bf16 %v6119_v54 }
 0x433   :  { %2958 = vmatpush.msra.mxu1 %v2438_v12  ;;  %2880 = vmatpush.msra.mxu0 %v2423_v11  ;;  %v6350_v12 = vld [vmem:[%s6684_s12 + $0x10] sm:$0xff]  ;;  %v2256_v11 = vunpack.c.l.bf16 %v6336_v26  ;;  %v2396_v54 = vunpack.c.l.bf16 %v6343_v28 }
 0x434   :  { %2899 = vmatpush.msrb.mxu2 %v2542_v46  ;;  %2943 = vmatpush.msrb.mxu3 %v2291_v27  ;;  %v6357_v46 = vld [vmem:[%s6684_s12 + $0x240] sm:$0xff]  ;;  %v2381_v27 = vunpack.c.h.bf16 %v6141_v16  ;;  %v2374_v16 = vunpack.c.h.bf16 %v6155_v33  ;;  %v2486_v33 = vunpack.c.h.bf16 %v6094_v37  ;;  %v2479_v37 = vunpack.c.h.bf16 %v6109_v48 }
 0x435   :  { %2959 = vmatpush.msra.mxu1 %v2431_v59  ;;  %2881 = vmatpush.msra.mxu0 %v2416_v43  ;;  %v2500_v59 = vunpack.c.h.bf16 %v6064_v10  ;;  %v2249_v43 = vunpack.c.l.bf16 %v6350_v12  ;;  %v6374_v10 = vld [vmem:[%s6684_s12 + $0x208] sm:$0xff]  ;;  %v2446_v48 = vunpack.c.h.bf16 %v6244_v50  ;;  %v6419_v50 = vld [vmem:[%s6684_s12 + $0x550] sm:$0xff] }
 0x436   :  { %2900 = vmatpush.msrb.mxu2 %v2535_v51  ;;  %2944 = vmatpush.msrb.mxu3 %v2284_v39  ;;  %v2389_v51 = vunpack.c.l.bf16 %v6357_v46  ;;  %v2467_v39 = vunpack.c.h.bf16 %v6198_v49  ;;  %v2375_v49 = vunpack.c.l.bf16 %v6374_v10 }
 0x437   :  { %2960 = vmatpush.msra.mxu1 %v2424_v8  ;;  %2882 = vmatpush.msra.mxu0 %v2409_v56  ;;  %v2493_v8 = vunpack.c.h.bf16 %v6079_v55  ;;  %v2382_v56 = vunpack.c.l.bf16 %v6366_v58  ;;  %v2235_v55 = vld [vmem:[%s6684_s12 + $0x534] sm:$0xff] }
 0x438   :  { %2901 = vmatpush.msrb.mxu2 %v2528_v53  ;;  %2945 = vmatpush.msrb.mxu3 %v2277_v5  ;;  %v2460_v53 = vunpack.c.h.bf16 %v6213_v57  ;;  %v2367_v5 = vunpack.c.h.bf16 %v6170_v7  ;;  %v2453_v7 = vunpack.c.h.bf16 %v6227_v61  ;;  %v2360_v57 = vunpack.c.h.bf16 %v6184_v6  ;;  %v2231_v61 = vld [vmem:[%s6684_s12 + $0x518] sm:$0xff]  ;;  %v6406_v6 = vld [vmem:[%s6684_s12 + $0x56c] sm:$0xff] }
 0x439   :  { %2961 = vmatpush.msra.mxu1 %v2417_v47  ;;  %2883 = vmatpush.msra.mxu0 %v2402_v13  ;;  %v6386_v47 = vld [vmem:[%s6684_s12 + $0x1ec] sm:$0xff] }
 0x43a   :  { %2902 = vmatpush.msrb.mxu2 %v2521_v35  ;;  %2946 = vmatpush.msrb.mxu3 %v2270_v3  ;;  %v6397_v13 = vld [vmem:[%s6684_s12 + $0x1d0] sm:$0xff]  ;;  %v2368_v35 = vunpack.c.l.bf16 %v6386_v47  ;;  %v2578_v3 = vunpack.c.l.bf16 %v2235_v55 }
 0x43b   :  { %2962 = vmatpush.msra.mxu1 %v2410_v63  ;;  %2884 = vmatpush.msra.mxu0 %v2395_v52  ;;  %v2472_v63 = vunpack.c.h.bf16 %v6124_v4  ;;  %v2361_v52 = vunpack.c.l.bf16 %v6397_v13  ;;  %v2439_v4 = vunpack.c.h.bf16 %v6257_v29  ;;  %v2572_v29 = vunpack.c.h.bf16 %v2231_v61 }
 0x43c   :  { %2903 = vmatpush.msrb.mxu2 %v2514_v21  ;;  %2947 = vmatpush.msrb.mxu3 %v2263_v15  ;;  %v2227_v21 = vld [vmem:[%s6684_s12 + $0x4fc] sm:$0xff]  ;;  %v2571_v15 = vunpack.c.l.bf16 %v2231_v61 }
 0x43d   :  { %2963 = vmatpush.msra.mxu1 %v2403_v45  ;;  %2885 = vmatpush.msra.mxu0 %v2388_v2  ;;  %v2592_v45 = vunpack.c.l.bf16 %v6406_v6  ;;  %v2579_v2 = vunpack.c.h.bf16 %v2235_v55 }
 0x43e   :  { %2904 = vmatpush.msrb.mxu2 %v2507_v25  ;;  %2948 = vmatpush.msrb.mxu3 %v2256_v11  ;;  %v2564_v25 = vunpack.c.l.bf16 %v2227_v21  ;;  %v2223_v11 = vld [vmem:[%s6684_s12 + $0x4e0] sm:$0xff] }
 0x43f   :  { %2964 = vmatpush.msra.mxu1 %v2396_v54  ;;  %2886 = vmatpush.msra.mxu0 %v2381_v27  ;;  %v2585_v54 = vunpack.c.l.bf16 %v6419_v50  ;;  %v2432_v27 = vunpack.c.h.bf16 %v6271_v17  ;;  %v2565_v17 = vunpack.c.h.bf16 %v2227_v21  ;;  %v2383_v21 = vunpack.c.h.bf16 %v6366_v58  ;;  %v2187_v58 = vld [vmem:[%s6684_s12 + $0x3e4] sm:$0xff] }
 0x440   :  { %2905 = vmatpush.msrb.mxu2 %v2500_v59  ;;  %2949 = vmatpush.msrb.mxu3 %v2249_v43  ;;  %v2355_v59 = vunpack.c.h.bf16 %v6131_v14  ;;  %v2219_v43 = vld [vmem:[%s6684_s12 + $0x4c4] sm:$0xff] }
 0x441   :  { %2950 = vmatmul.f32.vlgmr.msrb.gmra.mxu3 %v5921_v30  ;;  %2965 = vmatpush.msra.mxu1 %v2389_v51  ;;  %v2557_v51 = vunpack.c.l.bf16 %v2223_v11  ;;  %v2215_v14 = vld [vmem:[%s6684_s12 + $0x4a8] sm:$0xff] }
 0x442   :  { %3034 = vmatpush.msra.mxu3 %v2467_v39  ;;  %2887 = vmatpush.msra.mxu0 %v2374_v16  ;;  %v2425_v39 = vunpack.c.h.bf16 %v6287_v23  ;;  %v2348_v16 = vunpack.c.h.bf16 %v6146_v18  ;;  %v2211_v23 = vld [vmem:[%s6684_s12 + $0x48c] sm:$0xff]  ;;  %v2543_v18 = vunpack.c.l.bf16 %v2215_v14 }
 0x443   :  { %2906 = vmatpush.msrb.mxu2 %v2493_v8  ;;  %2966 = vmatpush.msra.mxu1 %v2382_v56  ;;  %v2550_v8 = vunpack.c.l.bf16 %v2219_v43  ;;  %v2418_v56 = vunpack.c.h.bf16 %v6301_v34  ;;  %v2207_v34 = vld [vmem:[%s6684_s12 + $0x470] sm:$0xff]  ;;  %v2536_v55 = vunpack.c.l.bf16 %v2211_v23 }
 0x444   :  { %3035 = vmatpush.msra.mxu3 %v2460_v53  ;;  %2888 = vmatpush.msra.mxu0 %v2367_v5  ;;  %v2341_v53 = vunpack.c.h.bf16 %v6161_v32  ;;  %v2558_v5 = vunpack.c.h.bf16 %v2223_v11  ;;  %v2551_v32 = vunpack.c.h.bf16 %v2219_v43  ;;  %v2369_v11 = vunpack.c.h.bf16 %v6386_v47  ;;  %v2232_v43 = vld [vmem:[%s6684_s12 + $0x520] sm:$0xf] }
 0x445   :  { %2907 = vmatpush.msrb.mxu2 %v2486_v33  ;;  %2967 = vmatpush.msra.mxu1 %v2375_v49  ;;  %v2411_v33 = vunpack.c.h.bf16 %v6315_v24  ;;  %v2334_v49 = vunpack.c.h.bf16 %v6179_v19  ;;  %v2203_v24 = vld [vmem:[%s6684_s12 + $0x454] sm:$0xff]  ;;  %v2544_v19 = vunpack.c.h.bf16 %v2215_v14  ;;  %v2285_v47 = vunpack.c.h.bf16 %v6278_v1 }
 0x446   :  { %3036 = vmatpush.msra.mxu3 %v2453_v7  ;;  %2889 = vmatpush.msra.mxu0 %v2360_v57  ;;  %v2404_v7 = vunpack.c.h.bf16 %v6329_v36  ;;  %v2327_v57 = vunpack.c.h.bf16 %v6193_v41  ;;  %v2199_v41 = vld [vmem:[%s6684_s12 + $0x438] sm:$0xff]  ;;  %v2537_v36 = vunpack.c.h.bf16 %v2211_v23  ;;  %v2522_v61 = vunpack.c.l.bf16 %v2203_v24  ;;  %v2175_v14 = vld [vmem:[%s6684_s12 + $0x390] sm:$0xff] }
 0x447   :  { %2908 = vmatpush.msrb.mxu2 %v2479_v37  ;;  %2890 = vmatmul.f32.vlgmr.msra.gmra.mxu0 %v5913_v9  ;;  %v2529_v37 = vunpack.c.l.bf16 %v2207_v34  ;;  %v2495_v1 = vunpack.c.h.bf16 %v2187_v58  ;;  %v2473_v23 = vunpack.c.l.bf16 %v2175_v14 }
 0x448   :  { %2968 = vmatpush.msra.mxu1 %v2368_v35  ;;  %2974 = vmatpush.msrb.mxu0 %v2578_v3  ;;  %v2397_v35 = vunpack.c.h.bf16 %v6343_v28  ;;  %v2320_v3 = vunpack.c.h.bf16 %v6208_v44  ;;  %v2195_v28 = vld [vmem:[%s6684_s12 + $0x41c] sm:$0xff]  ;;  %v2530_v44 = vunpack.c.h.bf16 %v2207_v34  ;;  %v2593_v34 = vunpack.c.h.bf16 %v6406_v6  ;;  %v2216_v6 = vld [vmem:[%s6684_s12 + $0x4b0] sm:$0xf] }
 0x449   :  { %3037 = vmatpush.msra.mxu3 %v2446_v48  ;;  %2909 = vmatpush.msrb.mxu2 %v2472_v63  ;;  %v2390_v48 = vunpack.c.h.bf16 %v6357_v46  ;;  %v2313_v63 = vunpack.c.h.bf16 %v6222_v40  ;;  %v2191_v46 = vld [vmem:[%s6684_s12 + $0x400] sm:$0xff]  ;;  %v2523_v40 = vunpack.c.h.bf16 %v2203_v24 }
 0x44a   :  { %2910 = vmatmul.f32.vlgmr.msrb.gmra.mxu2 %v5949_v42  ;;  %2969 = vmatpush.msra.mxu1 %v2361_v52  ;;  %v2515_v52 = vunpack.c.l.bf16 %v2199_v41 }
 0x44b   :  { %2975 = vmatpush.msrb.mxu0 %v2571_v15  ;;  %3008 = vmatpush.msra.mxu2 %v2592_v45  ;;  %v2306_v15 = vunpack.c.h.bf16 %v6237_v0  ;;  %v2508_v45 = vunpack.c.l.bf16 %v2195_v28  ;;  %v2516_v0 = vunpack.c.h.bf16 %v2199_v41  ;;  %v2100_v41 = vld [vmem:[%s6684_s12 + $0x184] sm:$0xf] }
 0x44c   :  { %3038 = vmatpush.msra.mxu3 %v2439_v4  ;;  %2970 = vmatmul.f32.vlgmr.msra.gmra.mxu1 %v5913_v9  ;;  %v2376_v4 = vunpack.c.h.bf16 %v6374_v10  ;;  %v2494_v10 = vunpack.c.l.bf16 %v2187_v58  ;;  %v2160_v58 = vld [vmem:[%s6684_s12 + $0x328] sm:$0xf] }
 0x44d   :  { %3054 = vmatpush.msrb.mxu1 %v2579_v2  ;;  %2976 = vmatpush.msrb.mxu0 %v2564_v25  ;;  %v2299_v2 = vunpack.c.h.bf16 %v6251_v62  ;;  %v2501_v25 = vunpack.c.l.bf16 %v2191_v46  ;;  %v2236_v62 = vld [vmem:[%s6684_s12 + $0x53c] sm:$0xf] }
 0x44e   :  { %3009 = vmatpush.msra.mxu2 %v2585_v54  ;;  %3039 = vmatpush.msra.mxu3 %v2432_v27  ;;  %v2292_v54 = vunpack.c.h.bf16 %v6264_v20  ;;  %v2509_v27 = vunpack.c.h.bf16 %v2195_v28  ;;  %v2502_v20 = vunpack.c.h.bf16 %v2191_v46  ;;  %v2204_v46 = vld [vmem:[%s6684_s12 + $0x45c] sm:$0xf] }
 0x44f   :  { %3055 = vmatpush.msrb.mxu1 %v2572_v29  ;;  %2977 = vmatpush.msrb.mxu0 %v2557_v51  ;;  %v2362_v29 = vunpack.c.h.bf16 %v6397_v13  ;;  %v2179_v51 = vld [vmem:[%s6684_s12 + $0x3ac] sm:$0xff]  ;;  %v2278_v13 = vunpack.c.h.bf16 %v6294_v60 }
 0x450   :  { %3014 = vmatpush.msrb.mxu2 %v2355_v59  ;;  %3040 = vmatpush.msra.mxu3 %v2425_v39  ;;  %v2183_v59 = vld [vmem:[%s6684_s12 + $0x3c8] sm:$0xff]  ;;  %v2580_v39 = vunpack.c.l.bf16 %v2236_v62 }
 0x451   :  { %3056 = vmatpush.msrb.mxu1 %v2565_v17  ;;  %2978 = vmatpush.msrb.mxu0 %v2550_v8  ;;  %v2228_v17 = vld [vmem:[%s6684_s12 + $0x504] sm:$0xf]  ;;  %v2573_v8 = vunpack.c.l.bf16 %v2232_v43  ;;  %v2156_v62 = vld [vmem:[%s6684_s12 + $0x30c] sm:$0xf]  ;;  %v2084_v43 = vld [vmem:[%s6684_s12 + $0x114] sm:$0xf] }
 0x452   :  { %3015 = vmatpush.msrb.mxu2 %v2348_v16  ;;  %3041 = vmatpush.msra.mxu3 %v2418_v56  ;;  %v2487_v16 = vunpack.c.l.bf16 %v2183_v59  ;;  %v2480_v56 = vunpack.c.l.bf16 %v2179_v51  ;;  %v2566_v60 = vunpack.c.l.bf16 %v2228_v17  ;;  %v2080_v17 = vld [vmem:[%s6684_s12 + $0xf8] sm:$0xf] }
 0x453   :  { %3057 = vmatpush.msrb.mxu1 %v2558_v5  ;;  %2979 = vmatpush.msrb.mxu0 %v2543_v18  ;;  %v2488_v5 = vunpack.c.h.bf16 %v2183_v59  ;;  %v2224_v18 = vld [vmem:[%s6684_s12 + $0x4e8] sm:$0xf] }
 0x454   :  { %3016 = vmatpush.msrb.mxu2 %v2341_v53  ;;  %3042 = vmatpush.msra.mxu3 %v2411_v33  ;;  %v2271_v53 = vunpack.c.h.bf16 %v6308_v22  ;;  %v2264_v33 = vunpack.c.h.bf16 %v6322_v31  ;;  %v2220_v22 = vld [vmem:[%s6684_s12 + $0x4cc] sm:$0xf]  ;;  %v2474_v31 = vunpack.c.h.bf16 %v2175_v14  ;;  %v2148_v14 = vld [vmem:[%s6684_s12 + $0x2d4] sm:$0xf] }
 0x455   :  { %3360 = vmatmul.msk.f32.vlgmr.msra.gmra.mxu2 %vm656_vm0, %v5976_v38  ;;  %3058 = vmatpush.msrb.mxu1 %v2551_v32  ;;  %v2559_v32 = vunpack.c.l.bf16 %v2224_v18  ;;  %v2552_v24 = vunpack.c.l.bf16 %v2220_v22  ;;  %v6602_v18 = vld [vmem:[%s6685_s13] sm:$0x7f] }
 0x456   :  { %3017 = vmatpush.msrb.mxu2 %v2334_v49  ;;  %2980 = vmatpush.msrb.mxu0 %v2536_v55  ;;  %v2481_v49 = vunpack.c.h.bf16 %v2179_v51  ;;  %v2257_v55 = vunpack.c.h.bf16 %v6336_v26  ;;  %v2104_v26 = vld [vmem:[%s6684_s12 + $0x1a0] sm:$0xf]  ;;  %v2152_v51 = vld [vmem:[%s6684_s12 + $0x2f0] sm:$0xf] }
 0x457   :  { %3043 = vmatpush.msra.mxu3 %v2404_v7  ;;  %3059 = vmatpush.msrb.mxu1 %v2544_v19  ;;  %v2108_v7 = vld [vmem:[%s6684_s12 + $0x1bc] sm:$0xf]  ;;  %v2072_v22 = vld [vmem:[%s6684_s12 + $0xc0] sm:$0xf] }
 0x458   :  { %3018 = vmatpush.msrb.mxu2 %v2327_v57  ;;  %2981 = vmatpush.msrb.mxu0 %v2529_v37  ;;  %v2586_v57 = vunpack.c.h.bf16 %v6419_v50  ;;  %v2172_v19 = vld [vmem:[%s6684_s12 + $0x37c] sm:$0xf]  ;;  %v2356_v37 = vunpack.c.l.bf16 %v2108_v7  ;;  %v2250_v50 = vunpack.c.h.bf16 %v6350_v12  ;;  %v2208_v12 = vld [vmem:[%s6684_s12 + $0x478] sm:$0xf] }
 0x459   :  { %3044 = vmatpush.msra.mxu3 %v2397_v35  ;;  %3060 = vmatpush.msrb.mxu1 %v2537_v36  ;;  %v2212_v35 = vld [vmem:[%s6684_s12 + $0x494] sm:$0xf]  ;;  %v2168_v36 = vld [vmem:[%s6684_s12 + $0x360] sm:$0xf] }
 0x45a   :  { %3019 = vmatpush.msrb.mxu2 %v2320_v3  ;;  %2982 = vmatpush.msrb.mxu0 %v2522_v61  ;;  %v2545_v3 = vunpack.c.l.bf16 %v2216_v6  ;;  %v2349_v61 = vunpack.c.l.bf16 %v2104_v26  ;;  %v2538_v28 = vunpack.c.l.bf16 %v2212_v35  ;;  %v2136_v26 = vld [vmem:[%s6684_s12 + $0x280] sm:$0xf] }
 0x45b   :  { %3045 = vmatpush.msra.mxu3 %v2390_v48  ;;  %3061 = vmatpush.msrb.mxu1 %v2530_v44  ;;  %v2468_v48 = vunpack.c.l.bf16 %v2172_v19  ;;  %v2096_v44 = vld [vmem:[%s6684_s12 + $0x168] sm:$0xf]  ;;  %v2293_v19 = vunpack.c.l.bf16 %v2072_v22 }
 0x45c   :  { %3020 = vmatpush.msrb.mxu2 %v2313_v63  ;;  %2983 = vmatpush.msrb.mxu0 %v2515_v52  ;;  %v2244_v63 = vld [vmem:[%s6684_s12 + $0x574] sm:$0xf]  ;;  %v2164_v52 = vld [vmem:[%s6684_s12 + $0x344] sm:$0xf] }
 0x45d   :  { %3046 = vmatpush.msra.mxu3 %v2383_v21  ;;  %3062 = vmatpush.msrb.mxu1 %v2523_v40  ;;  %v2342_v21 = vunpack.c.l.bf16 %v2100_v41  ;;  %v2240_v40 = vld [vmem:[%s6684_s12 + $0x558] sm:$0xf]  ;;  %v2132_v41 = vld [vmem:[%s6684_s12 + $0x264] sm:$0xf] }
 0x45e   :  { %3021 = vmatpush.msrb.mxu2 %v2306_v15  ;;  %2984 = vmatpush.msrb.mxu0 %v2508_v45  ;;  %v2461_v15 = vunpack.c.l.bf16 %v2168_v36  ;;  %v2531_v45 = vunpack.c.l.bf16 %v2208_v12 }
 0x45f   :  { %3047 = vmatpush.msra.mxu3 %v2376_v4  ;;  %3063 = vmatpush.msrb.mxu1 %v2516_v0  ;;  %v2594_v4 = vunpack.c.l.bf16 %v2244_v63  ;;  %v2335_v0 = vunpack.c.l.bf16 %v2096_v44  ;;  %v2128_v44 = vld [vmem:[%s6684_s12 + $0x248] sm:$0xf] }
 0x460   :  { %3022 = vmatpush.msrb.mxu2 %v2299_v2  ;;  %2985 = vmatpush.msrb.mxu0 %v2501_v25  ;;  %v2092_v2 = vld [vmem:[%s6684_s12 + $0x14c] sm:$0xf]  ;;  %v2454_v25 = vunpack.c.l.bf16 %v2164_v52 }
 0x461   :  { %3048 = vmatpush.msra.mxu3 %v2369_v11  ;;  %3064 = vmatpush.msrb.mxu1 %v2509_v27  ;;  %v2200_v11 = vld [vmem:[%s6684_s12 + $0x440] sm:$0xf]  ;;  %v2587_v27 = vunpack.c.l.bf16 %v2240_v40  ;;  %v2328_v59 = vunpack.c.l.bf16 %v2092_v2  ;;  %v2124_v40 = vld [vmem:[%s6684_s12 + $0x22c] sm:$0xf]  ;;  %v2391_v2 = vunpack.c.l.bf16 %v2128_v44 }
 0x462   :  { %3023 = vmatpush.msrb.mxu2 %v2292_v54  ;;  %2986 = vmatpush.msrb.mxu0 %v2494_v10  ;;  %v2524_v54 = vunpack.c.l.bf16 %v2204_v46  ;;  %v2088_v10 = vld [vmem:[%s6684_s12 + $0x130] sm:$0xf] }
 0x463   :  { %3049 = vmatpush.msra.mxu3 %v2362_v29  ;;  %3065 = vmatpush.msrb.mxu1 %v2502_v20  ;;  %v2447_v29 = vunpack.c.l.bf16 %v2160_v58  ;;  %v2517_v20 = vunpack.c.l.bf16 %v2200_v11  ;;  %v2056_v46 = vld [vmem:[%s6684_s12 + $0x50] sm:$0xf]  ;;  %v2052_v58 = vld [vmem:[%s6684_s12 + $0x34] sm:$0xf]  ;;  %v2384_v11 = vunpack.c.l.bf16 %v2124_v40 }
 0x464   :  { %3024 = vmatpush.msrb.mxu2 %v2285_v47  ;;  %3050 = vmatmul.f32.vlgmr.msra.gmra.mxu3 %v5913_v9  ;;  %v2196_v47 = vld [vmem:[%s6684_s12 + $0x424] sm:$0xf] }
 0x465   :  { %3134 = vmatpush.msrb.mxu3 %v2580_v39  ;;  %2987 = vmatpush.msrb.mxu0 %v2487_v16  ;;  %v2321_v39 = vunpack.c.l.bf16 %v2088_v10  ;;  %v2440_v16 = vunpack.c.l.bf16 %v2156_v62  ;;  %v2048_v10 = vld [vmem:[%s6684_s12 + $0x18] sm:$0xf]  ;;  %v2116_v62 = vld [vmem:[%s6684_s12 + $0x1f4] sm:$0xf] }
 0x466   :  { %3025 = vmatpush.msrb.mxu2 %v2278_v13  ;;  %3066 = vmatpush.msrb.mxu1 %v2495_v1  ;;  %v2192_v13 = vld [vmem:[%s6684_s12 + $0x408] sm:$0xf]  ;;  %v2510_v1 = vunpack.c.l.bf16 %v2196_v47 }
 0x467   :  { %3135 = vmatpush.msrb.mxu3 %v2573_v8  ;;  %2988 = vmatpush.msrb.mxu0 %v2480_v56  ;;  %v2314_v8 = vunpack.c.l.bf16 %v2084_v43  ;;  %v2433_v56 = vunpack.c.l.bf16 %v2152_v51  ;;  %v2370_v51 = vunpack.c.l.bf16 %v2116_v62 }
 0x468   :  { %3026 = vmatpush.msrb.mxu2 %v2271_v53  ;;  %3067 = vmatpush.msrb.mxu1 %v2488_v5  ;;  %v2188_v53 = vld [vmem:[%s6684_s12 + $0x3ec] sm:$0xf]  ;;  %v2503_v5 = vunpack.c.l.bf16 %v2192_v13  ;;  %v2598_v13 = vperm.slane %v6602_v18, 1 }
 0x469   :  { %3136 = vmatpush.msrb.mxu3 %v2566_v60  ;;  %2989 = vmatpush.msrb.mxu0 %v2473_v23  ;;  %v2076_v60 = vld [vmem:[%s6684_s12 + $0xdc] sm:$0xf]  ;;  %v2144_v23 = vld [vmem:[%s6684_s12 + $0x2b8] sm:$0xf] }
 0x46a   :  { %2990 = vmatmul.f32.vlgmr.msrb.gmra.mxu0 %v5949_v42  ;;  %3027 = vmatpush.msrb.mxu2 %v2264_v33  ;;  %v2307_v33 = vunpack.c.l.bf16 %v2080_v17  ;;  %v2419_v7 = vunpack.c.l.bf16 %v2144_v23 }
 0x46b   :  { %3068 = vmatpush.msrb.mxu1 %v2481_v49  ;;  %3088 = vmatpush.msra.mxu0 %v2593_v34  ;;  %v2426_v49 = vunpack.c.l.bf16 %v2148_v14  ;;  %v2496_v34 = vunpack.c.l.bf16 %v2188_v53 }
 0x46c   :  { %3137 = vmatpush.msrb.mxu3 %v2559_v32  ;;  %3028 = vmatpush.msrb.mxu2 %v2257_v55  ;;  %v2140_v32 = vld [vmem:[%s6684_s12 + $0x29c] sm:$0xf]  ;;  %v2300_v55 = vunpack.c.l.bf16 %v2076_v60 }
 0x46d   :  { %3069 = vmatpush.msrb.mxu1 %v2474_v31  ;;  %3089 = vmatpush.msra.mxu0 %v2586_v57  ;;  %v2180_v31 = vld [vmem:[%s6684_s12 + $0x3b4] sm:$0xf]  ;;  %v2597_v57 = vperm.slane %v6602_v18, 0 }
 0x46e   :  { %3138 = vmatpush.msrb.mxu3 %v2552_v24  ;;  %3070 = vmatmul.f32.vlgmr.msrb.gmra.mxu1 %v5949_v42  ;;  %v2068_v24 = vld [vmem:[%s6684_s12 + $0xa4] sm:$0xf]  ;;  %v2482_v35 = vunpack.c.l.bf16 %v2180_v31 }
 0x46f   :  { %3094 = vmatpush.msrb.mxu0 %v2356_v37  ;;  %3029 = vmatpush.msrb.mxu2 %v2250_v50  ;;  %v2412_v37 = vunpack.c.l.bf16 %v2140_v32  ;;  %v2176_v50 = vld [vmem:[%s6684_s12 + $0x398] sm:$0xf] }
 0x470   :  { %3139 = vmatpush.msrb.mxu3 %v2545_v3  ;;  %3030 = vmatmul.f32.vlgmr.msrb.gmra.mxu2 %v5921_v30  ;;  %v2064_v3 = vld [vmem:[%s6684_s12 + $0x88] sm:$0xf]  ;;  %v2475_v63 = vunpack.c.l.bf16 %v2176_v50 }
 0x471   :  { %3095 = vmatpush.msrb.mxu0 %v2349_v61  ;;  %3114 = vmatpush.msra.mxu2 %v2468_v48  ;;  %v2286_v61 = vunpack.c.l.bf16 %v2068_v24  ;;  %v2405_v48 = vunpack.c.l.bf16 %v2136_v26  ;;  %v2599_v26 = vperm.slane %v6602_v18, 2 }
 0x472   :  { %3140 = vmatpush.msrb.mxu3 %v2538_v28  ;;  %3361 = vmatmul.msk.f32.vlgmr.msra.gmra.mxu0 %vm656_vm0, %v5976_v38  ;;  %v2060_v28 = vld [vmem:[%s6684_s12 + $0x6c] sm:$0xf] }
 0x473   :  { %3096 = vmatpush.msrb.mxu0 %v2342_v21  ;;  %3115 = vmatpush.msra.mxu2 %v2461_v15  ;;  %v2279_v21 = vunpack.c.l.bf16 %v2064_v3  ;;  %v2398_v15 = vunpack.c.l.bf16 %v2132_v41 }
 0x474   :  { %3141 = vmatpush.msrb.mxu3 %v2531_v45  ;;  %3168 = vmatpush.msra.mxu1 %v2594_v4  ;;  %v2272_v4 = vunpack.c.l.bf16 %v2060_v28 }
 0x475   :  { %3097 = vmatpush.msrb.mxu0 %v2335_v0  ;;  %3116 = vmatpush.msra.mxu2 %v2454_v25  ;;  %v2120_v0 = vld [vmem:[%s6684_s12 + $0x210] sm:$0xf]  ;;  %v2265_v25 = vunpack.c.l.bf16 %v2056_v46 }
 0x476   :  { %3142 = vmatpush.msrb.mxu3 %v2524_v54  ;;  %3169 = vmatpush.msra.mxu1 %v2587_v27 }
 0x477   :  { %3098 = vmatpush.msrb.mxu0 %v2328_v59  ;;  %3117 = vmatpush.msra.mxu2 %v2447_v29  ;;  %v2651_v52 = vpop.f32.mrf.mxu1  ;;  %v2258_v59 = vunpack.c.l.bf16 %v2052_v58  ;;  %v2377_v29 = vunpack.c.l.bf16 %v2120_v0 }
 0x478   :  { %3362 = vmatmul.msk.f32.vlgmr.msra.gmra.mxu1 %vm656_vm0, %v5976_v38  ;;  %3143 = vmatpush.msrb.mxu3 %v2517_v20  ;;  %v2184_v38 = vld [vmem:[%s6684_s12 + $0x3d0] sm:$0xf]  ;;  %v2112_v20 = vld [vmem:[%s6684_s12 + $0x1d8] sm:$0xf]  ;;  %s3503_s12 = smov [#allocation2]  }
 0x479   :  { %3099 = vmatpush.msrb.mxu0 %v2321_v39  ;;  %3118 = vmatpush.msra.mxu2 %v2440_v16  ;;  %v2489_v6 = vunpack.c.l.bf16 %v2184_v38  ;;  %v2363_v16 = vunpack.c.l.bf16 %v2112_v20  ;;  %s3326_s5 = sshll.u32 %s3503_s12, 4  ;;  %s3327_s5 = int_to_ptr.vmem [resolvable:$true] %s3326_s5 }
 0x47a   :  { %3144 = vmatpush.msrb.mxu3 %v2510_v1 }
 0x47b   :  { %3100 = vmatpush.msrb.mxu0 %v2314_v8  ;;  %3119 = vmatpush.msra.mxu2 %v2433_v56 }
 0x47c   :  { %3145 = vmatpush.msrb.mxu3 %v2503_v5 }
 0x47d   :  { %3101 = vmatpush.msrb.mxu0 %v2307_v33  ;;  %3120 = vmatpush.msra.mxu2 %v2426_v49 }
 0x47e   :  { %3146 = vmatpush.msrb.mxu3 %v2496_v34  ;;  %v2631_v36 = vpop.f32.mrf.mxu3  ;;  %v2671_v54 = vpop.f32.mrf.mxu0 }
 0x47f   :  { %3102 = vmatpush.msrb.mxu0 %v2300_v55  ;;  %3121 = vmatpush.msra.mxu2 %v2419_v7  ;;  %v2632_v12 = vadd.f32 %v2631_v36, %v2597_v57  ;;  %v2751_v5 = vpop.f32.mrf.mxu1 }
 0x480   :  { %3147 = vmatpush.msrb.mxu3 %v2489_v6 }
 0x481   :  { %3103 = vmatpush.msrb.mxu0 %v2293_v19  ;;  %3122 = vmatpush.msra.mxu2 %v2412_v37  ;;  %v2652_v45 = vadd.f32 %v2651_v52, %v2632_v12 }
 0x482   :  { %3148 = vmatpush.msrb.mxu3 %v2482_v35 }
 0x483   :  { %3104 = vmatpush.msrb.mxu0 %v2286_v61  ;;  %3123 = vmatpush.msra.mxu2 %v2405_v48  ;;  %v2672_v27 = vadd.f32 %v2671_v54, %v2652_v45 }
 0x484   :  { %3149 = vmatpush.msrb.mxu3 %v2475_v63 }
 0x485   :  { %3105 = vmatpush.msrb.mxu0 %v2279_v21  ;;  %3124 = vmatpush.msra.mxu2 %v2398_v15 }
 0x486   :  { %3150 = vmatmul.f32.vlgmr.msrb.gmra.mxu3 %v5949_v42  ;;  %v2251_v42 = vunpack.c.l.bf16 %v2048_v10 }
 0x487   :  { %3106 = vmatpush.msrb.mxu0 %v2272_v4  ;;  %3125 = vmatpush.msra.mxu2 %v2391_v2  ;;  %v2691_v47 = vpop.f32.mrf.mxu2  ;;  %v2731_v8 = vpop.f32.mrf.mxu3 }
 0x488   :  { %v2692_v43 = vadd.f32 %v2691_v47, %v2672_v27  ;;  %v2771_v23 = vpop.f32.mrf.mxu0 }
 0x489   :  { %3107 = vmatpush.msrb.mxu0 %v2265_v25  ;;  %3126 = vmatpush.msra.mxu2 %v2384_v11  ;;  %v2600_v11 = vperm.slane %v6602_v18, 3 }
 0x48a   :  { %v3363_v39 = vmul.f32 -1.442695, %v2692_v43  ;;  %v2851_v12 = vpop.f32.mrf.mxu1 }
 0x48b   :  { %3108 = vmatpush.msrb.mxu0 %v2258_v59  ;;  %3127 = vmatpush.msra.mxu2 %v2377_v29 }
 0x48c   :  { %3438 = vpow2.f32 %v3363_v39 }
 0x48d   :  { %3109 = vmatpush.msrb.mxu0 %v2251_v42  ;;  %3128 = vmatpush.msra.mxu2 %v2370_v51 }
 0x48e   :  { %3110 = vmatmul.f32.vlgmr.msrb.gmra.mxu0 %v5921_v30 }
 0x48f   :  { %3129 = vmatpush.msra.mxu2 %v2363_v16 }
 0x490   :  { %3130 = vmatmul.f32.vlgmr.msra.gmra.mxu2 %v5913_v9  ;;  %v2711_v1 = vpop.f32.mrf.mxu2 }
 0x491   :  { %v2712_v17 = vadd.f32 %v2711_v1, %v2598_v13 }
 0x492   :  { %v3439_v14 = vpop.eup %3438 }
 0x493   :  { %v3195_v56 = vadd.f32 1.0, %v3439_v14  ;;  %v2732_v53 = vadd.f32 %v2731_v8, %v2712_v17 }
 0x495   :  { %3440 = vrcp.f32 %v3195_v56  ;;  %v2752_v60 = vadd.f32 %v2751_v5, %v2732_v53  ;;  %v3213_v30 = vand.u32 2147483648, %v3195_v56  ;;  %v3211_v9 = vand.u32 2147483647, %v3195_v56 }
 0x496   :  { %vm3207_vm1 = vweird.f32 %v3195_v56 }
 0x497   :  { %v2772_v33 = vadd.f32 %v2771_v23, %v2752_v60  ;;  %v3214_v31 = vor.u32 1.1754944e-38, %v3213_v30  ;;  %vm3212_vm3 = vcmp.eq.f32.partialorder %v3211_v9, 8.507059e+37 }
 0x499   :  { %v3364_v49 = vmul.f32 -1.442695, %v2772_v33 }
 0x49b   :  { %v3441_v38 = vpop.eup %3440  ;;  %3442 = vpow2.f32 %v3364_v49 }
 0x49c   :  { %v3203_v34 = vmul.f32 %v3441_v38, %v3195_v56  ;;  %vm3208_vm15 = vweird.f32 %v3441_v38  ;;  %v2601_v56 = vperm.slane %v6602_v18, 4 }
 0x49d   :  { %vm3209_vm2 = vmor %vm3207_vm1, %vm3208_vm15 }
 0x49e   :  { %v3204_v22 = vsub.f32 1.0, %v3203_v34 }
 0x4a0   :  { %v3205_v32 = vmul.f32 %v3441_v38, %v3204_v22 }
 0x4a1   :  { %v3443_v55 = vpop.eup %3442  ;;  %v2831_v36 = vpop.f32.mrf.mxu3 }
 0x4a2   :  { %v3206_v7 = vadd.f32 %v3441_v38, %v3205_v32  ;;  %v3196_v57 = vadd.f32 1.0, %v3443_v55  ;;  %v2791_v19 = vpop.f32.mrf.mxu0  ;;  %v2871_v25 = vpop.f32.mrf.mxu1 }
 0x4a3   :  { %v2792_v37 = vadd.f32 %v2791_v19, %v2599_v26  ;;  %v2872_v29 = vadd.f32 %v2871_v25, %v2600_v11  ;;  %v2602_v19 = vperm.slane %v6602_v18, 5 }
 0x4a4   :  { %v3210_v6 = vsel %vm3209_vm2, %v3441_v38, %v3206_v7  ;;  %3444 = vrcp.f32 %v3196_v57  ;;  %v3228_v63 = vand.u32 2147483648, %v3196_v57  ;;  %v3226_v44 = vand.u32 2147483647, %v3196_v57 }
 0x4a5   :  { %v3215_v24 = vsel %vm3212_vm3, %v3214_v31, %v3210_v6  ;;  %vm3222_vm5 = vweird.f32 %v3196_v57 }
 0x4a6   :  { %3307 = vst [vmem:[#allocation2] sm:$0xff] %v3215_v24  ;;  %v3229_v46 = vor.u32 1.1754944e-38, %v3228_v63  ;;  %vm3227_vm7 = vcmp.eq.f32.partialorder %v3226_v44, 8.507059e+37 }
 0x4aa   :  { %v3445_v50 = vpop.eup %3444 }
 0x4ab   :  { %v2811_v35 = vpop.f32.mrf.mxu2  ;;  %v3218_v3 = vmul.f32 %v3445_v50, %v3196_v57  ;;  %vm3223_vm4 = vweird.f32 %v3445_v50 }
 0x4ac   :  { %v2812_v41 = vadd.f32 %v2811_v35, %v2792_v37  ;;  %vm3224_vm6 = vmor %vm3222_vm5, %vm3223_vm4 }
 0x4ad   :  { %v3219_v61 = vsub.f32 1.0, %v3218_v3  ;;  %v2931_v13 = vpop.f32.mrf.mxu1 }
 0x4ae   :  { %v2832_v48 = vadd.f32 %v2831_v36, %v2812_v41 }
 0x4af   :  { %v3220_v28 = vmul.f32 %v3445_v50, %v3219_v61 }
 0x4b0   :  { %v2852_v52 = vadd.f32 %v2851_v12, %v2832_v48 }
 0x4b1   :  { %v3221_v21 = vadd.f32 %v3445_v50, %v3220_v28 }
 0x4b2   :  { %v3365_v15 = vmul.f32 -1.442695, %v2852_v52 }
 0x4b3   :  { %v3225_v40 = vsel %vm3224_vm6, %v3445_v50, %v3221_v21 }
 0x4b4   :  { %3446 = vpow2.f32 %v3365_v15  ;;  %v3230_v45 = vsel %vm3227_vm7, %v3229_v46, %v3225_v40 }
 0x4b5   :  { %3308 = vst [vmem:[#allocation2 + $0x8] sm:$0xff] %v3230_v45 }
 0x4ba   :  { %v3447_v4 = vpop.eup %3446 }
 0x4bb   :  { %v3197_v2 = vadd.f32 1.0, %v3447_v4 }
 0x4bd   :  { %3448 = vrcp.f32 %v3197_v2  ;;  %v3243_v27 = vand.u32 2147483648, %v3197_v2  ;;  %v3241_v62 = vand.u32 2147483647, %v3197_v2  ;;  %vm3237_vm9 = vweird.f32 %v3197_v2 }
 0x4bf   :  { %v3244_v20 = vor.u32 1.1754944e-38, %v3243_v27  ;;  %vm3242_vm11 = vcmp.eq.f32.partialorder %v3241_v62, 8.507059e+37  ;;  %v2603_v27 = vperm.slane %v6602_v18, 6 }
 0x4c3   :  { %v3449_v58 = vpop.eup %3448 }
 0x4c4   :  { %v3233_v0 = vmul.f32 %v3449_v58, %v3197_v2  ;;  %vm3238_vm8 = vweird.f32 %v3449_v58  ;;  %v2891_v59 = vpop.f32.mrf.mxu0  ;;  %v2951_v53 = vpop.f32.mrf.mxu3 }
 0x4c5   :  { %vm3239_vm10 = vmor %vm3237_vm9, %vm3238_vm8  ;;  %v2892_v42 = vadd.f32 %v2891_v59, %v2872_v29  ;;  %v2952_v5 = vadd.f32 %v2951_v53, %v2601_v56 }
 0x4c6   :  { %v3234_v54 = vsub.f32 1.0, %v3233_v0 }
 0x4c8   :  { %v3235_v10 = vmul.f32 %v3449_v58, %v3234_v54 }
 0x4c9   :  { %v2971_v23 = vpop.f32.mrf.mxu1 }
 0x4ca   :  { %v3236_v47 = vadd.f32 %v3449_v58, %v3235_v10  ;;  %v2972_v49 = vadd.f32 %v2971_v23, %v2952_v5 }
 0x4cc   :  { %v3240_v43 = vsel %vm3239_vm10, %v3449_v58, %v3236_v47 }
 0x4cd   :  { %v3245_v51 = vsel %vm3242_vm11, %v3244_v20, %v3240_v43  ;;  %v2911_v39 = vpop.f32.mrf.mxu2 }
 0x4ce   :  { %3309 = vst [vmem:[#allocation2 + $0x10] sm:$0xff] %v3245_v51  ;;  %v2912_v16 = vadd.f32 %v2911_v39, %v2892_v42 }
 0x4d0   :  { %v2932_v1 = vadd.f32 %v2931_v13, %v2912_v16 }
 0x4d2   :  { %v3366_v17 = vmul.f32 -1.442695, %v2932_v1 }
 0x4d4   :  { %3450 = vpow2.f32 %v3366_v17 }
 0x4d8   :  { %v3011_v55 = vpop.f32.mrf.mxu2 }
 0x4da   :  { %v3451_v14 = vpop.eup %3450 }
 0x4db   :  { %v3198_v8 = vadd.f32 1.0, %v3451_v14 }
 0x4dd   :  { %3452 = vrcp.f32 %v3198_v8  ;;  %v3258_v34 = vand.u32 2147483648, %v3198_v8  ;;  %v3256_v32 = vand.u32 2147483647, %v3198_v8  ;;  %vm3252_vm13 = vweird.f32 %v3198_v8 }
 0x4df   :  { %v3259_v57 = vor.u32 1.1754944e-38, %v3258_v34  ;;  %vm3257_vm15 = vcmp.eq.f32.partialorder %v3256_v32, 8.507059e+37 }
 0x4e3   :  { %v3453_v60 = vpop.eup %3452 }
 0x4e4   :  { %v3248_v33 = vmul.f32 %v3453_v60, %v3198_v8  ;;  %vm3253_vm12 = vweird.f32 %v3453_v60 }
 0x4e5   :  { %vm3254_vm14 = vmor %vm3252_vm13, %vm3253_vm12 }
 0x4e6   :  { %v3249_v38 = vsub.f32 1.0, %v3248_v33 }
 0x4e7   :  { %v2991_v22 = vpop.f32.mrf.mxu0  ;;  %v3051_v41 = vpop.f32.mrf.mxu3 }
 0x4e8   :  { %v3250_v30 = vmul.f32 %v3453_v60, %v3249_v38  ;;  %v2992_v9 = vadd.f32 %v2991_v22, %v2972_v49 }
 0x4ea   :  { %v3251_v7 = vadd.f32 %v3453_v60, %v3250_v30  ;;  %v3012_v31 = vadd.f32 %v3011_v55, %v2992_v9 }
 0x4eb   :  { %v3071_v61 = vpop.f32.mrf.mxu1 }
 0x4ec   :  { %v3255_v6 = vsel %vm3254_vm14, %v3453_v60, %v3251_v7  ;;  %v3367_v24 = vmul.f32 -1.442695, %v3012_v31 }
 0x4ed   :  { %v3260_v26 = vsel %vm3257_vm15, %v3259_v57, %v3255_v6 }
 0x4ee   :  { %3310 = vst [vmem:[#allocation2 + $0x18] sm:$0xff] %v3260_v26  ;;  %3454 = vpow2.f32 %v3367_v24 }
 0x4ef   :  { %v3091_v12 = vpop.f32.mrf.mxu0 }
 0x4f3   :  { %v3031_v37 = vpop.f32.mrf.mxu2 }
 0x4f4   :  { %v3455_v50 = vpop.eup %3454  ;;  %v3032_v35 = vadd.f32 %v3031_v37, %v2602_v19 }
 0x4f5   :  { %v3199_v3 = vadd.f32 1.0, %v3455_v50  ;;  %v3171_v14 = vpop.f32.mrf.mxu1 }
 0x4f6   :  { %v3052_v36 = vadd.f32 %v3051_v41, %v3032_v35 }
 0x4f7   :  { %3456 = vrcp.f32 %v3199_v3  ;;  %v3273_v15 = vand.u32 2147483648, %v3199_v3  ;;  %v3271_v40 = vand.u32 2147483647, %v3199_v3  ;;  %vm3267_vm2 = vweird.f32 %v3199_v3 }
 0x4f8   :  { %v3072_v48 = vadd.f32 %v3071_v61, %v3052_v36 }
 0x4f9   :  { %v3274_v2 = vor.u32 1.1754944e-38, %v3273_v15  ;;  %vm3272_vm4 = vcmp.eq.f32.partialorder %v3271_v40, 8.507059e+37 }
 0x4fa   :  { %v3092_v63 = vadd.f32 %v3091_v12, %v3072_v48 }
 0x4fc   :  { %v3368_v28 = vmul.f32 -1.442695, %v3092_v63 }
 0x4fd   :  { %v3457_v44 = vpop.eup %3456 }
 0x4fe   :  { %v3263_v52 = vmul.f32 %v3457_v44, %v3199_v3  ;;  %3458 = vpow2.f32 %v3368_v28  ;;  %vm3268_vm1 = vweird.f32 %v3457_v44 }
 0x4ff   :  { %vm3269_vm3 = vmor %vm3267_vm2, %vm3268_vm1 }
 0x500   :  { %v3264_v21 = vsub.f32 1.0, %v3263_v52 }
 0x502   :  { %v3265_v46 = vmul.f32 %v3457_v44, %v3264_v21 }
 0x504   :  { %v3459_v45 = vpop.eup %3458  ;;  %v3266_v4 = vadd.f32 %v3457_v44, %v3265_v46 }
 0x505   :  { %v3200_v58 = vadd.f32 1.0, %v3459_v45 }
 0x506   :  { %v3270_v0 = vsel %vm3269_vm3, %v3457_v44, %v3266_v4 }
 0x507   :  { %v3275_v25 = vsel %vm3272_vm4, %v3274_v2, %v3270_v0  ;;  %3460 = vrcp.f32 %v3200_v58  ;;  %v3288_v59 = vand.u32 2147483648, %v3200_v58  ;;  %v3286_v47 = vand.u32 2147483647, %v3200_v58 }
 0x508   :  { %3311 = vst [vmem:[#allocation2 + $0x20] sm:$0xff] %v3275_v25  ;;  %vm3282_vm6 = vweird.f32 %v3200_v58 }
 0x509   :  { %v3289_v39 = vor.u32 1.1754944e-38, %v3288_v59  ;;  %v3151_v16 = vpop.f32.mrf.mxu3  ;;  %vm3287_vm8 = vcmp.eq.f32.partialorder %v3286_v47, 8.507059e+37 }
 0x50b   :  { %v3111_v10 = vpop.f32.mrf.mxu0 }
 0x50c   :  { %v3112_v20 = vadd.f32 %v3111_v10, %v2603_v27 }
 0x50d   :  { %v3461_v11 = vpop.eup %3460 }
 0x50e   :  { %v3278_v54 = vmul.f32 %v3461_v11, %v3200_v58  ;;  %vm3283_vm5 = vweird.f32 %v3461_v11 }
 0x50f   :  { %vm3284_vm7 = vmor %vm3282_vm6, %vm3283_vm5 }
 0x510   :  { %v3279_v62 = vsub.f32 1.0, %v3278_v54 }
 0x512   :  { %v3280_v29 = vmul.f32 %v3461_v11, %v3279_v62 }
 0x513   :  { %v3131_v43 = vpop.f32.mrf.mxu2 }
 0x514   :  { %v3281_v42 = vadd.f32 %v3461_v11, %v3280_v29  ;;  %v3132_v51 = vadd.f32 %v3131_v43, %v3112_v20 }
 0x516   :  { %v3285_v13 = vsel %vm3284_vm7, %v3461_v11, %v3281_v42  ;;  %v3152_v1 = vadd.f32 %v3151_v16, %v3132_v51 }
 0x517   :  { %v3290_v17 = vsel %vm3287_vm8, %v3289_v39, %v3285_v13 }
 0x518   :  { %3312 = vst [vmem:[#allocation2 + $0x28] sm:$0xff] %v3290_v17  ;;  %v3172_v18 = vadd.f32 %v3171_v14, %v3152_v1 }
 0x51a   :  { %v3369_v8 = vmul.f32 -1.442695, %v3172_v18 }
 0x51c   :  { %3462 = vpow2.f32 %v3369_v8 }
 0x522   :  { %v3463_v56 = vpop.eup %3462 }
 0x523   :  { %v3201_v53 = vadd.f32 1.0, %v3463_v56 }
 0x525   :  { %3464 = vrcp.f32 %v3201_v53  ;;  %v3303_v33 = vand.u32 2147483648, %v3201_v53  ;;  %v3301_v38 = vand.u32 2147483647, %v3201_v53  ;;  %vm3297_vm10 = vweird.f32 %v3201_v53 }
 0x527   :  { %v3304_v22 = vor.u32 1.1754944e-38, %v3303_v33  ;;  %vm3302_vm12 = vcmp.eq.f32.partialorder %v3301_v38, 8.507059e+37 }
 0x52b   :  { %v3465_v5 = vpop.eup %3464 }
 0x52c   :  { %v3293_v60 = vmul.f32 %v3465_v5, %v3201_v53  ;;  %vm3298_vm9 = vweird.f32 %v3465_v5 }
 0x52d   :  { %vm3299_vm11 = vmor %vm3297_vm10, %vm3298_vm9 }
 0x52e   :  { %v3294_v23 = vsub.f32 1.0, %v3293_v60 }
 0x530   :  { %v3295_v49 = vmul.f32 %v3465_v5, %v3294_v23 }
 0x532   :  { %v3296_v34 = vadd.f32 %v3465_v5, %v3295_v49 }
 0x534   :  { %v3300_v30 = vsel %vm3299_vm11, %v3465_v5, %v3296_v34 }
 0x535   :  { %v3305_v32 = vsel %vm3302_vm12, %v3304_v22, %v3300_v30 }
 0x536   :  { %3313 = vst.msk [vmem:[#allocation2 + $0x30] sm:$0xff] %vm656_vm0, %v3305_v32 }
 0x537   :  { %3331 = dma.vmem_to_hbm [thread:$0]  %s3327_s5, 896, %s3329_s23, [#allocation3]  }
 0x538   :  { %3497 = dma.done.wait [#allocation3], 896  }
 0x539   :  { %3498 = vsyncadd [#allocation3], 4294966400 }
 0x53a   :  { %3344 = vsyncpa [#allocation3], 1 }

</bundles_post_ra>
